<compile_context>
chip_gen: v7x
topology: tpu7x:2x2x1
jax: 0.10.0
libtpu: 0.0.40
codegen_flags: <defaults>
</compile_context>

<pallas_src>
import functools

import jax
import jax.numpy as jnp
import numpy as np
from jax.experimental import pallas as pl
from jax.experimental.pallas import tpu as pltpu

EPS = 1e-5


# ---------------------------------------------------------------------------
# helpers
# ---------------------------------------------------------------------------
def _round_up(x, m):
    return ((int(x) + m - 1) // m) * m


def _pick_row_tile(m, target=2048):
    """Fixed row tile: multiple of 8, <= target, <= m (full m if m <= 8)."""
    m = int(m)
    if m <= 8:
        return m
    tm = min((max(int(target), 8) // 8) * 8, (m // 8) * 8)
    return max(tm, 8)


@functools.lru_cache(maxsize=None)
def _vmem_limit_cap():
    """~75% of physical VMEM (generation aware), with a sane fallback."""
    cap = 128 << 20
    try:
        info = pltpu.get_tpu_info()
        cap = int(getattr(info, "vmem_capacity_bytes", cap)) or cap
    except Exception:
        pass
    return max(int(0.75 * cap), 16 << 20)


def _cparams(dims, working_set_bytes):
    vmem = int(min(max(4 * int(working_set_bytes), 16 << 20), _vmem_limit_cap()))
    return pltpu.CompilerParams(dimension_semantics=dims, vmem_limit_bytes=vmem)


def _cost(flops, bytes_accessed, transcendentals=0):
    return pl.CostEstimate(flops=int(flops), transcendentals=int(transcendentals),
                           bytes_accessed=int(bytes_accessed))


# ---------------------------------------------------------------------------
# Kernel 1: expand 1x1 GEMM, accumulate BN1 batch stats, emit scale1/shift1.
#   x: (M, Ci) row-tiled; w1: (Ci, Ne) resident (already mm_dtype).
# ---------------------------------------------------------------------------
def expand_stats_kernel(x_ref, w1_ref, g1_ref, b1_ref, s1_ref, t1_ref,
                        sum_scr, sq_scr, *, inv_count, mm_dtype, m_total, tm):
    i = pl.program_id(0)

    @pl.when(i == 0)
    def _():
        sum_scr[...] = jnp.zeros_like(sum_scr)
        sq_scr[...] = jnp.zeros_like(sq_scr)

    h = jnp.dot(x_ref[...].astype(mm_dtype), w1_ref[...],
                preferred_element_type=jnp.float32)
    # mask the ragged tail so the GLOBAL statistics stay exact
    row = i * tm + jax.lax.broadcasted_iota(jnp.int32, (tm, 1), 0)
    h = jnp.where(row < m_total, h, 0.0)
    sum_scr[...] += jnp.sum(h, axis=0, keepdims=True)
    sq_scr[...] += jnp.sum(h * h, axis=0, keepdims=True)

    @pl.when(i == pl.num_programs(0) - 1)
    def _():
        mean = sum_scr[...] * inv_count
        var = sq_scr[...] * inv_count - mean * mean          # one-pass variance
        scale = g1_ref[...] * jax.lax.rsqrt(var + EPS)
        s1_ref[...] = scale
        t1_ref[...] = b1_ref[...] - mean * scale


# ---------------------------------------------------------------------------
# Kernel 2 (fused): recompute expand GEMM per image, apply BN1 scale/shift +
# ReLU, depthwise FxF conv (stride S) with the halo coming from a zero-ringed
# VMEM scratch (interior left-padded to a sublane-aligned column), write the
# raw (pre-BN2) output (possibly bf16), accumulate BN2 stats from the f32
# accumulator, emit scale2/shift2 on the last image.  The expanded activation
# never touches HBM.
# ---------------------------------------------------------------------------
def expand_dw_stats_kernel(x_ref, w1_ref, s1_ref, t1_ref, wdw_ref, g2_ref, b2_ref,
                           h2_ref, s2_ref, t2_ref,
                           pad_scr, sum_scr, sq_scr,
                           *, F, S, H, W, Ho, Wo, P, WL, inv_count, mm_dtype):
    n = pl.program_id(0)
    Ne = pad_scr.shape[-1]

    @pl.when(n == 0)
    def _():
        # zero once: the padding ring stays zero, the interior is fully
        # overwritten for every image below.
        pad_scr[...] = jnp.zeros_like(pad_scr)
        sum_scr[...] = jnp.zeros_like(sum_scr)
        sq_scr[...] = jnp.zeros_like(sq_scr)

    # --- expand 1x1 + BN1(scale/shift) + ReLU, entirely in VMEM ---
    xv = x_ref[...]
    x2d = xv if xv.ndim == 2 else xv.reshape(H * W, xv.shape[-1])
    h1 = jnp.dot(x2d.astype(mm_dtype), w1_ref[...],
                 preferred_element_type=jnp.float32)
    h1 = jnp.maximum(h1 * s1_ref[...] + t1_ref[...], 0.0)
    # interior write starts at sublane-aligned column WL
    pad_scr[P:P + H, WL:WL + W, :] = h1.reshape(H, W, Ne)

    # --- depthwise FxF conv, stride S (zero halo from the scratch ring) ---
    wdw = wdw_ref[...]
    acc = jnp.zeros((Ho, Wo, Ne), jnp.float32)
    c0 = WL - P
    if S == 1:
        for fy in range(F):
            for fx in range(F):
                tap = pad_scr[fy:fy + Ho, c0 + fx:c0 + fx + Wo, :]   # static slice
                acc = acc + tap * wdw[fy, fx].reshape(1, 1, Ne)
    else:
        padded = pad_scr[...]
        for fy in range(F):
            for fx in range(F):
                tap = jax.lax.slice(
                    padded, (fy, c0 + fx, 0),
                    (fy + (Ho - 1) * S + 1, c0 + fx + (Wo - 1) * S + 1, Ne),
                    (S, S, 1))
                acc = acc + tap * wdw[fy, fx].reshape(1, 1, Ne)

    # --- one-pass BN2 statistics (global over the whole batch, from f32) ---
    acc2d = acc.reshape(Ho * Wo, Ne)
    sum_scr[...] += jnp.sum(acc2d, axis=0, keepdims=True)
    sq_scr[...] += jnp.sum(acc2d * acc2d, axis=0, keepdims=True)

    h2_ref[...] = acc.reshape(1, Ho, Wo, Ne).astype(h2_ref.dtype)

    @pl.when(n == pl.num_programs(0) - 1)
    def _():
        mean = sum_scr[...] * inv_count
        var = sq_scr[...] * inv_count - mean * mean
        scale = g2_ref[...] * jax.lax.rsqrt(var + EPS)
        s2_ref[...] = scale
        t2_ref[...] = b2_ref[...] - mean * scale


# ---------------------------------------------------------------------------
# Kernel 3: BN2-apply + ReLU + project 1x1 GEMM, write raw (pre-BN3) output,
# accumulate BN3 stats, emit scale3/shift3.
# ---------------------------------------------------------------------------
def project_stats_kernel(h2_ref, s2_ref, t2_ref, w3_ref, g3_ref, b3_ref,
                         h3_ref, s3_ref, t3_ref, sum_scr, sq_scr,
                         *, inv_count, mm_dtype, m_total, tm):
    i = pl.program_id(0)

    @pl.when(i == 0)
    def _():
        sum_scr[...] = jnp.zeros_like(sum_scr)
        sq_scr[...] = jnp.zeros_like(sq_scr)

    p = jnp.maximum(h2_ref[...].astype(jnp.float32) * s2_ref[...] + t2_ref[...], 0.0)
    h3 = jnp.dot(p.astype(mm_dtype), w3_ref[...],
                 preferred_element_type=jnp.float32)
    h3_ref[...] = h3

    row = i * tm + jax.lax.broadcasted_iota(jnp.int32, (tm, 1), 0)
    h3m = jnp.where(row < m_total, h3, 0.0)
    sum_scr[...] += jnp.sum(h3m, axis=0, keepdims=True)
    sq_scr[...] += jnp.sum(h3m * h3m, axis=0, keepdims=True)

    @pl.when(i == pl.num_programs(0) - 1)
    def _():
        mean = sum_scr[...] * inv_count
        var = sq_scr[...] * inv_count - mean * mean
        scale = g3_ref[...] * jax.lax.rsqrt(var + EPS)
        s3_ref[...] = scale
        t3_ref[...] = b3_ref[...] - mean * scale


# ---------------------------------------------------------------------------
# Kernel 4: BN3-apply (+ residual), in place on the h3 buffer via aliasing.
# ---------------------------------------------------------------------------
def bn_apply_res_kernel(h3_ref, s3_ref, t3_ref, x_ref, o_ref):
    o_ref[...] = h3_ref[...] * s3_ref[...] + t3_ref[...] + x_ref[...]


def bn_apply_kernel(h3_ref, s3_ref, t3_ref, o_ref):
    o_ref[...] = h3_ref[...] * s3_ref[...] + t3_ref[...]


# ---------------------------------------------------------------------------
# Wrapper: full InvResBlock forward (NHWC activations)
# ---------------------------------------------------------------------------
def inv_res_block(x_nhwc, params, F, S, *,
                  mm_dtype=jnp.bfloat16, h2_dtype=jnp.bfloat16, row_tile=2048):
    w1, g1, b1, wdw, g2, b2, w3, g3, b3 = params
    N, H, W, Ni = x_nhwc.shape
    Ne = w1.shape[1]
    No = w3.shape[1]
    use_id = (Ni == No) and (S == 1)
    P = F // 2
    Ho = (H + 2 * P - F) // S + 1
    Wo = (W + 2 * P - F) // S + 1
    Hp = H + 2 * P
    WL = _round_up(P, 8)                    # sublane-aligned interior start
    WpS = WL + W + P                        # scratch width (left-pad + img + right)
    M1 = N * H * W
    M2 = N * Ho * Wo
    f32 = jnp.float32
    mm_isz = jnp.dtype(mm_dtype).itemsize
    h2_isz = jnp.dtype(h2_dtype).itemsize

    # weights cast once (bf16 MXU operands by default); BN params stay f32
    w1_mm = w1.astype(mm_dtype)
    w3_mm = w3.astype(mm_dtype)
    g1r, b1r = g1.reshape(1, Ne), b1.reshape(1, Ne)
    g2r, b2r = g2.reshape(1, Ne), b2.reshape(1, Ne)
    g3r, b3r = g3.reshape(1, No), b3.reshape(1, No)
    x2d = x_nhwc.reshape(M1, Ni)

    def small(c):
        return pl.BlockSpec((1, c), lambda i: (0, 0))

    # ---- stage 1: expand GEMM stats -> (scale1, shift1) --------------------
    tm1 = _pick_row_tile(M1, row_tile)
    grid1 = (pl.cdiv(M1, tm1),)
    s1, t1 = pl.pallas_call(
        functools.partial(expand_stats_kernel, inv_count=1.0 / M1,
                          mm_dtype=mm_dtype, m_total=M1, tm=tm1),
        grid=grid1,
        in_specs=[
            pl.BlockSpec((tm1, Ni), lambda i: (i, 0)),
            pl.BlockSpec((Ni, Ne), lambda i: (0, 0)),
            small(Ne), small(Ne),
        ],
        out_specs=[small(Ne), small(Ne)],
        out_shape=[jax.ShapeDtypeStruct((1, Ne), f32),
                   jax.ShapeDtypeStruct((1, Ne), f32)],
        scratch_shapes=[pltpu.VMEM((1, Ne), f32), pltpu.VMEM((1, Ne), f32)],
        compiler_params=_cparams(("arbitrary",),
                                 2 * 4 * tm1 * Ni + 4 * tm1 * Ne
                                 + mm_isz * Ni * Ne + 8 * 4 * Ne),
        cost_estimate=_cost(2 * M1 * Ni * Ne + 4 * M1 * Ne,
                            4 * M1 * Ni + mm_isz * Ni * Ne + 16 * Ne),
    )(x2d, w1_mm, g1r, b1r)

    # ---- stage 2: fused BN1-apply + ReLU + depthwise + BN2 stats ------------
    # feed the 2-D view of x whenever the (8,128) tiling allows it
    x_is_2d = (H * W) % 8 == 0 or N == 1
    if x_is_2d:
        x_arg = x2d
        spec_x = pl.BlockSpec((H * W, Ni), lambda n: (n, 0))
    else:
        x_arg = x_nhwc
        spec_x = pl.BlockSpec((1, H, W, Ni), lambda n: (n, 0, 0, 0))

    ws2 = (4 * Hp * WpS * Ne + 2 * 4 * H * W * Ni + 4 * H * W * Ne
           + 2 * 4 * Ho * Wo * Ne + mm_isz * Ni * Ne + 4 * F * F * Ne
           + 2 * h2_isz * Ho * Wo * Ne + 16 * 4 * Ne)
    h2_raw, s2, t2 = pl.pallas_call(
        functools.partial(expand_dw_stats_kernel, F=F, S=S, H=H, W=W,
                          Ho=Ho, Wo=Wo, P=P, WL=WL,
                          inv_count=1.0 / M2, mm_dtype=mm_dtype),
        grid=(N,),
        in_specs=[
            spec_x,
            pl.BlockSpec((Ni, Ne), lambda n: (0, 0)),
            small(Ne), small(Ne),
            pl.BlockSpec((F, F, Ne), lambda n: (0, 0, 0)),
            small(Ne), small(Ne),
        ],
        out_specs=[
            pl.BlockSpec((1, Ho, Wo, Ne), lambda n: (n, 0, 0, 0)),
            small(Ne), small(Ne),
        ],
        out_shape=[
            jax.ShapeDtypeStruct((N, Ho, Wo, Ne), h2_dtype),
            jax.ShapeDtypeStruct((1, Ne), f32),
            jax.ShapeDtypeStruct((1, Ne), f32),
        ],
        scratch_shapes=[
            pltpu.VMEM((Hp, WpS, Ne), f32),
            pltpu.VMEM((1, Ne), f32),
            pltpu.VMEM((1, Ne), f32),
        ],
        compiler_params=_cparams(("arbitrary",), ws2),
        cost_estimate=_cost(2 * M1 * Ni * Ne + 3 * M1 * Ne
                            + 2 * M2 * Ne * F * F + 4 * M2 * Ne,
                            4 * M1 * Ni + h2_isz * M2 * Ne),
    )(x_arg, w1_mm, s1, t1, wdw, g2r, b2r)

    # ---- stage 3: BN2-apply + ReLU + project GEMM + BN3 stats ---------------
    h2_2d = h2_raw.reshape(M2, Ne)
    tm2 = _pick_row_tile(M2, row_tile)
    grid2 = (pl.cdiv(M2, tm2),)
    h3_raw, s3, t3 = pl.pallas_call(
        functools.partial(project_stats_kernel, inv_count=1.0 / M2,
                          mm_dtype=mm_dtype, m_total=M2, tm=tm2),
        grid=grid2,
        in_specs=[
            pl.BlockSpec((tm2, Ne), lambda i: (i, 0)),
            small(Ne), small(Ne),
            pl.BlockSpec((Ne, No), lambda i: (0, 0)),
            small(No), small(No),
        ],
        out_specs=[
            pl.BlockSpec((tm2, No), lambda i: (i, 0)),
            small(No), small(No),
        ],
        out_shape=[
            jax.ShapeDtypeStruct((M2, No), f32),
            jax.ShapeDtypeStruct((1, No), f32),
            jax.ShapeDtypeStruct((1, No), f32),
        ],
        scratch_shapes=[pltpu.VMEM((1, No), f32), pltpu.VMEM((1, No), f32)],
        compiler_params=_cparams(("arbitrary",),
                                 2 * h2_isz * tm2 * Ne + 4 * tm2 * Ne
                                 + 2 * 4 * tm2 * No + mm_isz * Ne * No + 8 * 4 * No),
        cost_estimate=_cost(2 * M2 * Ne * No + 3 * M2 * Ne + 4 * M2 * No,
                            h2_isz * M2 * Ne + 4 * M2 * No),
    )(h2_2d, s2, t2, w3_mm, g3r, b3r)

    # ---- stage 4: BN3-apply (+ residual), in place on h3_raw ----------------
    cp4 = _cparams(("parallel",), 4 * (3 * tm2 * No + tm2 * Ni))
    if use_id:
        out2d = pl.pallas_call(
            bn_apply_res_kernel,
            grid=grid2,
            in_specs=[
                pl.BlockSpec((tm2, No), lambda i: (i, 0)),
                small(No), small(No),
                pl.BlockSpec((tm2, Ni), lambda i: (i, 0)),
            ],
            out_specs=pl.BlockSpec((tm2, No), lambda i: (i, 0)),
            out_shape=jax.ShapeDtypeStruct((M2, No), f32),
            input_output_aliases={0: 0},
            compiler_params=cp4,
            cost_estimate=_cost(3 * M2 * No, 4 * (3 * M2 * No)),
        )(h3_raw, s3, t3, x2d)
    else:
        out2d = pl.pallas_call(
            bn_apply_kernel,
            grid=grid2,
            in_specs=[
                pl.BlockSpec((tm2, No), lambda i: (i, 0)),
                small(No), small(No),
            ],
            out_specs=pl.BlockSpec((tm2, No), lambda i: (i, 0)),
            out_shape=jax.ShapeDtypeStruct((M2, No), f32),
            input_output_aliases={0: 0},
            compiler_params=cp4,
            cost_estimate=_cost(2 * M2 * No, 4 * (2 * M2 * No)),
        )(h3_raw, s3, t3)

    return out2d.reshape(N, Ho, Wo, No)


# ---------------------------------------------------------------------------
# Pure-JAX reference (training-mode BN), for correctness checking
# ---------------------------------------------------------------------------
def _bn_train(h, gamma, beta):
    mean = jnp.mean(h, axis=(0, 1, 2), keepdims=True)
    var = jnp.mean((h - mean) ** 2, axis=(0, 1, 2), keepdims=True)
    return (h - mean) / jnp.sqrt(var + EPS) * gamma + beta


def ref_forward(x_nhwc, params, F, S):
    w1, g1, b1, wdw, g2, b2, w3, g3, b3 = params
    Ni = x_nhwc.shape[-1]
    Ne = w1.shape[1]
    No = w3.shape[1]
    use_id = (Ni == No) and (S == 1)
    P = F // 2

    h = jnp.einsum("nhwi,io->nhwo", x_nhwc, w1)
    h = jax.nn.relu(_bn_train(h, g1, b1))
    h = jax.lax.conv_general_dilated(
        h, wdw.reshape(F, F, 1, Ne), window_strides=(S, S),
        padding=[(P, P), (P, P)],
        dimension_numbers=("NHWC", "HWIO", "NHWC"),
        feature_group_count=Ne)
    h = jax.nn.relu(_bn_train(h, g2, b2))
    h = jnp.einsum("nhwe,eo->nhwo", h, w3)
    h = _bn_train(h, g3, b3)
    if use_id:
        h = h + x_nhwc
    return h


# ---------------------------------------------------------------------------
# Self-test
# ---------------------------------------------------------------------------
def _make_params(key, Ni, Ne, No, F):
    ks = jax.random.split(key, 9)
    return (
        jax.random.normal(ks[0], (Ni, Ne), jnp.float32) * 0.1,    # conv1 weight
        1.0 + 0.1 * jax.random.normal(ks[1], (Ne,), jnp.float32),  # bn1 gamma
        0.1 * jax.random.normal(ks[2], (Ne,), jnp.float32),        # bn1 beta
        jax.random.normal(ks[3], (F, F, Ne), jnp.float32) * 0.1,   # depthwise weight
        1.0 + 0.1 * jax.random.normal(ks[4], (Ne,), jnp.float32),  # bn2 gamma
        0.1 * jax.random.normal(ks[5], (Ne,), jnp.float32),        # bn2 beta
        jax.random.normal(ks[6], (Ne, No), jnp.float32) * 0.1,     # conv3 weight
        1.0 + 0.1 * jax.random.normal(ks[7], (No,), jnp.float32),  # bn3 gamma
        0.1 * jax.random.normal(ks[8], (No,), jnp.float32),        # bn3 beta
    )


def _run_case(key, N, H, W, Ni, Ne, No, F, S,
              mm_dtype=jnp.bfloat16, h2_dtype=jnp.bfloat16, rtol=3e-2, atol=3e-2):
    kx, kp = jax.random.split(key)
    x_nchw = jax.random.normal(kx, (N, Ni, H, W), jnp.float32)   # PyTorch layout
    x_nhwc = jnp.transpose(x_nchw, (0, 2, 3, 1))
    params = _make_params(kp, Ni, Ne, No, F)

    fwd = jax.jit(functools.partial(inv_res_block, mm_dtype=mm_dtype,
                                    h2_dtype=h2_dtype),
                  static_argnums=(2, 3))
    out = jax.block_until_ready(fwd(x_nhwc, params, F, S))

    ref = ref_forward(x_nhwc, params, F, S)
    np.testing.assert_allclose(np.asarray(out), np.asarray(ref),
                               rtol=rtol, atol=atol)


if __name__ == "__main__":
    key = jax.random.PRNGKey(0)
    k1, k2, k3 = jax.random.split(key, 3)
    # identity branch active (Ni == No, stride 1), default bf16 fast path
    _run_case(k1, N=2, H=16, W=16, Ni=4, Ne=8, No=4, F=3, S=1)
    # no identity branch: expanded channels, stride 2 (strided-tap fallback)
    _run_case(k2, N=2, H=16, W=16, Ni=4, Ne=16, No=8, F=3, S=2)
    # full-f32 path sanity check at tight tolerance
    _run_case(k3, N=2, H=16, W=16, Ni=4, Ne=8, No=4, F=3, S=1,
              mm_dtype=jnp.float32, h2_dtype=jnp.float32, rtol=1e-3, atol=1e-3)
    print("KERNEL_OK")
</pallas_src>

<mosaic_0001>
module attributes {stable_mosaic.version = 11 : i64} {
  func.func @bn_apply_res_kernel(%arg0: i32, %arg1: memref<512x4xf32, #tpu.memory_space<vmem>>, %arg2: memref<1x4xf32, #tpu.memory_space<vmem>>, %arg3: memref<1x4xf32, #tpu.memory_space<vmem>>, %arg4: memref<512x4xf32, #tpu.memory_space<vmem>>, %arg5: memref<512x4xf32, #tpu.memory_space<vmem>>) attributes {dimension_semantics = [#tpu.dimension_semantics<parallel>], iteration_bounds = array<i64: 1>, scalar_prefetch = 0 : i64, scratch_operands = 0 : i64, tpu.core_type = #tpu.core_type<tc>, window_params = [{transform_indices = @transform_0, window_bounds = array<i64: 512, 4>}, {pipeline_mode = #tpu.pipeline_mode<synchronous>, transform_indices = @transform_1, window_bounds = array<i64: 1, 4>}, {pipeline_mode = #tpu.pipeline_mode<synchronous>, transform_indices = @transform_2, window_bounds = array<i64: 1, 4>}, {transform_indices = @transform_3, window_bounds = array<i64: 512, 4>}, {transform_indices = @transform_4, window_bounds = array<i64: 512, 4>}]} {
    %c0 = arith.constant 0 : index
    %c0_0 = arith.constant 0 : index
    %0 = vector.load %arg1[%c0, %c0_0] : memref<512x4xf32, #tpu.memory_space<vmem>>, vector<512x4xf32>
    %c0_1 = arith.constant 0 : index
    %c0_2 = arith.constant 0 : index
    %1 = vector.load %arg2[%c0_1, %c0_2] : memref<1x4xf32, #tpu.memory_space<vmem>>, vector<1x4xf32>
    %2 = vector.broadcast %1 : vector<1x4xf32> to vector<512x4xf32>
    %3 = arith.mulf %0, %2 : vector<512x4xf32>
    %c0_3 = arith.constant 0 : index
    %c0_4 = arith.constant 0 : index
    %4 = vector.load %arg3[%c0_3, %c0_4] : memref<1x4xf32, #tpu.memory_space<vmem>>, vector<1x4xf32>
    %5 = vector.broadcast %4 : vector<1x4xf32> to vector<512x4xf32>
    %6 = arith.addf %3, %5 : vector<512x4xf32>
    %c0_5 = arith.constant 0 : index
    %c0_6 = arith.constant 0 : index
    %7 = vector.load %arg4[%c0_5, %c0_6] : memref<512x4xf32, #tpu.memory_space<vmem>>, vector<512x4xf32>
    %8 = arith.addf %6, %7 : vector<512x4xf32>
    %c0_7 = arith.constant 0 : index
    %c0_8 = arith.constant 0 : index
    %9 = vector.load %arg5[%c0_7, %c0_8] : memref<512x4xf32, #tpu.memory_space<vmem>>, vector<512x4xf32>
    tpu.vector_store %arg5[%c0_7, %c0_8], %8 {strides = array<i32>} : memref<512x4xf32, #tpu.memory_space<vmem>>, vector<512x4xf32>,
    return
  }
  func.func @transform_0(%arg0: i32) -> (i32, i32) {
    %c0_i32 = arith.constant 0 : i32
    %c0_i32_0 = arith.constant 0 : i32
    return %arg0, %c0_i32 : i32, i32
  }
  func.func @transform_1(%arg0: i32) -> (i32, i32) {
    %c0_i32 = arith.constant 0 : i32
    %c0_i32_0 = arith.constant 0 : i32
    %c0_i32_1 = arith.constant 0 : i32
    return %c0_i32, %c0_i32_0 : i32, i32
  }
  func.func @transform_2(%arg0: i32) -> (i32, i32) {
    %c0_i32 = arith.constant 0 : i32
    %c0_i32_0 = arith.constant 0 : i32
    %c0_i32_1 = arith.constant 0 : i32
    return %c0_i32, %c0_i32_0 : i32, i32
  }
  func.func @transform_3(%arg0: i32) -> (i32, i32) {
    %c0_i32 = arith.constant 0 : i32
    %c0_i32_0 = arith.constant 0 : i32
    return %arg0, %c0_i32 : i32, i32
  }
  func.func @transform_4(%arg0: i32) -> (i32, i32) {
    %c0_i32 = arith.constant 0 : i32
    %c0_i32_0 = arith.constant 0 : i32
    return %arg0, %c0_i32 : i32, i32
  }
}

module attributes {stable_mosaic.version = 11 : i64} {
  func.func @expand_stats_kernel(%arg0: i32, %arg1: memref<512x4xf32, #tpu.memory_space<vmem>>, %arg2: memref<4x8xbf16, #tpu.memory_space<vmem>>, %arg3: memref<1x8xf32, #tpu.memory_space<vmem>>, %arg4: memref<1x8xf32, #tpu.memory_space<vmem>>, %arg5: memref<1x8xf32, #tpu.memory_space<vmem>>, %arg6: memref<1x8xf32, #tpu.memory_space<vmem>>, %arg7: memref<1x8xf32, #tpu.memory_space<vmem>>, %arg8: memref<1x8xf32, #tpu.memory_space<vmem>>) attributes {dimension_semantics = [#tpu.dimension_semantics<arbitrary>], iteration_bounds = array<i64: 1>, scalar_prefetch = 0 : i64, scratch_operands = 2 : i64, tpu.core_type = #tpu.core_type<tc>, window_params = [{transform_indices = @transform_0, window_bounds = array<i64: 512, 4>}, {pipeline_mode = #tpu.pipeline_mode<synchronous>, transform_indices = @transform_1, window_bounds = array<i64: 4, 8>}, {pipeline_mode = #tpu.pipeline_mode<synchronous>, transform_indices = @transform_2, window_bounds = array<i64: 1, 8>}, {pipeline_mode = #tpu.pipeline_mode<synchronous>, transform_indices = @transform_3, window_bounds = array<i64: 1, 8>}, {pipeline_mode = #tpu.pipeline_mode<synchronous>, transform_indices = @transform_4, window_bounds = array<i64: 1, 8>}, {pipeline_mode = #tpu.pipeline_mode<synchronous>, transform_indices = @transform_5, window_bounds = array<i64: 1, 8>}]} {
    %c0_i32 = arith.constant 0 : i32
    %0 = arith.cmpi eq, %arg0, %c0_i32 : i32
    %1 = arith.extui %0 : i1 to i32
    %c0_i32_0 = arith.constant 0 : i32
    %2 = arith.cmpi ne, %1, %c0_i32_0 : i32
    scf.if %2 {
      %cst_18 = arith.constant 0.000000e+00 : f32
      %31 = vector.broadcast %cst_18 : f32 to vector<1x8xf32>
      %c0_19 = arith.constant 0 : index
      %c0_20 = arith.constant 0 : index
      %32 = vector.load %arg7[%c0_19, %c0_20] : memref<1x8xf32, #tpu.memory_space<vmem>>, vector<1x8xf32>
      tpu.vector_store %arg7[%c0_19, %c0_20], %31 {strides = array<i32>} : memref<1x8xf32, #tpu.memory_space<vmem>>, vector<1x8xf32>,
      %cst_21 = arith.constant 0.000000e+00 : f32
      %33 = vector.broadcast %cst_21 : f32 to vector<1x8xf32>
      %c0_22 = arith.constant 0 : index
      %c0_23 = arith.constant 0 : index
      %34 = vector.load %arg8[%c0_22, %c0_23] : memref<1x8xf32, #tpu.memory_space<vmem>>, vector<1x8xf32>
      tpu.vector_store %arg8[%c0_22, %c0_23], %33 {strides = array<i32>} : memref<1x8xf32, #tpu.memory_space<vmem>>, vector<1x8xf32>,
    } else {
    }
    %c0 = arith.constant 0 : index
    %c0_1 = arith.constant 0 : index
    %3 = vector.load %arg1[%c0, %c0_1] : memref<512x4xf32, #tpu.memory_space<vmem>>, vector<512x4xf32>
    %4 = arith.truncf %3 : vector<512x4xf32> to vector<512x4xbf16>
    %c0_2 = arith.constant 0 : index
    %c0_3 = arith.constant 0 : index
    %5 = vector.load %arg2[%c0_2, %c0_3] : memref<4x8xbf16, #tpu.memory_space<vmem>>, vector<4x8xbf16>
    %cst = arith.constant dense<0.000000e+00> : vector<512x8xf32>
    %6 = tpu.matmul %4, %5, %cst {dimension_numbers = #tpu.dot_dimension_numbers<[1], [0], [0], [1], [0, 0, 1, 1], [], []>} : vector<512x4xbf16>, vector<4x8xbf16>, vector<512x8xf32> -> vector<512x8xf32>
    %c512_i32 = arith.constant 512 : i32
    %7 = arith.muli %arg0, %c512_i32 : i32
    %8 = tpu.iota {dimensions = array<i32: 0>} : vector<512x1xi32>
    %9 = vector.broadcast %7 : i32 to vector<512x1xi32>
    %10 = arith.addi %9, %8 : vector<512x1xi32>
    %c512_i32_4 = arith.constant 512 : i32
    %11 = vector.broadcast %c512_i32_4 : i32 to vector<512x1xi32>
    %12 = arith.cmpi slt, %10, %11 : vector<512x1xi32>
    %cst_5 = arith.constant 0.000000e+00 : f32
    %13 = vector.shape_cast %12 : vector<512x1xi1> to vector<512x1xi1>
    %14 = vector.broadcast %13 : vector<512x1xi1> to vector<512x8xi1>
    %15 = vector.broadcast %cst_5 : f32 to vector<512x8xf32>
    %16 = arith.select %14, %6, %15 : vector<512x8xi1>, vector<512x8xf32>
    %c0_6 = arith.constant 0 : index
    %c0_7 = arith.constant 0 : index
    %17 = vector.load %arg7[%c0_6, %c0_7] : memref<1x8xf32, #tpu.memory_space<vmem>>, vector<1x8xf32>
    %cst_8 = arith.constant dense<0.000000e+00> : vector<8xf32>
    %18 = vector.multi_reduction <add>, %16, %cst_8 [0] : vector<512x8xf32> to vector<8xf32>
    %19 = vector.shape_cast %18 : vector<8xf32> to vector<1x8xf32>
    %20 = arith.addf %17, %19 : vector<1x8xf32>
    %c0_9 = arith.constant 0 : index
    %c0_10 = arith.constant 0 : index
    %21 = vector.load %arg7[%c0_9, %c0_10] : memref<1x8xf32, #tpu.memory_space<vmem>>, vector<1x8xf32>
    tpu.vector_store %arg7[%c0_9, %c0_10], %20 {strides = array<i32>} : memref<1x8xf32, #tpu.memory_space<vmem>>, vector<1x8xf32>,
    %c0_11 = arith.constant 0 : index
    %c0_12 = arith.constant 0 : index
    %22 = vector.load %arg8[%c0_11, %c0_12] : memref<1x8xf32, #tpu.memory_space<vmem>>, vector<1x8xf32>
    %23 = arith.mulf %16, %16 : vector<512x8xf32>
    %cst_13 = arith.constant dense<0.000000e+00> : vector<8xf32>
    %24 = vector.multi_reduction <add>, %23, %cst_13 [0] : vector<512x8xf32> to vector<8xf32>
    %25 = vector.shape_cast %24 : vector<8xf32> to vector<1x8xf32>
    %26 = arith.addf %22, %25 : vector<1x8xf32>
    %c0_14 = arith.constant 0 : index
    %c0_15 = arith.constant 0 : index
    %27 = vector.load %arg8[%c0_14, %c0_15] : memref<1x8xf32, #tpu.memory_space<vmem>>, vector<1x8xf32>
    tpu.vector_store %arg8[%c0_14, %c0_15], %26 {strides = array<i32>} : memref<1x8xf32, #tpu.memory_space<vmem>>, vector<1x8xf32>,
    %c0_i32_16 = arith.constant 0 : i32
    %28 = arith.cmpi eq, %arg0, %c0_i32_16 : i32
    %29 = arith.extui %28 : i1 to i32
    %c0_i32_17 = arith.constant 0 : i32
    %30 = arith.cmpi ne, %29, %c0_i32_17 : i32
    scf.if %30 {
      %c0_18 = arith.constant 0 : index
      %c0_19 = arith.constant 0 : index
      %31 = vector.load %arg7[%c0_18, %c0_19] : memref<1x8xf32, #tpu.memory_space<vmem>>, vector<1x8xf32>
      %cst_20 = arith.constant 0.001953125 : f32
      %32 = vector.broadcast %cst_20 : f32 to vector<1x8xf32>
      %33 = arith.mulf %31, %32 : vector<1x8xf32>
      %c0_21 = arith.constant 0 : index
      %c0_22 = arith.constant 0 : index
      %34 = vector.load %arg8[%c0_21, %c0_22] : memref<1x8xf32, #tpu.memory_space<vmem>>, vector<1x8xf32>
      %cst_23 = arith.constant 0.001953125 : f32
      %35 = vector.broadcast %cst_23 : f32 to vector<1x8xf32>
      %36 = arith.mulf %34, %35 : vector<1x8xf32>
      %37 = arith.mulf %33, %33 : vector<1x8xf32>
      %38 = arith.subf %36, %37 : vector<1x8xf32>
      %c0_24 = arith.constant 0 : index
      %c0_25 = arith.constant 0 : index
      %39 = vector.load %arg3[%c0_24, %c0_25] : memref<1x8xf32, #tpu.memory_space<vmem>>, vector<1x8xf32>
      %cst_26 = arith.constant 9.99999974E-6 : f32
      %40 = vector.broadcast %cst_26 : f32 to vector<1x8xf32>
      %41 = arith.addf %38, %40 : vector<1x8xf32>
      %42 = math.rsqrt %41 : vector<1x8xf32>
      %43 = arith.mulf %39, %42 : vector<1x8xf32>
      %c0_27 = arith.constant 0 : index
      %c0_28 = arith.constant 0 : index
      %44 = vector.load %arg5[%c0_27, %c0_28] : memref<1x8xf32, #tpu.memory_space<vmem>>, vector<1x8xf32>
      tpu.vector_store %arg5[%c0_27, %c0_28], %43 {strides = array<i32>} : memref<1x8xf32, #tpu.memory_space<vmem>>, vector<1x8xf32>,
      %c0_29 = arith.constant 0 : index
      %c0_30 = arith.constant 0 : index
      %45 = vector.load %arg4[%c0_29, %c0_30] : memref<1x8xf32, #tpu.memory_space<vmem>>, vector<1x8xf32>
      %46 = arith.mulf %33, %43 : vector<1x8xf32>
      %47 = arith.subf %45, %46 : vector<1x8xf32>
      %c0_31 = arith.constant 0 : index
      %c0_32 = arith.constant 0 : index
      %48 = vector.load %arg6[%c0_31, %c0_32] : memref<1x8xf32, #tpu.memory_space<vmem>>, vector<1x8xf32>
      tpu.vector_store %arg6[%c0_31, %c0_32], %47 {strides = array<i32>} : memref<1x8xf32, #tpu.memory_space<vmem>>, vector<1x8xf32>,
    } else {
    }
    return
  }
  func.func @transform_0(%arg0: i32) -> (i32, i32) {
    %c0_i32 = arith.constant 0 : i32
    %c0_i32_0 = arith.constant 0 : i32
    return %arg0, %c0_i32 : i32, i32
  }
  func.func @transform_1(%arg0: i32) -> (i32, i32) {
    %c0_i32 = arith.constant 0 : i32
    %c0_i32_0 = arith.constant 0 : i32
    %c0_i32_1 = arith.constant 0 : i32
    return %c0_i32, %c0_i32_0 : i32, i32
  }
  func.func @transform_2(%arg0: i32) -> (i32, i32) {
    %c0_i32 = arith.constant 0 : i32
    %c0_i32_0 = arith.constant 0 : i32
    %c0_i32_1 = arith.constant 0 : i32
    return %c0_i32, %c0_i32_0 : i32, i32
  }
  func.func @transform_3(%arg0: i32) -> (i32, i32) {
    %c0_i32 = arith.constant 0 : i32
    %c0_i32_0 = arith.constant 0 : i32
    %c0_i32_1 = arith.constant 0 : i32
    return %c0_i32, %c0_i32_0 : i32, i32
  }
  func.func @transform_4(%arg0: i32) -> (i32, i32) {
    %c0_i32 = arith.constant 0 : i32
    %c0_i32_0 = arith.constant 0 : i32
    %c0_i32_1 = arith.constant 0 : i32
    return %c0_i32, %c0_i32_0 : i32, i32
  }
  func.func @transform_5(%arg0: i32) -> (i32, i32) {
    %c0_i32 = arith.constant 0 : i32
    %c0_i32_0 = arith.constant 0 : i32
    %c0_i32_1 = arith.constant 0 : i32
    return %c0_i32, %c0_i32_0 : i32, i32
  }
}

module attributes {stable_mosaic.version = 11 : i64} {
  func.func @project_stats_kernel(%arg0: i32, %arg1: memref<512x8xbf16, #tpu.memory_space<vmem>>, %arg2: memref<1x8xf32, #tpu.memory_space<vmem>>, %arg3: memref<1x8xf32, #tpu.memory_space<vmem>>, %arg4: memref<8x4xbf16, #tpu.memory_space<vmem>>, %arg5: memref<1x4xf32, #tpu.memory_space<vmem>>, %arg6: memref<1x4xf32, #tpu.memory_space<vmem>>, %arg7: memref<512x4xf32, #tpu.memory_space<vmem>>, %arg8: memref<1x4xf32, #tpu.memory_space<vmem>>, %arg9: memref<1x4xf32, #tpu.memory_space<vmem>>, %arg10: memref<1x4xf32, #tpu.memory_space<vmem>>, %arg11: memref<1x4xf32, #tpu.memory_space<vmem>>) attributes {dimension_semantics = [#tpu.dimension_semantics<arbitrary>], iteration_bounds = array<i64: 1>, scalar_prefetch = 0 : i64, scratch_operands = 2 : i64, tpu.core_type = #tpu.core_type<tc>, window_params = [{transform_indices = @transform_0, window_bounds = array<i64: 512, 8>}, {pipeline_mode = #tpu.pipeline_mode<synchronous>, transform_indices = @transform_1, window_bounds = array<i64: 1, 8>}, {pipeline_mode = #tpu.pipeline_mode<synchronous>, transform_indices = @transform_2, window_bounds = array<i64: 1, 8>}, {pipeline_mode = #tpu.pipeline_mode<synchronous>, transform_indices = @transform_3, window_bounds = array<i64: 8, 4>}, {pipeline_mode = #tpu.pipeline_mode<synchronous>, transform_indices = @transform_4, window_bounds = array<i64: 1, 4>}, {pipeline_mode = #tpu.pipeline_mode<synchronous>, transform_indices = @transform_5, window_bounds = array<i64: 1, 4>}, {transform_indices = @transform_6, window_bounds = array<i64: 512, 4>}, {pipeline_mode = #tpu.pipeline_mode<synchronous>, transform_indices = @transform_7, window_bounds = array<i64: 1, 4>}, {pipeline_mode = #tpu.pipeline_mode<synchronous>, transform_indices = @transform_8, window_bounds = array<i64: 1, 4>}]} {
    %c0_i32 = arith.constant 0 : i32
    %0 = arith.cmpi eq, %arg0, %c0_i32 : i32
    %1 = arith.extui %0 : i1 to i32
    %c0_i32_0 = arith.constant 0 : i32
    %2 = arith.cmpi ne, %1, %c0_i32_0 : i32
    scf.if %2 {
      %cst_25 = arith.constant 0.000000e+00 : f32
      %41 = vector.broadcast %cst_25 : f32 to vector<1x4xf32>
      %c0_26 = arith.constant 0 : index
      %c0_27 = arith.constant 0 : index
      %42 = vector.load %arg10[%c0_26, %c0_27] : memref<1x4xf32, #tpu.memory_space<vmem>>, vector<1x4xf32>
      tpu.vector_store %arg10[%c0_26, %c0_27], %41 {strides = array<i32>} : memref<1x4xf32, #tpu.memory_space<vmem>>, vector<1x4xf32>,
      %cst_28 = arith.constant 0.000000e+00 : f32
      %43 = vector.broadcast %cst_28 : f32 to vector<1x4xf32>
      %c0_29 = arith.constant 0 : index
      %c0_30 = arith.constant 0 : index
      %44 = vector.load %arg11[%c0_29, %c0_30] : memref<1x4xf32, #tpu.memory_space<vmem>>, vector<1x4xf32>
      tpu.vector_store %arg11[%c0_29, %c0_30], %43 {strides = array<i32>} : memref<1x4xf32, #tpu.memory_space<vmem>>, vector<1x4xf32>,
    } else {
    }
    %c0 = arith.constant 0 : index
    %c0_1 = arith.constant 0 : index
    %3 = vector.load %arg1[%c0, %c0_1] : memref<512x8xbf16, #tpu.memory_space<vmem>>, vector<512x8xbf16>
    %4 = arith.extf %3 : vector<512x8xbf16> to vector<512x8xf32>
    %c0_2 = arith.constant 0 : index
    %c0_3 = arith.constant 0 : index
    %5 = vector.load %arg2[%c0_2, %c0_3] : memref<1x8xf32, #tpu.memory_space<vmem>>, vector<1x8xf32>
    %6 = vector.broadcast %5 : vector<1x8xf32> to vector<512x8xf32>
    %7 = arith.mulf %4, %6 : vector<512x8xf32>
    %c0_4 = arith.constant 0 : index
    %c0_5 = arith.constant 0 : index
    %8 = vector.load %arg3[%c0_4, %c0_5] : memref<1x8xf32, #tpu.memory_space<vmem>>, vector<1x8xf32>
    %9 = vector.broadcast %8 : vector<1x8xf32> to vector<512x8xf32>
    %10 = arith.addf %7, %9 : vector<512x8xf32>
    %cst = arith.constant 0.000000e+00 : f32
    %11 = vector.broadcast %cst : f32 to vector<512x8xf32>
    %12 = arith.maximumf %10, %11 : vector<512x8xf32>
    %13 = arith.truncf %12 : vector<512x8xf32> to vector<512x8xbf16>
    %c0_6 = arith.constant 0 : index
    %c0_7 = arith.constant 0 : index
    %14 = vector.load %arg4[%c0_6, %c0_7] : memref<8x4xbf16, #tpu.memory_space<vmem>>, vector<8x4xbf16>
    %cst_8 = arith.constant dense<0.000000e+00> : vector<512x4xf32>
    %15 = tpu.matmul %13, %14, %cst_8 {dimension_numbers = #tpu.dot_dimension_numbers<[1], [0], [0], [1], [0, 0, 1, 1], [], []>} : vector<512x8xbf16>, vector<8x4xbf16>, vector<512x4xf32> -> vector<512x4xf32>
    %c0_9 = arith.constant 0 : index
    %c0_10 = arith.constant 0 : index
    %16 = vector.load %arg7[%c0_9, %c0_10] : memref<512x4xf32, #tpu.memory_space<vmem>>, vector<512x4xf32>
    tpu.vector_store %arg7[%c0_9, %c0_10], %15 {strides = array<i32>} : memref<512x4xf32, #tpu.memory_space<vmem>>, vector<512x4xf32>,
    %c512_i32 = arith.constant 512 : i32
    %17 = arith.muli %arg0, %c512_i32 : i32
    %18 = tpu.iota {dimensions = array<i32: 0>} : vector<512x1xi32>
    %19 = vector.broadcast %17 : i32 to vector<512x1xi32>
    %20 = arith.addi %19, %18 : vector<512x1xi32>
    %c512_i32_11 = arith.constant 512 : i32
    %21 = vector.broadcast %c512_i32_11 : i32 to vector<512x1xi32>
    %22 = arith.cmpi slt, %20, %21 : vector<512x1xi32>
    %cst_12 = arith.constant 0.000000e+00 : f32
    %23 = vector.shape_cast %22 : vector<512x1xi1> to vector<512x1xi1>
    %24 = vector.broadcast %23 : vector<512x1xi1> to vector<512x4xi1>
    %25 = vector.broadcast %cst_12 : f32 to vector<512x4xf32>
    %26 = arith.select %24, %15, %25 : vector<512x4xi1>, vector<512x4xf32>
    %c0_13 = arith.constant 0 : index
    %c0_14 = arith.constant 0 : index
    %27 = vector.load %arg10[%c0_13, %c0_14] : memref<1x4xf32, #tpu.memory_space<vmem>>, vector<1x4xf32>
    %cst_15 = arith.constant dense<0.000000e+00> : vector<4xf32>
    %28 = vector.multi_reduction <add>, %26, %cst_15 [0] : vector<512x4xf32> to vector<4xf32>
    %29 = vector.shape_cast %28 : vector<4xf32> to vector<1x4xf32>
    %30 = arith.addf %27, %29 : vector<1x4xf32>
    %c0_16 = arith.constant 0 : index
    %c0_17 = arith.constant 0 : index
    %31 = vector.load %arg10[%c0_16, %c0_17] : memref<1x4xf32, #tpu.memory_space<vmem>>, vector<1x4xf32>
    tpu.vector_store %arg10[%c0_16, %c0_17], %30 {strides = array<i32>} : memref<1x4xf32, #tpu.memory_space<vmem>>, vector<1x4xf32>,
    %c0_18 = arith.constant 0 : index
    %c0_19 = arith.constant 0 : index
    %32 = vector.load %arg11[%c0_18, %c0_19] : memref<1x4xf32, #tpu.memory_space<vmem>>, vector<1x4xf32>
    %33 = arith.mulf %26, %26 : vector<512x4xf32>
    %cst_20 = arith.constant dense<0.000000e+00> : vector<4xf32>
    %34 = vector.multi_reduction <add>, %33, %cst_20 [0] : vector<512x4xf32> to vector<4xf32>
    %35 = vector.shape_cast %34 : vector<4xf32> to vector<1x4xf32>
    %36 = arith.addf %32, %35 : vector<1x4xf32>
    %c0_21 = arith.constant 0 : index
    %c0_22 = arith.constant 0 : index
    %37 = vector.load %arg11[%c0_21, %c0_22] : memref<1x4xf32, #tpu.memory_space<vmem>>, vector<1x4xf32>
    tpu.vector_store %arg11[%c0_21, %c0_22], %36 {strides = array<i32>} : memref<1x4xf32, #tpu.memory_space<vmem>>, vector<1x4xf32>,
    %c0_i32_23 = arith.constant 0 : i32
    %38 = arith.cmpi eq, %arg0, %c0_i32_23 : i32
    %39 = arith.extui %38 : i1 to i32
    %c0_i32_24 = arith.constant 0 : i32
    %40 = arith.cmpi ne, %39, %c0_i32_24 : i32
    scf.if %40 {
      %c0_25 = arith.constant 0 : index
      %c0_26 = arith.constant 0 : index
      %41 = vector.load %arg10[%c0_25, %c0_26] : memref<1x4xf32, #tpu.memory_space<vmem>>, vector<1x4xf32>
      %cst_27 = arith.constant 0.001953125 : f32
      %42 = vector.broadcast %cst_27 : f32 to vector<1x4xf32>
      %43 = arith.mulf %41, %42 : vector<1x4xf32>
      %c0_28 = arith.constant 0 : index
      %c0_29 = arith.constant 0 : index
      %44 = vector.load %arg11[%c0_28, %c0_29] : memref<1x4xf32, #tpu.memory_space<vmem>>, vector<1x4xf32>
      %cst_30 = arith.constant 0.001953125 : f32
      %45 = vector.broadcast %cst_30 : f32 to vector<1x4xf32>
      %46 = arith.mulf %44, %45 : vector<1x4xf32>
      %47 = arith.mulf %43, %43 : vector<1x4xf32>
      %48 = arith.subf %46, %47 : vector<1x4xf32>
      %c0_31 = arith.constant 0 : index
      %c0_32 = arith.constant 0 : index
      %49 = vector.load %arg5[%c0_31, %c0_32] : memref<1x4xf32, #tpu.memory_space<vmem>>, vector<1x4xf32>
      %cst_33 = arith.constant 9.99999974E-6 : f32
      %50 = vector.broadcast %cst_33 : f32 to vector<1x4xf32>
      %51 = arith.addf %48, %50 : vector<1x4xf32>
      %52 = math.rsqrt %51 : vector<1x4xf32>
      %53 = arith.mulf %49, %52 : vector<1x4xf32>
      %c0_34 = arith.constant 0 : index
      %c0_35 = arith.constant 0 : index
      %54 = vector.load %arg8[%c0_34, %c0_35] : memref<1x4xf32, #tpu.memory_space<vmem>>, vector<1x4xf32>
      tpu.vector_store %arg8[%c0_34, %c0_35], %53 {strides = array<i32>} : memref<1x4xf32, #tpu.memory_space<vmem>>, vector<1x4xf32>,
      %c0_36 = arith.constant 0 : index
      %c0_37 = arith.constant 0 : index
      %55 = vector.load %arg6[%c0_36, %c0_37] : memref<1x4xf32, #tpu.memory_space<vmem>>, vector<1x4xf32>
      %56 = arith.mulf %43, %53 : vector<1x4xf32>
      %57 = arith.subf %55, %56 : vector<1x4xf32>
      %c0_38 = arith.constant 0 : index
      %c0_39 = arith.constant 0 : index
      %58 = vector.load %arg9[%c0_38, %c0_39] : memref<1x4xf32, #tpu.memory_space<vmem>>, vector<1x4xf32>
      tpu.vector_store %arg9[%c0_38, %c0_39], %57 {strides = array<i32>} : memref<1x4xf32, #tpu.memory_space<vmem>>, vector<1x4xf32>,
    } else {
    }
    return
  }
  func.func @transform_0(%arg0: i32) -> (i32, i32) {
    %c0_i32 = arith.constant 0 : i32
    %c0_i32_0 = arith.constant 0 : i32
    return %arg0, %c0_i32 : i32, i32
  }
  func.func @transform_1(%arg0: i32) -> (i32, i32) {
    %c0_i32 = arith.constant 0 : i32
    %c0_i32_0 = arith.constant 0 : i32
    %c0_i32_1 = arith.constant 0 : i32
    return %c0_i32, %c0_i32_0 : i32, i32
  }
  func.func @transform_2(%arg0: i32) -> (i32, i32) {
    %c0_i32 = arith.constant 0 : i32
    %c0_i32_0 = arith.constant 0 : i32
    %c0_i32_1 = arith.constant 0 : i32
    return %c0_i32, %c0_i32_0 : i32, i32
  }
  func.func @transform_3(%arg0: i32) -> (i32, i32) {
    %c0_i32 = arith.constant 0 : i32
    %c0_i32_0 = arith.constant 0 : i32
    %c0_i32_1 = arith.constant 0 : i32
    return %c0_i32, %c0_i32_0 : i32, i32
  }
  func.func @transform_4(%arg0: i32) -> (i32, i32) {
    %c0_i32 = arith.constant 0 : i32
    %c0_i32_0 = arith.constant 0 : i32
    %c0_i32_1 = arith.constant 0 : i32
    return %c0_i32, %c0_i32_0 : i32, i32
  }
  func.func @transform_5(%arg0: i32) -> (i32, i32) {
    %c0_i32 = arith.constant 0 : i32
    %c0_i32_0 = arith.constant 0 : i32
    %c0_i32_1 = arith.constant 0 : i32
    return %c0_i32, %c0_i32_0 : i32, i32
  }
  func.func @transform_6(%arg0: i32) -> (i32, i32) {
    %c0_i32 = arith.constant 0 : i32
    %c0_i32_0 = arith.constant 0 : i32
    return %arg0, %c0_i32 : i32, i32
  }
  func.func @transform_7(%arg0: i32) -> (i32, i32) {
    %c0_i32 = arith.constant 0 : i32
    %c0_i32_0 = arith.constant 0 : i32
    %c0_i32_1 = arith.constant 0 : i32
    return %c0_i32, %c0_i32_0 : i32, i32
  }
  func.func @transform_8(%arg0: i32) -> (i32, i32) {
    %c0_i32 = arith.constant 0 : i32
    %c0_i32_0 = arith.constant 0 : i32
    %c0_i32_1 = arith.constant 0 : i32
    return %c0_i32, %c0_i32_0 : i32, i32
  }
}

module attributes {stable_mosaic.version = 11 : i64} {
  func.func @expand_dw_stats_kernel(%arg0: i32, %arg1: memref<256x4xf32, #tpu.memory_space<vmem>>, %arg2: memref<4x8xbf16, #tpu.memory_space<vmem>>, %arg3: memref<1x8xf32, #tpu.memory_space<vmem>>, %arg4: memref<1x8xf32, #tpu.memory_space<vmem>>, %arg5: memref<3x3x8xf32, #tpu.memory_space<vmem>>, %arg6: memref<1x8xf32, #tpu.memory_space<vmem>>, %arg7: memref<1x8xf32, #tpu.memory_space<vmem>>, %arg8: memref<1x16x16x8xbf16, #tpu.memory_space<vmem>>, %arg9: memref<1x8xf32, #tpu.memory_space<vmem>>, %arg10: memref<1x8xf32, #tpu.memory_space<vmem>>, %arg11: memref<18x25x8xf32, #tpu.memory_space<vmem>>, %arg12: memref<1x8xf32, #tpu.memory_space<vmem>>, %arg13: memref<1x8xf32, #tpu.memory_space<vmem>>) attributes {dimension_semantics = [#tpu.dimension_semantics<arbitrary>], iteration_bounds = array<i64: 2>, scalar_prefetch = 0 : i64, scratch_operands = 3 : i64, tpu.core_type = #tpu.core_type<tc>, window_params = [{transform_indices = @transform_0, window_bounds = array<i64: 256, 4>}, {pipeline_mode = #tpu.pipeline_mode<synchronous>, transform_indices = @transform_1, window_bounds = array<i64: 4, 8>}, {pipeline_mode = #tpu.pipeline_mode<synchronous>, transform_indices = @transform_2, window_bounds = array<i64: 1, 8>}, {pipeline_mode = #tpu.pipeline_mode<synchronous>, transform_indices = @transform_3, window_bounds = array<i64: 1, 8>}, {pipeline_mode = #tpu.pipeline_mode<synchronous>, transform_indices = @transform_4, window_bounds = array<i64: 3, 3, 8>}, {pipeline_mode = #tpu.pipeline_mode<synchronous>, transform_indices = @transform_5, window_bounds = array<i64: 1, 8>}, {pipeline_mode = #tpu.pipeline_mode<synchronous>, transform_indices = @transform_6, window_bounds = array<i64: 1, 8>}, {transform_indices = @transform_7, window_bounds = array<i64: 1, 16, 16, 8>}, {pipeline_mode = #tpu.pipeline_mode<synchronous>, transform_indices = @transform_8, window_bounds = array<i64: 1, 8>}, {pipeline_mode = #tpu.pipeline_mode<synchronous>, transform_indices = @transform_9, window_bounds = array<i64: 1, 8>}]} {
    %c0_i32 = arith.constant 0 : i32
    %0 = arith.cmpi eq, %arg0, %c0_i32 : i32
    %1 = arith.extui %0 : i1 to i32
    %c0_i32_0 = arith.constant 0 : i32
    %2 = arith.cmpi ne, %1, %c0_i32_0 : i32
    scf.if %2 {
      %cst_53 = arith.constant 0.000000e+00 : f32
      %100 = vector.broadcast %cst_53 : f32 to vector<18x25x8xf32>
      %c0_54 = arith.constant 0 : index
      %c0_55 = arith.constant 0 : index
      %c0_56 = arith.constant 0 : index
      %101 = vector.load %arg11[%c0_54, %c0_55, %c0_56] : memref<18x25x8xf32, #tpu.memory_space<vmem>>, vector<18x25x8xf32>
      tpu.vector_store %arg11[%c0_54, %c0_55, %c0_56], %100 {strides = array<i32>} : memref<18x25x8xf32, #tpu.memory_space<vmem>>, vector<18x25x8xf32>,
      %cst_57 = arith.constant 0.000000e+00 : f32
      %102 = vector.broadcast %cst_57 : f32 to vector<1x8xf32>
      %c0_58 = arith.constant 0 : index
      %c0_59 = arith.constant 0 : index
      %103 = vector.load %arg12[%c0_58, %c0_59] : memref<1x8xf32, #tpu.memory_space<vmem>>, vector<1x8xf32>
      tpu.vector_store %arg12[%c0_58, %c0_59], %102 {strides = array<i32>} : memref<1x8xf32, #tpu.memory_space<vmem>>, vector<1x8xf32>,
      %cst_60 = arith.constant 0.000000e+00 : f32
      %104 = vector.broadcast %cst_60 : f32 to vector<1x8xf32>
      %c0_61 = arith.constant 0 : index
      %c0_62 = arith.constant 0 : index
      %105 = vector.load %arg13[%c0_61, %c0_62] : memref<1x8xf32, #tpu.memory_space<vmem>>, vector<1x8xf32>
      tpu.vector_store %arg13[%c0_61, %c0_62], %104 {strides = array<i32>} : memref<1x8xf32, #tpu.memory_space<vmem>>, vector<1x8xf32>,
    } else {
    }
    %c0 = arith.constant 0 : index
    %c0_1 = arith.constant 0 : index
    %3 = vector.load %arg1[%c0, %c0_1] : memref<256x4xf32, #tpu.memory_space<vmem>>, vector<256x4xf32>
    %4 = arith.truncf %3 : vector<256x4xf32> to vector<256x4xbf16>
    %c0_2 = arith.constant 0 : index
    %c0_3 = arith.constant 0 : index
    %5 = vector.load %arg2[%c0_2, %c0_3] : memref<4x8xbf16, #tpu.memory_space<vmem>>, vector<4x8xbf16>
    %cst = arith.constant dense<0.000000e+00> : vector<256x8xf32>
    %6 = tpu.matmul %4, %5, %cst {dimension_numbers = #tpu.dot_dimension_numbers<[1], [0], [0], [1], [0, 0, 1, 1], [], []>} : vector<256x4xbf16>, vector<4x8xbf16>, vector<256x8xf32> -> vector<256x8xf32>
    %c0_4 = arith.constant 0 : index
    %c0_5 = arith.constant 0 : index
    %7 = vector.load %arg3[%c0_4, %c0_5] : memref<1x8xf32, #tpu.memory_space<vmem>>, vector<1x8xf32>
    %8 = vector.broadcast %7 : vector<1x8xf32> to vector<256x8xf32>
    %9 = arith.mulf %6, %8 : vector<256x8xf32>
    %c0_6 = arith.constant 0 : index
    %c0_7 = arith.constant 0 : index
    %10 = vector.load %arg4[%c0_6, %c0_7] : memref<1x8xf32, #tpu.memory_space<vmem>>, vector<1x8xf32>
    %11 = vector.broadcast %10 : vector<1x8xf32> to vector<256x8xf32>
    %12 = arith.addf %9, %11 : vector<256x8xf32>
    %cst_8 = arith.constant 0.000000e+00 : f32
    %13 = vector.broadcast %cst_8 : f32 to vector<256x8xf32>
    %14 = arith.maximumf %12, %13 : vector<256x8xf32>
    %15 = vector.shape_cast %14 : vector<256x8xf32> to vector<16x16x8xf32>
    %c1 = arith.constant 1 : index
    %c8 = arith.constant 8 : index
    %c0_9 = arith.constant 0 : index
    %16 = vector.load %arg11[%c1, %c8, %c0_9] : memref<18x25x8xf32, #tpu.memory_space<vmem>>, vector<16x16x8xf32>
    tpu.vector_store %arg11[%c1, %c8, %c0_9], %15 {strides = array<i32>} : memref<18x25x8xf32, #tpu.memory_space<vmem>>, vector<16x16x8xf32>,
    %c0_10 = arith.constant 0 : index
    %c0_11 = arith.constant 0 : index
    %c0_12 = arith.constant 0 : index
    %17 = vector.load %arg5[%c0_10, %c0_11, %c0_12] : memref<3x3x8xf32, #tpu.memory_space<vmem>>, vector<3x3x8xf32>
    %cst_13 = arith.constant 0.000000e+00 : f32
    %18 = vector.broadcast %cst_13 : f32 to vector<16x16x8xf32>
    %c0_14 = arith.constant 0 : index
    %c7 = arith.constant 7 : index
    %c0_15 = arith.constant 0 : index
    %19 = vector.load %arg11[%c0_14, %c7, %c0_15] : memref<18x25x8xf32, #tpu.memory_space<vmem>>, vector<16x16x8xf32>
    %20 = vector.extract_strided_slice %17 {offsets = [0, 0, 0], sizes = [1, 1, 8], strides = [1, 1, 1]} : vector<3x3x8xf32> to vector<1x1x8xf32>
    %21 = vector.shape_cast %20 : vector<1x1x8xf32> to vector<8xf32>
    %22 = vector.shape_cast %21 : vector<8xf32> to vector<1x1x8xf32>
    %23 = vector.broadcast %22 : vector<1x1x8xf32> to vector<16x16x8xf32>
    %24 = arith.mulf %19, %23 : vector<16x16x8xf32>
    %25 = arith.addf %18, %24 : vector<16x16x8xf32>
    %c0_16 = arith.constant 0 : index
    %c8_17 = arith.constant 8 : index
    %c0_18 = arith.constant 0 : index
    %26 = vector.load %arg11[%c0_16, %c8_17, %c0_18] : memref<18x25x8xf32, #tpu.memory_space<vmem>>, vector<16x16x8xf32>
    %27 = vector.extract_strided_slice %17 {offsets = [0, 1, 0], sizes = [1, 1, 8], strides = [1, 1, 1]} : vector<3x3x8xf32> to vector<1x1x8xf32>
    %28 = vector.shape_cast %27 : vector<1x1x8xf32> to vector<8xf32>
    %29 = vector.shape_cast %28 : vector<8xf32> to vector<1x1x8xf32>
    %30 = vector.broadcast %29 : vector<1x1x8xf32> to vector<16x16x8xf32>
    %31 = arith.mulf %26, %30 : vector<16x16x8xf32>
    %32 = arith.addf %25, %31 : vector<16x16x8xf32>
    %c0_19 = arith.constant 0 : index
    %c9 = arith.constant 9 : index
    %c0_20 = arith.constant 0 : index
    %33 = vector.load %arg11[%c0_19, %c9, %c0_20] : memref<18x25x8xf32, #tpu.memory_space<vmem>>, vector<16x16x8xf32>
    %34 = vector.extract_strided_slice %17 {offsets = [0, 2, 0], sizes = [1, 1, 8], strides = [1, 1, 1]} : vector<3x3x8xf32> to vector<1x1x8xf32>
    %35 = vector.shape_cast %34 : vector<1x1x8xf32> to vector<8xf32>
    %36 = vector.shape_cast %35 : vector<8xf32> to vector<1x1x8xf32>
    %37 = vector.broadcast %36 : vector<1x1x8xf32> to vector<16x16x8xf32>
    %38 = arith.mulf %33, %37 : vector<16x16x8xf32>
    %39 = arith.addf %32, %38 : vector<16x16x8xf32>
    %c1_21 = arith.constant 1 : index
    %c7_22 = arith.constant 7 : index
    %c0_23 = arith.constant 0 : index
    %40 = vector.load %arg11[%c1_21, %c7_22, %c0_23] : memref<18x25x8xf32, #tpu.memory_space<vmem>>, vector<16x16x8xf32>
    %41 = vector.extract_strided_slice %17 {offsets = [1, 0, 0], sizes = [1, 1, 8], strides = [1, 1, 1]} : vector<3x3x8xf32> to vector<1x1x8xf32>
    %42 = vector.shape_cast %41 : vector<1x1x8xf32> to vector<8xf32>
    %43 = vector.shape_cast %42 : vector<8xf32> to vector<1x1x8xf32>
    %44 = vector.broadcast %43 : vector<1x1x8xf32> to vector<16x16x8xf32>
    %45 = arith.mulf %40, %44 : vector<16x16x8xf32>
    %46 = arith.addf %39, %45 : vector<16x16x8xf32>
    %c1_24 = arith.constant 1 : index
    %c8_25 = arith.constant 8 : index
    %c0_26 = arith.constant 0 : index
    %47 = vector.load %arg11[%c1_24, %c8_25, %c0_26] : memref<18x25x8xf32, #tpu.memory_space<vmem>>, vector<16x16x8xf32>
    %48 = vector.extract_strided_slice %17 {offsets = [1, 1, 0], sizes = [1, 1, 8], strides = [1, 1, 1]} : vector<3x3x8xf32> to vector<1x1x8xf32>
    %49 = vector.shape_cast %48 : vector<1x1x8xf32> to vector<8xf32>
    %50 = vector.shape_cast %49 : vector<8xf32> to vector<1x1x8xf32>
    %51 = vector.broadcast %50 : vector<1x1x8xf32> to vector<16x16x8xf32>
    %52 = arith.mulf %47, %51 : vector<16x16x8xf32>
    %53 = arith.addf %46, %52 : vector<16x16x8xf32>
    %c1_27 = arith.constant 1 : index
    %c9_28 = arith.constant 9 : index
    %c0_29 = arith.constant 0 : index
    %54 = vector.load %arg11[%c1_27, %c9_28, %c0_29] : memref<18x25x8xf32, #tpu.memory_space<vmem>>, vector<16x16x8xf32>
    %55 = vector.extract_strided_slice %17 {offsets = [1, 2, 0], sizes = [1, 1, 8], strides = [1, 1, 1]} : vector<3x3x8xf32> to vector<1x1x8xf32>
    %56 = vector.shape_cast %55 : vector<1x1x8xf32> to vector<8xf32>
    %57 = vector.shape_cast %56 : vector<8xf32> to vector<1x1x8xf32>
    %58 = vector.broadcast %57 : vector<1x1x8xf32> to vector<16x16x8xf32>
    %59 = arith.mulf %54, %58 : vector<16x16x8xf32>
    %60 = arith.addf %53, %59 : vector<16x16x8xf32>
    %c2 = arith.constant 2 : index
    %c7_30 = arith.constant 7 : index
    %c0_31 = arith.constant 0 : index
    %61 = vector.load %arg11[%c2, %c7_30, %c0_31] : memref<18x25x8xf32, #tpu.memory_space<vmem>>, vector<16x16x8xf32>
    %62 = vector.extract_strided_slice %17 {offsets = [2, 0, 0], sizes = [1, 1, 8], strides = [1, 1, 1]} : vector<3x3x8xf32> to vector<1x1x8xf32>
    %63 = vector.shape_cast %62 : vector<1x1x8xf32> to vector<8xf32>
    %64 = vector.shape_cast %63 : vector<8xf32> to vector<1x1x8xf32>
    %65 = vector.broadcast %64 : vector<1x1x8xf32> to vector<16x16x8xf32>
    %66 = arith.mulf %61, %65 : vector<16x16x8xf32>
    %67 = arith.addf %60, %66 : vector<16x16x8xf32>
    %c2_32 = arith.constant 2 : index
    %c8_33 = arith.constant 8 : index
    %c0_34 = arith.constant 0 : index
    %68 = vector.load %arg11[%c2_32, %c8_33, %c0_34] : memref<18x25x8xf32, #tpu.memory_space<vmem>>, vector<16x16x8xf32>
    %69 = vector.extract_strided_slice %17 {offsets = [2, 1, 0], sizes = [1, 1, 8], strides = [1, 1, 1]} : vector<3x3x8xf32> to vector<1x1x8xf32>
    %70 = vector.shape_cast %69 : vector<1x1x8xf32> to vector<8xf32>
    %71 = vector.shape_cast %70 : vector<8xf32> to vector<1x1x8xf32>
    %72 = vector.broadcast %71 : vector<1x1x8xf32> to vector<16x16x8xf32>
    %73 = arith.mulf %68, %72 : vector<16x16x8xf32>
    %74 = arith.addf %67, %73 : vector<16x16x8xf32>
    %c2_35 = arith.constant 2 : index
    %c9_36 = arith.constant 9 : index
    %c0_37 = arith.constant 0 : index
    %75 = vector.load %arg11[%c2_35, %c9_36, %c0_37] : memref<18x25x8xf32, #tpu.memory_space<vmem>>, vector<16x16x8xf32>
    %76 = vector.extract_strided_slice %17 {offsets = [2, 2, 0], sizes = [1, 1, 8], strides = [1, 1, 1]} : vector<3x3x8xf32> to vector<1x1x8xf32>
    %77 = vector.shape_cast %76 : vector<1x1x8xf32> to vector<8xf32>
    %78 = vector.shape_cast %77 : vector<8xf32> to vector<1x1x8xf32>
    %79 = vector.broadcast %78 : vector<1x1x8xf32> to vector<16x16x8xf32>
    %80 = arith.mulf %75, %79 : vector<16x16x8xf32>
    %81 = arith.addf %74, %80 : vector<16x16x8xf32>
    %82 = vector.shape_cast %81 : vector<16x16x8xf32> to vector<256x8xf32>
    %c0_38 = arith.constant 0 : index
    %c0_39 = arith.constant 0 : index
    %83 = vector.load %arg12[%c0_38, %c0_39] : memref<1x8xf32, #tpu.memory_space<vmem>>, vector<1x8xf32>
    %cst_40 = arith.constant dense<0.000000e+00> : vector<8xf32>
    %84 = vector.multi_reduction <add>, %82, %cst_40 [0] : vector<256x8xf32> to vector<8xf32>
    %85 = vector.shape_cast %84 : vector<8xf32> to vector<1x8xf32>
    %86 = arith.addf %83, %85 : vector<1x8xf32>
    %c0_41 = arith.constant 0 : index
    %c0_42 = arith.constant 0 : index
    %87 = vector.load %arg12[%c0_41, %c0_42] : memref<1x8xf32, #tpu.memory_space<vmem>>, vector<1x8xf32>
    tpu.vector_store %arg12[%c0_41, %c0_42], %86 {strides = array<i32>} : memref<1x8xf32, #tpu.memory_space<vmem>>, vector<1x8xf32>,
    %c0_43 = arith.constant 0 : index
    %c0_44 = arith.constant 0 : index
    %88 = vector.load %arg13[%c0_43, %c0_44] : memref<1x8xf32, #tpu.memory_space<vmem>>, vector<1x8xf32>
    %89 = arith.mulf %82, %82 : vector<256x8xf32>
    %cst_45 = arith.constant dense<0.000000e+00> : vector<8xf32>
    %90 = vector.multi_reduction <add>, %89, %cst_45 [0] : vector<256x8xf32> to vector<8xf32>
    %91 = vector.shape_cast %90 : vector<8xf32> to vector<1x8xf32>
    %92 = arith.addf %88, %91 : vector<1x8xf32>
    %c0_46 = arith.constant 0 : index
    %c0_47 = arith.constant 0 : index
    %93 = vector.load %arg13[%c0_46, %c0_47] : memref<1x8xf32, #tpu.memory_space<vmem>>, vector<1x8xf32>
    tpu.vector_store %arg13[%c0_46, %c0_47], %92 {strides = array<i32>} : memref<1x8xf32, #tpu.memory_space<vmem>>, vector<1x8xf32>,
    %94 = vector.shape_cast %81 : vector<16x16x8xf32> to vector<1x16x16x8xf32>
    %95 = arith.truncf %94 : vector<1x16x16x8xf32> to vector<1x16x16x8xbf16>
    %c0_48 = arith.constant 0 : index
    %c0_49 = arith.constant 0 : index
    %c0_50 = arith.constant 0 : index
    %c0_51 = arith.constant 0 : index
    %96 = vector.load %arg8[%c0_48, %c0_49, %c0_50, %c0_51] : memref<1x16x16x8xbf16, #tpu.memory_space<vmem>>, vector<1x16x16x8xbf16>
    tpu.vector_store %arg8[%c0_48, %c0_49, %c0_50, %c0_51], %95 {strides = array<i32>} : memref<1x16x16x8xbf16, #tpu.memory_space<vmem>>, vector<1x16x16x8xbf16>,
    %c1_i32 = arith.constant 1 : i32
    %97 = arith.cmpi eq, %arg0, %c1_i32 : i32
    %98 = arith.extui %97 : i1 to i32
    %c0_i32_52 = arith.constant 0 : i32
    %99 = arith.cmpi ne, %98, %c0_i32_52 : i32
    scf.if %99 {
      %c0_53 = arith.constant 0 : index
      %c0_54 = arith.constant 0 : index
      %100 = vector.load %arg12[%c0_53, %c0_54] : memref<1x8xf32, #tpu.memory_space<vmem>>, vector<1x8xf32>
      %cst_55 = arith.constant 0.001953125 : f32
      %101 = vector.broadcast %cst_55 : f32 to vector<1x8xf32>
      %102 = arith.mulf %100, %101 : vector<1x8xf32>
      %c0_56 = arith.constant 0 : index
      %c0_57 = arith.constant 0 : index
      %103 = vector.load %arg13[%c0_56, %c0_57] : memref<1x8xf32, #tpu.memory_space<vmem>>, vector<1x8xf32>
      %cst_58 = arith.constant 0.001953125 : f32
      %104 = vector.broadcast %cst_58 : f32 to vector<1x8xf32>
      %105 = arith.mulf %103, %104 : vector<1x8xf32>
      %106 = arith.mulf %102, %102 : vector<1x8xf32>
      %107 = arith.subf %105, %106 : vector<1x8xf32>
      %c0_59 = arith.constant 0 : index
      %c0_60 = arith.constant 0 : index
      %108 = vector.load %arg6[%c0_59, %c0_60] : memref<1x8xf32, #tpu.memory_space<vmem>>, vector<1x8xf32>
      %cst_61 = arith.constant 9.99999974E-6 : f32
      %109 = vector.broadcast %cst_61 : f32 to vector<1x8xf32>
      %110 = arith.addf %107, %109 : vector<1x8xf32>
      %111 = math.rsqrt %110 : vector<1x8xf32>
      %112 = arith.mulf %108, %111 : vector<1x8xf32>
      %c0_62 = arith.constant 0 : index
      %c0_63 = arith.constant 0 : index
      %113 = vector.load %arg9[%c0_62, %c0_63] : memref<1x8xf32, #tpu.memory_space<vmem>>, vector<1x8xf32>
      tpu.vector_store %arg9[%c0_62, %c0_63], %112 {strides = array<i32>} : memref<1x8xf32, #tpu.memory_space<vmem>>, vector<1x8xf32>,
      %c0_64 = arith.constant 0 : index
      %c0_65 = arith.constant 0 : index
      %114 = vector.load %arg7[%c0_64, %c0_65] : memref<1x8xf32, #tpu.memory_space<vmem>>, vector<1x8xf32>
      %115 = arith.mulf %102, %112 : vector<1x8xf32>
      %116 = arith.subf %114, %115 : vector<1x8xf32>
      %c0_66 = arith.constant 0 : index
      %c0_67 = arith.constant 0 : index
      %117 = vector.load %arg10[%c0_66, %c0_67] : memref<1x8xf32, #tpu.memory_space<vmem>>, vector<1x8xf32>
      tpu.vector_store %arg10[%c0_66, %c0_67], %116 {strides = array<i32>} : memref<1x8xf32, #tpu.memory_space<vmem>>, vector<1x8xf32>,
    } else {
    }
    return
  }
  func.func @transform_0(%arg0: i32) -> (i32, i32) {
    %c0_i32 = arith.constant 0 : i32
    %c0_i32_0 = arith.constant 0 : i32
    return %arg0, %c0_i32 : i32, i32
  }
  func.func @transform_1(%arg0: i32) -> (i32, i32) {
    %c0_i32 = arith.constant 0 : i32
    %c0_i32_0 = arith.constant 0 : i32
    %c0_i32_1 = arith.constant 0 : i32
    return %c0_i32, %c0_i32_0 : i32, i32
  }
  func.func @transform_2(%arg0: i32) -> (i32, i32) {
    %c0_i32 = arith.constant 0 : i32
    %c0_i32_0 = arith.constant 0 : i32
    %c0_i32_1 = arith.constant 0 : i32
    return %c0_i32, %c0_i32_0 : i32, i32
  }
  func.func @transform_3(%arg0: i32) -> (i32, i32) {
    %c0_i32 = arith.constant 0 : i32
    %c0_i32_0 = arith.constant 0 : i32
    %c0_i32_1 = arith.constant 0 : i32
    return %c0_i32, %c0_i32_0 : i32, i32
  }
  func.func @transform_4(%arg0: i32) -> (i32, i32, i32) {
    %c0_i32 = arith.constant 0 : i32
    %c0_i32_0 = arith.constant 0 : i32
    %c0_i32_1 = arith.constant 0 : i32
    %c0_i32_2 = arith.constant 0 : i32
    return %c0_i32, %c0_i32_0, %c0_i32_1 : i32, i32, i32
  }
  func.func @transform_5(%arg0: i32) -> (i32, i32) {
    %c0_i32 = arith.constant 0 : i32
    %c0_i32_0 = arith.constant 0 : i32
    %c0_i32_1 = arith.constant 0 : i32
    return %c0_i32, %c0_i32_0 : i32, i32
  }
  func.func @transform_6(%arg0: i32) -> (i32, i32) {
    %c0_i32 = arith.constant 0 : i32
    %c0_i32_0 = arith.constant 0 : i32
    %c0_i32_1 = arith.constant 0 : i32
    return %c0_i32, %c0_i32_0 : i32, i32
  }
  func.func @transform_7(%arg0: i32) -> (i32, i32, i32, i32) {
    %c0_i32 = arith.constant 0 : i32
    %c0_i32_0 = arith.constant 0 : i32
    %c0_i32_1 = arith.constant 0 : i32
    %c0_i32_2 = arith.constant 0 : i32
    return %arg0, %c0_i32, %c0_i32_0, %c0_i32_1 : i32, i32, i32, i32
  }
  func.func @transform_8(%arg0: i32) -> (i32, i32) {
    %c0_i32 = arith.constant 0 : i32
    %c0_i32_0 = arith.constant 0 : i32
    %c0_i32_1 = arith.constant 0 : i32
    return %c0_i32, %c0_i32_0 : i32, i32
  }
  func.func @transform_9(%arg0: i32) -> (i32, i32) {
    %c0_i32 = arith.constant 0 : i32
    %c0_i32_0 = arith.constant 0 : i32
    %c0_i32_1 = arith.constant 0 : i32
    return %c0_i32, %c0_i32_0 : i32, i32
  }
}

</mosaic_0001>

<bundles_post_ra>
// kernel: inv_res_block.7
= control target key start
LH: loop header
LB: loop body
LE: loop exit
PB: predicated region body
PF: predicated region fallthrough
CT: control target
= control target key end

     0   :  { %vm351_vm0 = vcmask 31744   ;;  %s1225_s0 = inlined_call_operand.vmem [shape: f32[512,4], index: 0, kind: input, shape index: {}, may-alias: {0,4}]   ;;  %s1226_s1 = inlined_call_operand.vmem [shape: f32[1,4], index: 1, kind: input, shape index: {}]   ;;  %s1227_s2 = inlined_call_operand.vmem [shape: f32[1,4], index: 2, kind: input, shape index: {}]   ;;  %s1228_s3 = inlined_call_operand.vmem [shape: f32[512,4], index: 3, kind: input, shape index: {}]   ;;  %s1229_s4 = inlined_call_operand.vmem [shape: f32[512,4], index: 4, kind: output, shape index: {}, may-alias: {0,4}]  }
   0x1   :  { %v17_v0 = vld [vmem:[%s1225_s0] sm:$0xff]  ;;  %v18_v4 = vld [vmem:[%s1225_s0 + $0x8] sm:$0xff]  ;;  %v19_v7 = vld [vmem:[%s1225_s0 + $0x10] sm:$0xff] }
   0x2   :  { %v453_v1 = vld [vmem:[%s1226_s1] ss:$0 sm:$0xff]  ;;  %v20_v8 = vld [vmem:[%s1225_s0 + $0x18] sm:$0xff]  ;;  %v224_v10 = vld [vmem:[%s1228_s3 + $0x8] sm:$0xff] }
   0x3   :  { %v458_v2 = vld [vmem:[%s1227_s2] ss:$0 sm:$0xff]  ;;  %v88_v3 = vmul.f32 %v453_v1, %v17_v0  ;;  %v89_v6 = vmul.f32 %v453_v1, %v18_v4  ;;  %v90_v11 = vmul.f32 %v453_v1, %v19_v7  ;;  %v225_v12 = vld [vmem:[%s1228_s3 + $0x10] sm:$0xff]  ;;  %v91_v13 = vmul.f32 %v453_v1, %v20_v8  ;;  %v226_v16 = vld [vmem:[%s1228_s3 + $0x18] sm:$0xff] }
   0x4   :  { %v223_v5 = vld [vmem:[%s1228_s3] sm:$0xff]  ;;  %v22_v18 = vld [vmem:[%s1225_s0 + $0x28] sm:$0xff]  ;;  %v23_v19 = vld [vmem:[%s1225_s0 + $0x30] sm:$0xff] }
   0x5   :  { %v159_v9 = vadd.f32 %v458_v2, %v88_v3  ;;  %v21_v14 = vld [vmem:[%s1225_s0 + $0x20] sm:$0xff]  ;;  %v160_v15 = vadd.f32 %v458_v2, %v89_v6  ;;  %v161_v21 = vadd.f32 %v458_v2, %v90_v11  ;;  %v162_v22 = vadd.f32 %v458_v2, %v91_v13  ;;  %v24_v25 = vld [vmem:[%s1225_s0 + $0x38] sm:$0xff]  ;;  %v228_v28 = vld [vmem:[%s1228_s3 + $0x28] sm:$0xff] }
   0x6   :  { %v92_v17 = vmul.f32 %v453_v1, %v21_v14  ;;  %v227_v23 = vld [vmem:[%s1228_s3 + $0x20] sm:$0xff]  ;;  %v93_v24 = vmul.f32 %v453_v1, %v22_v18  ;;  %v94_v29 = vmul.f32 %v453_v1, %v23_v19  ;;  %v95_v30 = vmul.f32 %v453_v1, %v24_v25  ;;  %v26_v32 = vld [vmem:[%s1225_s0 + $0x48] sm:$0xff]  ;;  %v229_v36 = vld [vmem:[%s1228_s3 + $0x30] sm:$0xff] }
   0x7   :  { %v287_v20 = vadd.f32 %v223_v5, %v159_v9  ;;  %v288_v26 = vadd.f32 %v224_v10, %v160_v15  ;;  %v25_v31 = vld [vmem:[%s1225_s0 + $0x40] sm:$0xff]  ;;  %v289_v33 = vadd.f32 %v225_v12, %v161_v21  ;;  %v290_v34 = vadd.f32 %v226_v16, %v162_v22  ;;  %v230_v37 = vld [vmem:[%s1228_s3 + $0x38] sm:$0xff]  ;;  %v232_v49 = vld [vmem:[%s1228_s3 + $0x48] sm:$0xff] }
   0x8   :  { %v163_v27 = vadd.f32 %v458_v2, %v92_v17  ;;  %v164_v35 = vadd.f32 %v458_v2, %v93_v24  ;;  %v96_v38 = vmul.f32 %v453_v1, %v25_v31  ;;  %v165_v41 = vadd.f32 %v458_v2, %v94_v29  ;;  %v231_v43 = vld [vmem:[%s1228_s3 + $0x40] sm:$0xff]  ;;  %v233_v51 = vld [vmem:[%s1228_s3 + $0x50] sm:$0xff]  ;;  %v234_v57 = vld [vmem:[%s1228_s3 + $0x58] sm:$0xff] }
   0x9   :  { %352 = vst.msk [vmem:[%s1229_s4] sm:$0xff] %vm351_vm0, %v287_v20  ;;  %v166_v42 = vadd.f32 %v458_v2, %v95_v30  ;;  %v97_v44 = vmul.f32 %v453_v1, %v26_v32  ;;  %v235_v0 = vld [vmem:[%s1228_s3 + $0x60] sm:$0xff]  ;;  %v236_v7 = vld [vmem:[%s1228_s3 + $0x68] sm:$0xff]  ;;  %v237_v15 = vld [vmem:[%s1228_s3 + $0x70] sm:$0xff] }
   0xa   :  { %v291_v40 = vadd.f32 %v227_v23, %v163_v27  ;;  %v292_v47 = vadd.f32 %v228_v28, %v164_v35  ;;  %v167_v48 = vadd.f32 %v458_v2, %v96_v38  ;;  %v293_v54 = vadd.f32 %v229_v36, %v165_v41  ;;  %v238_v16 = vld [vmem:[%s1228_s3 + $0x78] sm:$0xff]  ;;  %v239_v22 = vld [vmem:[%s1228_s3 + $0x80] sm:$0xff]  ;;  %v240_v28 = vld [vmem:[%s1228_s3 + $0x88] sm:$0xff] }
   0xb   :  { %v294_v55 = vadd.f32 %v230_v37, %v166_v42  ;;  %v168_v56 = vadd.f32 %v458_v2, %v97_v44  ;;  %v241_v30 = vld [vmem:[%s1228_s3 + $0x90] sm:$0xff]  ;;  %v242_v36 = vld [vmem:[%s1228_s3 + $0x98] sm:$0xff] }
   0xc   :  { %v295_v61 = vadd.f32 %v231_v43, %v167_v48  ;;  %v243_v43 = vld [vmem:[%s1228_s3 + $0xa0] sm:$0xff]  ;;  %v244_v48 = vld [vmem:[%s1228_s3 + $0xa8] sm:$0xff] }
   0xd   :  { %v296_v5 = vadd.f32 %v232_v49, %v168_v56  ;;  %v245_v56 = vld [vmem:[%s1228_s3 + $0xb0] sm:$0xff] }
  0x10   :  { %v27_v39 = vld [vmem:[%s1225_s0 + $0x50] sm:$0xff] }
  0x11   :  { %353 = vst.msk [vmem:[%s1229_s4 + $0x8] sm:$0xff] %vm351_vm0, %v288_v26  ;;  %v98_v50 = vmul.f32 %v453_v1, %v27_v39 }
  0x13   :  { %v169_v62 = vadd.f32 %v458_v2, %v98_v50 }
  0x15   :  { %v297_v12 = vadd.f32 %v233_v51, %v169_v62 }
  0x18   :  { %v28_v45 = vld [vmem:[%s1225_s0 + $0x58] sm:$0xff]  ;;  %v29_v46 = vld [vmem:[%s1225_s0 + $0x60] sm:$0xff] }
  0x19   :  { %354 = vst.msk [vmem:[%s1229_s4 + $0x10] sm:$0xff] %vm351_vm0, %v289_v33  ;;  %355 = vst.msk [vmem:[%s1229_s4 + $0x18] sm:$0xff] %vm351_vm0, %v290_v34  ;;  %v99_v52 = vmul.f32 %v453_v1, %v28_v45  ;;  %v100_v58 = vmul.f32 %v453_v1, %v29_v46 }
  0x1b   :  { %v170_v63 = vadd.f32 %v458_v2, %v99_v52  ;;  %v171_v6 = vadd.f32 %v458_v2, %v100_v58 }
  0x1d   :  { %v298_v13 = vadd.f32 %v234_v57, %v170_v63  ;;  %v299_v19 = vadd.f32 %v235_v0, %v171_v6  ;;  %v246_v57 = vld [vmem:[%s1228_s3 + $0xb8] sm:$0xff]  ;;  %v247_v63 = vld [vmem:[%s1228_s3 + $0xc0] sm:$0xff]  ;;  %v248_v6 = vld [vmem:[%s1228_s3 + $0xc8] sm:$0xff] }
  0x20   :  { %v30_v53 = vld [vmem:[%s1225_s0 + $0x68] sm:$0xff] }
  0x21   :  { %356 = vst.msk [vmem:[%s1229_s4 + $0x20] sm:$0xff] %vm351_vm0, %v291_v40  ;;  %v101_v3 = vmul.f32 %v453_v1, %v30_v53 }
  0x23   :  { %v172_v14 = vadd.f32 %v458_v2, %v101_v3 }
  0x25   :  { %v300_v26 = vadd.f32 %v236_v7, %v172_v14  ;;  %v249_v14 = vld [vmem:[%s1228_s3 + $0xd0] sm:$0xff] }
  0x28   :  { %v31_v59 = vld [vmem:[%s1225_s0 + $0x70] sm:$0xff]  ;;  %v32_v60 = vld [vmem:[%s1225_s0 + $0x78] sm:$0xff] }
  0x29   :  { %357 = vst.msk [vmem:[%s1229_s4 + $0x28] sm:$0xff] %vm351_vm0, %v292_v47  ;;  %v102_v8 = vmul.f32 %v453_v1, %v31_v59  ;;  %v103_v9 = vmul.f32 %v453_v1, %v32_v60 }
  0x2b   :  { %v173_v20 = vadd.f32 %v458_v2, %v102_v8  ;;  %v174_v21 = vadd.f32 %v458_v2, %v103_v9 }
  0x2d   :  { %v301_v33 = vadd.f32 %v237_v15, %v173_v20  ;;  %v302_v34 = vadd.f32 %v238_v16, %v174_v21  ;;  %v250_v15 = vld [vmem:[%s1228_s3 + $0xd8] sm:$0xff]  ;;  %v251_v21 = vld [vmem:[%s1228_s3 + $0xe0] sm:$0xff] }
  0x30   :  { %v33_v4 = vld [vmem:[%s1225_s0 + $0x80] sm:$0xff] }
  0x31   :  { %358 = vst.msk [vmem:[%s1229_s4 + $0x30] sm:$0xff] %vm351_vm0, %v293_v54  ;;  %359 = vst.msk [vmem:[%s1229_s4 + $0x38] sm:$0xff] %vm351_vm0, %v294_v55  ;;  %v104_v17 = vmul.f32 %v453_v1, %v33_v4 }
  0x33   :  { %v175_v27 = vadd.f32 %v458_v2, %v104_v17 }
  0x35   :  { %v303_v40 = vadd.f32 %v239_v22, %v175_v27 }
  0x38   :  { %v34_v10 = vld [vmem:[%s1225_s0 + $0x88] sm:$0xff]  ;;  %v35_v11 = vld [vmem:[%s1225_s0 + $0x90] sm:$0xff] }
  0x39   :  { %360 = vst.msk [vmem:[%s1229_s4 + $0x40] sm:$0xff] %vm351_vm0, %v295_v61  ;;  %v105_v23 = vmul.f32 %v453_v1, %v34_v10  ;;  %v106_v29 = vmul.f32 %v453_v1, %v35_v11 }
  0x3b   :  { %v176_v35 = vadd.f32 %v458_v2, %v105_v23  ;;  %v177_v41 = vadd.f32 %v458_v2, %v106_v29 }
  0x3d   :  { %v304_v46 = vadd.f32 %v240_v28, %v176_v35  ;;  %v305_v53 = vadd.f32 %v241_v30, %v177_v41  ;;  %v254_v35 = vld [vmem:[%s1228_s3 + $0xf8] sm:$0xff]  ;;  %v255_v41 = vld [vmem:[%s1228_s3 + $0x100] sm:$0xff] }
  0x40   :  { %v36_v18 = vld [vmem:[%s1225_s0 + $0x98] sm:$0xff] }
  0x41   :  { %361 = vst.msk [vmem:[%s1229_s4 + $0x48] sm:$0xff] %vm351_vm0, %v296_v5  ;;  %v107_v31 = vmul.f32 %v453_v1, %v36_v18 }
  0x43   :  { %v178_v42 = vadd.f32 %v458_v2, %v107_v31 }
  0x45   :  { %v306_v54 = vadd.f32 %v242_v36, %v178_v42 }
  0x48   :  { %v37_v24 = vld [vmem:[%s1225_s0 + $0xa0] sm:$0xff]  ;;  %v38_v25 = vld [vmem:[%s1225_s0 + $0xa8] sm:$0xff] }
  0x49   :  { %362 = vst.msk [vmem:[%s1229_s4 + $0x50] sm:$0xff] %vm351_vm0, %v297_v12  ;;  %363 = vst.msk [vmem:[%s1229_s4 + $0x58] sm:$0xff] %vm351_vm0, %v298_v13  ;;  %v108_v37 = vmul.f32 %v453_v1, %v37_v24  ;;  %v109_v44 = vmul.f32 %v453_v1, %v38_v25 }
  0x4b   :  { %v179_v47 = vadd.f32 %v458_v2, %v108_v37  ;;  %v180_v55 = vadd.f32 %v458_v2, %v109_v44 }
  0x4d   :  { %v307_v60 = vadd.f32 %v243_v43, %v179_v47  ;;  %v308_v4 = vadd.f32 %v244_v48, %v180_v55  ;;  %v258_v55 = vld [vmem:[%s1228_s3 + $0x118] sm:$0xff] }
  0x50   :  { %v39_v32 = vld [vmem:[%s1225_s0 + $0xb0] sm:$0xff] }
  0x51   :  { %364 = vst.msk [vmem:[%s1229_s4 + $0x60] sm:$0xff] %vm351_vm0, %v299_v19  ;;  %v110_v49 = vmul.f32 %v453_v1, %v39_v32 }
  0x53   :  { %v181_v61 = vadd.f32 %v458_v2, %v110_v49 }
  0x55   :  { %v309_v11 = vadd.f32 %v245_v56, %v181_v61  ;;  %v259_v61 = vld [vmem:[%s1228_s3 + $0x120] sm:$0xff] }
  0x58   :  { %v40_v38 = vld [vmem:[%s1225_s0 + $0xb8] sm:$0xff]  ;;  %v41_v39 = vld [vmem:[%s1225_s0 + $0xc0] sm:$0xff] }
  0x59   :  { %365 = vst.msk [vmem:[%s1229_s4 + $0x68] sm:$0xff] %vm351_vm0, %v300_v26  ;;  %v111_v50 = vmul.f32 %v453_v1, %v40_v38  ;;  %v112_v58 = vmul.f32 %v453_v1, %v41_v39  ;;  %v252_v26 = vld [vmem:[%s1228_s3 + $0xe8] sm:$0xff] }
  0x5b   :  { %v182_v62 = vadd.f32 %v458_v2, %v111_v50  ;;  %v183_v5 = vadd.f32 %v458_v2, %v112_v58 }
  0x5d   :  { %v310_v12 = vadd.f32 %v246_v57, %v182_v62  ;;  %v311_v18 = vadd.f32 %v247_v63, %v183_v5 }
  0x60   :  { %v42_v45 = vld [vmem:[%s1225_s0 + $0xc8] sm:$0xff] }
  0x61   :  { %366 = vst.msk [vmem:[%s1229_s4 + $0x70] sm:$0xff] %vm351_vm0, %v301_v33  ;;  %367 = vst.msk [vmem:[%s1229_s4 + $0x78] sm:$0xff] %vm351_vm0, %v302_v34  ;;  %v113_v0 = vmul.f32 %v453_v1, %v42_v45  ;;  %v253_v34 = vld [vmem:[%s1228_s3 + $0xf0] sm:$0xff] }
  0x63   :  { %v184_v13 = vadd.f32 %v458_v2, %v113_v0 }
  0x65   :  { %v312_v24 = vadd.f32 %v248_v6, %v184_v13  ;;  %v262_v13 = vld [vmem:[%s1228_s3 + $0x138] sm:$0xff] }
  0x68   :  { %v43_v51 = vld [vmem:[%s1225_s0 + $0xd0] sm:$0xff]  ;;  %v44_v52 = vld [vmem:[%s1225_s0 + $0xd8] sm:$0xff] }
  0x69   :  { %368 = vst.msk [vmem:[%s1229_s4 + $0x80] sm:$0xff] %vm351_vm0, %v303_v40  ;;  %v114_v7 = vmul.f32 %v453_v1, %v43_v51  ;;  %v115_v8 = vmul.f32 %v453_v1, %v44_v52 }
  0x6b   :  { %v185_v19 = vadd.f32 %v458_v2, %v114_v7  ;;  %v186_v20 = vadd.f32 %v458_v2, %v115_v8 }
  0x6d   :  { %v313_v31 = vadd.f32 %v249_v14, %v185_v19  ;;  %v314_v32 = vadd.f32 %v250_v15, %v186_v20  ;;  %v263_v19 = vld [vmem:[%s1228_s3 + $0x140] sm:$0xff] }
  0x70   :  { %v45_v59 = vld [vmem:[%s1225_s0 + $0xe0] sm:$0xff] }
  0x71   :  { %369 = vst.msk [vmem:[%s1229_s4 + $0x88] sm:$0xff] %vm351_vm0, %v304_v46  ;;  %v116_v16 = vmul.f32 %v453_v1, %v45_v59  ;;  %v256_v46 = vld [vmem:[%s1228_s3 + $0x108] sm:$0xff] }
  0x73   :  { %v187_v25 = vadd.f32 %v458_v2, %v116_v16 }
  0x75   :  { %v315_v38 = vadd.f32 %v251_v21, %v187_v25 }
  0x78   :  { %v46_v3 = vld [vmem:[%s1225_s0 + $0xe8] sm:$0xff] }
  0x79   :  { %370 = vst.msk [vmem:[%s1229_s4 + $0x90] sm:$0xff] %vm351_vm0, %v305_v53  ;;  %371 = vst.msk [vmem:[%s1229_s4 + $0x98] sm:$0xff] %vm351_vm0, %v306_v54  ;;  %v117_v22 = vmul.f32 %v453_v1, %v46_v3  ;;  %v257_v54 = vld [vmem:[%s1228_s3 + $0x110] sm:$0xff] }
  0x7b   :  { %v188_v33 = vadd.f32 %v458_v2, %v117_v22 }
  0x7d   :  { %v316_v44 = vadd.f32 %v252_v26, %v188_v33  ;;  %v266_v33 = vld [vmem:[%s1228_s3 + $0x158] sm:$0xff] }
  0x80   :  { %v47_v9 = vld [vmem:[%s1225_s0 + $0xf0] sm:$0xff]  ;;  %v48_v10 = vld [vmem:[%s1225_s0 + $0xf8] sm:$0xff] }
  0x81   :  { %372 = vst.msk [vmem:[%s1229_s4 + $0xa0] sm:$0xff] %vm351_vm0, %v307_v60  ;;  %v118_v27 = vmul.f32 %v453_v1, %v47_v9  ;;  %v119_v28 = vmul.f32 %v453_v1, %v48_v10 }
  0x83   :  { %v189_v39 = vadd.f32 %v458_v2, %v118_v27  ;;  %v190_v40 = vadd.f32 %v458_v2, %v119_v28 }
  0x85   :  { %v317_v51 = vadd.f32 %v253_v34, %v189_v39  ;;  %v318_v52 = vadd.f32 %v254_v35, %v190_v40  ;;  %v267_v39 = vld [vmem:[%s1228_s3 + $0x160] sm:$0xff] }
  0x88   :  { %v49_v17 = vld [vmem:[%s1225_s0 + $0x100] sm:$0xff] }
  0x89   :  { %373 = vst.msk [vmem:[%s1229_s4 + $0xa8] sm:$0xff] %vm351_vm0, %v308_v4  ;;  %v120_v36 = vmul.f32 %v453_v1, %v49_v17  ;;  %v260_v4 = vld [vmem:[%s1228_s3 + $0x128] sm:$0xff] }
  0x8b   :  { %v191_v45 = vadd.f32 %v458_v2, %v120_v36 }
  0x8d   :  { %v319_v58 = vadd.f32 %v255_v41, %v191_v45 }
  0x90   :  { %v50_v23 = vld [vmem:[%s1225_s0 + $0x108] sm:$0xff] }
  0x91   :  { %374 = vst.msk [vmem:[%s1229_s4 + $0xb0] sm:$0xff] %vm351_vm0, %v309_v11  ;;  %375 = vst.msk [vmem:[%s1229_s4 + $0xb8] sm:$0xff] %vm351_vm0, %v310_v12  ;;  %v121_v42 = vmul.f32 %v453_v1, %v50_v23  ;;  %v261_v12 = vld [vmem:[%s1228_s3 + $0x130] sm:$0xff] }
  0x93   :  { %v192_v53 = vadd.f32 %v458_v2, %v121_v42 }
  0x95   :  { %v320_v0 = vadd.f32 %v256_v46, %v192_v53  ;;  %v270_v53 = vld [vmem:[%s1228_s3 + $0x178] sm:$0xff] }
  0x98   :  { %v51_v29 = vld [vmem:[%s1225_s0 + $0x110] sm:$0xff]  ;;  %v52_v30 = vld [vmem:[%s1225_s0 + $0x118] sm:$0xff] }
  0x99   :  { %376 = vst.msk [vmem:[%s1229_s4 + $0xc0] sm:$0xff] %vm351_vm0, %v311_v18  ;;  %v122_v47 = vmul.f32 %v453_v1, %v51_v29  ;;  %v123_v48 = vmul.f32 %v453_v1, %v52_v30 }
  0x9b   :  { %v193_v59 = vadd.f32 %v458_v2, %v122_v47  ;;  %v194_v60 = vadd.f32 %v458_v2, %v123_v48 }
  0x9d   :  { %v321_v9 = vadd.f32 %v257_v54, %v193_v59  ;;  %v322_v10 = vadd.f32 %v258_v55, %v194_v60  ;;  %v271_v59 = vld [vmem:[%s1228_s3 + $0x180] sm:$0xff] }
  0xa0   :  { %v53_v37 = vld [vmem:[%s1225_s0 + $0x120] sm:$0xff] }
  0xa1   :  { %377 = vst.msk [vmem:[%s1229_s4 + $0xc8] sm:$0xff] %vm351_vm0, %v312_v24  ;;  %v124_v56 = vmul.f32 %v453_v1, %v53_v37  ;;  %v264_v24 = vld [vmem:[%s1228_s3 + $0x148] sm:$0xff] }
  0xa3   :  { %v195_v3 = vadd.f32 %v458_v2, %v124_v56 }
  0xa5   :  { %v323_v16 = vadd.f32 %v259_v61, %v195_v3 }
  0xa8   :  { %v54_v43 = vld [vmem:[%s1225_s0 + $0x128] sm:$0xff] }
  0xa9   :  { %378 = vst.msk [vmem:[%s1229_s4 + $0xd0] sm:$0xff] %vm351_vm0, %v313_v31  ;;  %379 = vst.msk [vmem:[%s1229_s4 + $0xd8] sm:$0xff] %vm351_vm0, %v314_v32  ;;  %v125_v62 = vmul.f32 %v453_v1, %v54_v43  ;;  %v265_v32 = vld [vmem:[%s1228_s3 + $0x150] sm:$0xff] }
  0xab   :  { %v196_v11 = vadd.f32 %v458_v2, %v125_v62 }
  0xad   :  { %v324_v22 = vadd.f32 %v260_v4, %v196_v11  ;;  %v274_v11 = vld [vmem:[%s1228_s3 + $0x198] sm:$0xff] }
  0xb0   :  { %v55_v49 = vld [vmem:[%s1225_s0 + $0x130] sm:$0xff]  ;;  %v56_v50 = vld [vmem:[%s1225_s0 + $0x138] sm:$0xff] }
  0xb1   :  { %380 = vst.msk [vmem:[%s1229_s4 + $0xe0] sm:$0xff] %vm351_vm0, %v315_v38  ;;  %v126_v5 = vmul.f32 %v453_v1, %v55_v49  ;;  %v127_v6 = vmul.f32 %v453_v1, %v56_v50 }
  0xb3   :  { %v197_v17 = vadd.f32 %v458_v2, %v126_v5  ;;  %v198_v18 = vadd.f32 %v458_v2, %v127_v6 }
  0xb5   :  { %v325_v29 = vadd.f32 %v261_v12, %v197_v17  ;;  %v326_v30 = vadd.f32 %v262_v13, %v198_v18  ;;  %v275_v17 = vld [vmem:[%s1228_s3 + $0x1a0] sm:$0xff] }
  0xb8   :  { %v57_v57 = vld [vmem:[%s1225_s0 + $0x140] sm:$0xff] }
  0xb9   :  { %381 = vst.msk [vmem:[%s1229_s4 + $0xe8] sm:$0xff] %vm351_vm0, %v316_v44  ;;  %v128_v14 = vmul.f32 %v453_v1, %v57_v57  ;;  %v268_v44 = vld [vmem:[%s1228_s3 + $0x168] sm:$0xff] }
  0xbb   :  { %v199_v23 = vadd.f32 %v458_v2, %v128_v14 }
  0xbd   :  { %v327_v36 = vadd.f32 %v263_v19, %v199_v23 }
  0xc0   :  { %v58_v63 = vld [vmem:[%s1225_s0 + $0x148] sm:$0xff] }
  0xc1   :  { %382 = vst.msk [vmem:[%s1229_s4 + $0xf0] sm:$0xff] %vm351_vm0, %v317_v51  ;;  %383 = vst.msk [vmem:[%s1229_s4 + $0xf8] sm:$0xff] %vm351_vm0, %v318_v52  ;;  %v129_v20 = vmul.f32 %v453_v1, %v58_v63  ;;  %v269_v52 = vld [vmem:[%s1228_s3 + $0x170] sm:$0xff] }
  0xc3   :  { %v200_v31 = vadd.f32 %v458_v2, %v129_v20 }
  0xc5   :  { %v328_v42 = vadd.f32 %v264_v24, %v200_v31  ;;  %v278_v31 = vld [vmem:[%s1228_s3 + $0x1b8] sm:$0xff] }
  0xc8   :  { %v59_v7 = vld [vmem:[%s1225_s0 + $0x150] sm:$0xff]  ;;  %v60_v8 = vld [vmem:[%s1225_s0 + $0x158] sm:$0xff] }
  0xc9   :  { %384 = vst.msk [vmem:[%s1229_s4 + $0x100] sm:$0xff] %vm351_vm0, %v319_v58  ;;  %v130_v25 = vmul.f32 %v453_v1, %v59_v7  ;;  %v131_v26 = vmul.f32 %v453_v1, %v60_v8 }
  0xcb   :  { %v201_v37 = vadd.f32 %v458_v2, %v130_v25  ;;  %v202_v38 = vadd.f32 %v458_v2, %v131_v26 }
  0xcd   :  { %v329_v49 = vadd.f32 %v265_v32, %v201_v37  ;;  %v330_v50 = vadd.f32 %v266_v33, %v202_v38  ;;  %v279_v37 = vld [vmem:[%s1228_s3 + $0x1c0] sm:$0xff] }
  0xd0   :  { %v61_v15 = vld [vmem:[%s1225_s0 + $0x160] sm:$0xff] }
  0xd1   :  { %385 = vst.msk [vmem:[%s1229_s4 + $0x108] sm:$0xff] %vm351_vm0, %v320_v0  ;;  %v132_v34 = vmul.f32 %v453_v1, %v61_v15  ;;  %v272_v0 = vld [vmem:[%s1228_s3 + $0x188] sm:$0xff] }
  0xd3   :  { %v203_v43 = vadd.f32 %v458_v2, %v132_v34 }
  0xd5   :  { %v331_v56 = vadd.f32 %v267_v39, %v203_v43 }
  0xd8   :  { %v62_v21 = vld [vmem:[%s1225_s0 + $0x168] sm:$0xff] }
  0xd9   :  { %386 = vst.msk [vmem:[%s1229_s4 + $0x110] sm:$0xff] %vm351_vm0, %v321_v9  ;;  %387 = vst.msk [vmem:[%s1229_s4 + $0x118] sm:$0xff] %vm351_vm0, %v322_v10  ;;  %v133_v40 = vmul.f32 %v453_v1, %v62_v21  ;;  %v273_v10 = vld [vmem:[%s1228_s3 + $0x190] sm:$0xff] }
  0xdb   :  { %v204_v51 = vadd.f32 %v458_v2, %v133_v40 }
  0xdd   :  { %v332_v62 = vadd.f32 %v268_v44, %v204_v51  ;;  %v282_v51 = vld [vmem:[%s1228_s3 + $0x1d8] sm:$0xff] }
  0xe0   :  { %v63_v27 = vld [vmem:[%s1225_s0 + $0x170] sm:$0xff]  ;;  %v64_v28 = vld [vmem:[%s1225_s0 + $0x178] sm:$0xff] }
  0xe1   :  { %388 = vst.msk [vmem:[%s1229_s4 + $0x120] sm:$0xff] %vm351_vm0, %v323_v16  ;;  %v134_v45 = vmul.f32 %v453_v1, %v63_v27  ;;  %v135_v46 = vmul.f32 %v453_v1, %v64_v28 }
  0xe3   :  { %v205_v57 = vadd.f32 %v458_v2, %v134_v45  ;;  %v206_v58 = vadd.f32 %v458_v2, %v135_v46 }
  0xe5   :  { %v333_v7 = vadd.f32 %v269_v52, %v205_v57  ;;  %v334_v8 = vadd.f32 %v270_v53, %v206_v58 }
  0xe8   :  { %v65_v35 = vld [vmem:[%s1225_s0 + $0x180] sm:$0xff] }
  0xe9   :  { %389 = vst.msk [vmem:[%s1229_s4 + $0x128] sm:$0xff] %vm351_vm0, %v324_v22  ;;  %v136_v54 = vmul.f32 %v453_v1, %v65_v35  ;;  %v276_v22 = vld [vmem:[%s1228_s3 + $0x1a8] sm:$0xff] }
  0xeb   :  { %v207_v63 = vadd.f32 %v458_v2, %v136_v54 }
  0xed   :  { %v335_v14 = vadd.f32 %v271_v59, %v207_v63 }
  0xf0   :  { %v66_v41 = vld [vmem:[%s1225_s0 + $0x188] sm:$0xff] }
  0xf1   :  { %390 = vst.msk [vmem:[%s1229_s4 + $0x130] sm:$0xff] %vm351_vm0, %v325_v29  ;;  %391 = vst.msk [vmem:[%s1229_s4 + $0x138] sm:$0xff] %vm351_vm0, %v326_v30  ;;  %v137_v60 = vmul.f32 %v453_v1, %v66_v41  ;;  %v277_v30 = vld [vmem:[%s1228_s3 + $0x1b0] sm:$0xff] }
  0xf3   :  { %v208_v9 = vadd.f32 %v458_v2, %v137_v60  ;;  %v284_v60 = vld [vmem:[%s1228_s3 + $0x1e8] sm:$0xff] }
  0xf5   :  { %v336_v20 = vadd.f32 %v272_v0, %v208_v9 }
  0xf8   :  { %v67_v47 = vld [vmem:[%s1225_s0 + $0x190] sm:$0xff]  ;;  %v68_v48 = vld [vmem:[%s1225_s0 + $0x198] sm:$0xff] }
  0xf9   :  { %392 = vst.msk [vmem:[%s1229_s4 + $0x140] sm:$0xff] %vm351_vm0, %v327_v36  ;;  %v138_v3 = vmul.f32 %v453_v1, %v67_v47  ;;  %v139_v4 = vmul.f32 %v453_v1, %v68_v48 }
  0xfb   :  { %v209_v15 = vadd.f32 %v458_v2, %v138_v3  ;;  %v210_v16 = vadd.f32 %v458_v2, %v139_v4  ;;  %v285_v4 = vld [vmem:[%s1228_s3 + $0x1f0] sm:$0xff] }
  0xfd   :  { %v337_v27 = vadd.f32 %v273_v10, %v209_v15  ;;  %v338_v28 = vadd.f32 %v274_v11, %v210_v16 }
 0x100   :  { %v69_v55 = vld [vmem:[%s1225_s0 + $0x1a0] sm:$0xff] }
 0x101   :  { %393 = vst.msk [vmem:[%s1229_s4 + $0x148] sm:$0xff] %vm351_vm0, %v328_v42  ;;  %v140_v12 = vmul.f32 %v453_v1, %v69_v55  ;;  %v280_v42 = vld [vmem:[%s1228_s3 + $0x1c8] sm:$0xff] }
 0x103   :  { %v211_v21 = vadd.f32 %v458_v2, %v140_v12 }
 0x105   :  { %v339_v34 = vadd.f32 %v275_v17, %v211_v21 }
 0x108   :  { %v70_v61 = vld [vmem:[%s1225_s0 + $0x1a8] sm:$0xff] }
 0x109   :  { %394 = vst.msk [vmem:[%s1229_s4 + $0x150] sm:$0xff] %vm351_vm0, %v329_v49  ;;  %395 = vst.msk [vmem:[%s1229_s4 + $0x158] sm:$0xff] %vm351_vm0, %v330_v50  ;;  %v141_v18 = vmul.f32 %v453_v1, %v70_v61  ;;  %v281_v50 = vld [vmem:[%s1228_s3 + $0x1d0] sm:$0xff] }
 0x10b   :  { %v212_v29 = vadd.f32 %v458_v2, %v141_v18 }
 0x10d   :  { %v340_v40 = vadd.f32 %v276_v22, %v212_v29 }
 0x110   :  { %v71_v5 = vld [vmem:[%s1225_s0 + $0x1b0] sm:$0xff]  ;;  %v72_v6 = vld [vmem:[%s1225_s0 + $0x1b8] sm:$0xff] }
 0x111   :  { %396 = vst.msk [vmem:[%s1229_s4 + $0x160] sm:$0xff] %vm351_vm0, %v331_v56  ;;  %v142_v23 = vmul.f32 %v453_v1, %v71_v5  ;;  %v143_v24 = vmul.f32 %v453_v1, %v72_v6  ;;  %v283_v56 = vld [vmem:[%s1228_s3 + $0x1e0] sm:$0xff]  ;;  %v286_v5 = vld [vmem:[%s1228_s3 + $0x1f8] sm:$0xff] }
 0x113   :  { %v213_v35 = vadd.f32 %v458_v2, %v142_v23  ;;  %v214_v36 = vadd.f32 %v458_v2, %v143_v24 }
 0x115   :  { %v341_v47 = vadd.f32 %v277_v30, %v213_v35  ;;  %v342_v48 = vadd.f32 %v278_v31, %v214_v36 }
 0x118   :  { %v73_v13 = vld [vmem:[%s1225_s0 + $0x1c0] sm:$0xff] }
 0x119   :  { %397 = vst.msk [vmem:[%s1229_s4 + $0x168] sm:$0xff] %vm351_vm0, %v332_v62  ;;  %v144_v32 = vmul.f32 %v453_v1, %v73_v13 }
 0x11b   :  { %v215_v41 = vadd.f32 %v458_v2, %v144_v32 }
 0x11d   :  { %v343_v53 = vadd.f32 %v279_v37, %v215_v41 }
 0x120   :  { %v74_v19 = vld [vmem:[%s1225_s0 + $0x1c8] sm:$0xff] }
 0x121   :  { %398 = vst.msk [vmem:[%s1229_s4 + $0x170] sm:$0xff] %vm351_vm0, %v333_v7  ;;  %399 = vst.msk [vmem:[%s1229_s4 + $0x178] sm:$0xff] %vm351_vm0, %v334_v8  ;;  %v145_v38 = vmul.f32 %v453_v1, %v74_v19 }
 0x123   :  { %v216_v49 = vadd.f32 %v458_v2, %v145_v38 }
 0x125   :  { %v344_v58 = vadd.f32 %v280_v42, %v216_v49 }
 0x128   :  { %v75_v25 = vld [vmem:[%s1225_s0 + $0x1d0] sm:$0xff]  ;;  %v76_v26 = vld [vmem:[%s1225_s0 + $0x1d8] sm:$0xff] }
 0x129   :  { %400 = vst.msk [vmem:[%s1229_s4 + $0x180] sm:$0xff] %vm351_vm0, %v335_v14  ;;  %v146_v43 = vmul.f32 %v453_v1, %v75_v25  ;;  %v147_v44 = vmul.f32 %v453_v1, %v76_v26 }
 0x12b   :  { %v217_v54 = vadd.f32 %v458_v2, %v146_v43  ;;  %v218_v55 = vadd.f32 %v458_v2, %v147_v44 }
 0x12d   :  { %v345_v63 = vadd.f32 %v281_v50, %v217_v54  ;;  %v346_v0 = vadd.f32 %v282_v51, %v218_v55 }
 0x130   :  { %v77_v33 = vld [vmem:[%s1225_s0 + $0x1e0] sm:$0xff] }
 0x131   :  { %401 = vst.msk [vmem:[%s1229_s4 + $0x188] sm:$0xff] %vm351_vm0, %v336_v20  ;;  %v148_v52 = vmul.f32 %v453_v1, %v77_v33 }
 0x133   :  { %v219_v59 = vadd.f32 %v458_v2, %v148_v52 }
 0x138   :  { %v78_v39 = vld [vmem:[%s1225_s0 + $0x1e8] sm:$0xff] }
 0x139   :  { %402 = vst.msk [vmem:[%s1229_s4 + $0x190] sm:$0xff] %vm351_vm0, %v337_v27  ;;  %403 = vst.msk [vmem:[%s1229_s4 + $0x198] sm:$0xff] %vm351_vm0, %v338_v28  ;;  %v149_v57 = vmul.f32 %v453_v1, %v78_v39 }
 0x13b   :  { %v220_v3 = vadd.f32 %v458_v2, %v149_v57 }
 0x13d   :  { %v348_v8 = vadd.f32 %v284_v60, %v220_v3 }
 0x140   :  { %v79_v45 = vld [vmem:[%s1225_s0 + $0x1f0] sm:$0xff]  ;;  %v80_v46 = vld [vmem:[%s1225_s0 + $0x1f8] sm:$0xff] }
 0x141   :  { %404 = vst.msk [vmem:[%s1229_s4 + $0x1a0] sm:$0xff] %vm351_vm0, %v339_v34  ;;  %405 = vst.msk [vmem:[%s1229_s4 + $0x1a8] sm:$0xff] %vm351_vm0, %v340_v40  ;;  %v150_v61 = vmul.f32 %v453_v1, %v79_v45  ;;  %v151_v62 = vmul.f32 %v453_v1, %v80_v46  ;;  %v347_v1 = vadd.f32 %v283_v56, %v219_v59 }
 0x142   :  { %406 = vst.msk [vmem:[%s1229_s4 + $0x1b0] sm:$0xff] %vm351_vm0, %v341_v47  ;;  %407 = vst.msk [vmem:[%s1229_s4 + $0x1b8] sm:$0xff] %vm351_vm0, %v342_v48 }
 0x143   :  { %408 = vst.msk [vmem:[%s1229_s4 + $0x1c0] sm:$0xff] %vm351_vm0, %v343_v53  ;;  %409 = vst.msk [vmem:[%s1229_s4 + $0x1c8] sm:$0xff] %vm351_vm0, %v344_v58  ;;  %v221_v6 = vadd.f32 %v458_v2, %v150_v61  ;;  %v222_v7 = vadd.f32 %v458_v2, %v151_v62 }
 0x144   :  { %410 = vst.msk [vmem:[%s1229_s4 + $0x1d0] sm:$0xff] %vm351_vm0, %v345_v63  ;;  %411 = vst.msk [vmem:[%s1229_s4 + $0x1d8] sm:$0xff] %vm351_vm0, %v346_v0 }
 0x145   :  { %412 = vst.msk [vmem:[%s1229_s4 + $0x1e0] sm:$0xff] %vm351_vm0, %v347_v1  ;;  %v349_v9 = vadd.f32 %v285_v4, %v221_v6  ;;  %v350_v10 = vadd.f32 %v286_v5, %v222_v7  ;;  %413 = vst.msk [vmem:[%s1229_s4 + $0x1e8] sm:$0xff] %vm351_vm0, %v348_v8 }
 0x147   :  { %414 = vst.msk [vmem:[%s1229_s4 + $0x1f0] sm:$0xff] %vm351_vm0, %v349_v9  ;;  %415 = vst.msk [vmem:[%s1229_s4 + $0x1f8] sm:$0xff] %vm351_vm0, %v350_v10 }

// kernel: inv_res_block.4
= control target key start
LH: loop header
LB: loop body
LE: loop exit
PB: predicated region body
PF: predicated region fallthrough
CT: control target
= control target key end

     0   :  { %vm221_vm0 = vcmask 1041408   ;;  %vm124_vm1 = vcmask 31744   ;;  %vm24_vm2 = vcmask 57344   ;;  %vm902_vm3 = vcmask 64512   ;;  %s1967_s1 = inlined_call_operand.vmem [shape: bf16[4,8], index: 1, kind: input, shape index: {}]   ;;  %s1968_s0 = inlined_call_operand.vmem [shape: f32[512,4], index: 0, kind: input, shape index: {}]   ;;  %s1969_s2 = inlined_call_operand.vmem [shape: f32[1,8], index: 2, kind: input, shape index: {}]   ;;  %s1970_s3 = inlined_call_operand.vmem [shape: f32[1,8], index: 3, kind: input, shape index: {}]   ;;  %s1971_s4 = inlined_call_operand.vmem [shape: f32[1,8], index: 4, kind: output, shape index: {0}]   ;;  %s1972_s5 = inlined_call_operand.vmem [shape: f32[1,8], index: 5, kind: output, shape index: {1}]  }
   0x1   :  { %v123_v0 = vld [vmem:[%s1967_s1] sm:$0x3]  ;;  %v28_v2 = vld [vmem:[%s1968_s0 + $0x8] sm:$0xff]  ;;  %v29_v5 = vld [vmem:[%s1968_s0 + $0x10] sm:$0xff] }
   0x2   :  { %v27_v1 = vld [vmem:[%s1968_s0] sm:$0xff]  ;;  %1398 = vmatprep.subr.msk.bf16.mxu0 %vm221_vm0, %v123_v0  ;;  %v223_v3 = vsel %vm221_vm0, %v123_v0, 0  ;;  %v30_v6 = vld [vmem:[%s1968_s0 + $0x18] sm:$0xff]  ;;  %1399 = vmatprep.subr.msk.bf16.mxu1 %vm221_vm0, %v123_v0  ;;  %v32_v9 = vld [vmem:[%s1968_s0 + $0x28] sm:$0xff] }
   0x3   :  { %v91_v4 = vpack.c.bf16 %v28_v2, %v27_v1  ;;  %v31_v7 = vld [vmem:[%s1968_s0 + $0x20] sm:$0xff]  ;;  %1331 = vmatpush3.bf16.msra.mxu0 %v223_v3  ;;  %v92_v8 = vpack.c.bf16 %v30_v6, %v29_v5  ;;  %1397 = vmatpush3.bf16.msra.mxu1 %v223_v3  ;;  %v33_v11 = vld [vmem:[%s1968_s0 + $0x30] sm:$0xff]  ;;  %v34_v12 = vld [vmem:[%s1968_s0 + $0x38] sm:$0xff] }
   0x4   :  { %v93_v10 = vpack.c.bf16 %v32_v9, %v31_v7  ;;  %v35_v13 = vld [vmem:[%s1968_s0 + $0x40] sm:$0xff]  ;;  %v36_v14 = vld [vmem:[%s1968_s0 + $0x48] sm:$0xff]  ;;  %v94_v15 = vpack.c.bf16 %v34_v12, %v33_v11  ;;  %v61_v19 = vld [vmem:[%s1968_s0 + $0x110] sm:$0xff] }
   0x5   :  { %1332 = vmatprep.mubr.msk.bf16.mxu0 %vm124_vm1, %v91_v4  ;;  %v95_v16 = vpack.c.bf16 %v36_v14, %v35_v13  ;;  %v59_v17 = vld [vmem:[%s1968_s0 + $0x100] sm:$0xff]  ;;  %v60_v18 = vld [vmem:[%s1968_s0 + $0x108] sm:$0xff]  ;;  %v62_v21 = vld [vmem:[%s1968_s0 + $0x118] sm:$0xff] }
   0x6   :  { %1333 = vmatmul.mubr.msk.bf16.vlgmr.msra.gmra.mrb[0].mxu0 %vm124_vm1, %v92_v8  ;;  %v107_v20 = vpack.c.bf16 %v60_v18, %v59_v17  ;;  %v63_v22 = vld [vmem:[%s1968_s0 + $0x120] sm:$0xff]  ;;  %v64_v23 = vld [vmem:[%s1968_s0 + $0x128] sm:$0xff]  ;;  %v108_v24 = vpack.c.bf16 %v62_v21, %v61_v19  ;;  %v37_v26 = vld [vmem:[%s1968_s0 + $0x50] sm:$0xff] }
   0x7   :  { %1336 = vmatprep.mubr.msk.bf16.mxu0 %vm124_vm1, %v93_v10  ;;  %v109_v25 = vpack.c.bf16 %v64_v23, %v63_v22  ;;  %v38_v27 = vld [vmem:[%s1968_s0 + $0x58] sm:$0xff]  ;;  %v39_v28 = vld [vmem:[%s1968_s0 + $0x60] sm:$0xff]  ;;  %v40_v29 = vld [vmem:[%s1968_s0 + $0x68] sm:$0xff] }
   0x8   :  { %1364 = vmatprep.mubr.msk.bf16.mxu1 %vm124_vm1, %v107_v20  ;;  %v65_v30 = vld [vmem:[%s1968_s0 + $0x130] sm:$0xff]  ;;  %v66_v31 = vld [vmem:[%s1968_s0 + $0x138] sm:$0xff]  ;;  %v96_v32 = vpack.c.bf16 %v38_v27, %v37_v26  ;;  %v67_v33 = vld [vmem:[%s1968_s0 + $0x140] sm:$0xff]  ;;  %v97_v35 = vpack.c.bf16 %v40_v29, %v39_v28 }
   0x9   :  { %1365 = vmatmul.mubr.msk.bf16.vlgmr.msra.gmra.mrb[0].mxu1 %vm124_vm1, %v108_v24  ;;  %v68_v34 = vld [vmem:[%s1968_s0 + $0x148] sm:$0xff]  ;;  %v110_v36 = vpack.c.bf16 %v66_v31, %v65_v30  ;;  %v41_v38 = vld [vmem:[%s1968_s0 + $0x70] sm:$0xff]  ;;  %v42_v39 = vld [vmem:[%s1968_s0 + $0x78] sm:$0xff] }
   0xa   :  { %1368 = vmatprep.mubr.msk.bf16.mxu1 %vm124_vm1, %v109_v25  ;;  %v111_v37 = vpack.c.bf16 %v68_v34, %v67_v33  ;;  %v43_v40 = vld [vmem:[%s1968_s0 + $0x80] sm:$0xff]  ;;  %v44_v41 = vld [vmem:[%s1968_s0 + $0x88] sm:$0xff]  ;;  %v69_v42 = vld [vmem:[%s1968_s0 + $0x150] sm:$0xff]  ;;  %v98_v44 = vpack.c.bf16 %v42_v39, %v41_v38  ;;  %v1403_v34 = vmov 0.0  }
   0xb   :  { %v70_v43 = vld [vmem:[%s1968_s0 + $0x158] sm:$0xff]  ;;  %v71_v45 = vld [vmem:[%s1968_s0 + $0x160] sm:$0xff]  ;;  %v72_v46 = vld [vmem:[%s1968_s0 + $0x168] sm:$0xff]  ;;  %v99_v47 = vpack.c.bf16 %v44_v41, %v43_v40  ;;  %25 = vst.msk [vmem:[#allocation2] sm:$0x1] %vm24_vm2, %v1403_v34 }
   0xc   :  { %v112_v48 = vpack.c.bf16 %v70_v43, %v69_v42  ;;  %v113_v49 = vpack.c.bf16 %v72_v46, %v71_v45  ;;  %v45_v50 = vld [vmem:[%s1968_s0 + $0x90] sm:$0xff]  ;;  %v46_v51 = vld [vmem:[%s1968_s0 + $0x98] sm:$0xff]  ;;  %v47_v52 = vld [vmem:[%s1968_s0 + $0xa0] sm:$0xff]  ;;  %26 = vst.msk [vmem:[#allocation3] sm:$0x1] %vm24_vm2, %v1403_v34 }
   0xd   :  { %v48_v53 = vld [vmem:[%s1968_s0 + $0xa8] sm:$0xff]  ;;  %v73_v54 = vld [vmem:[%s1968_s0 + $0x170] sm:$0xff]  ;;  %v74_v55 = vld [vmem:[%s1968_s0 + $0x178] sm:$0xff]  ;;  %v100_v56 = vpack.c.bf16 %v46_v51, %v45_v50 }
   0xe   :  { %1337 = vmatmul.mubr.msk.bf16.gmra.mrb[4].mxu0 %vm124_vm1, %v94_v15  ;;  %v75_v57 = vld [vmem:[%s1968_s0 + $0x180] sm:$0xff]  ;;  %v76_v58 = vld [vmem:[%s1968_s0 + $0x188] sm:$0xff]  ;;  %v101_v59 = vpack.c.bf16 %v48_v53, %v47_v52  ;;  %v114_v60 = vpack.c.bf16 %v74_v55, %v73_v54  ;;  %v49_v62 = vld [vmem:[%s1968_s0 + $0xb0] sm:$0xff] }
   0xf   :  { %1340 = vmatprep.mubr.msk.bf16.mxu0 %vm124_vm1, %v95_v16  ;;  %v115_v61 = vpack.c.bf16 %v76_v58, %v75_v57  ;;  %v50_v63 = vld [vmem:[%s1968_s0 + $0xb8] sm:$0xff]  ;;  %v51_v0 = vld [vmem:[%s1968_s0 + $0xc0] sm:$0xff]  ;;  %v52_v1 = vld [vmem:[%s1968_s0 + $0xc8] sm:$0xff] }
  0x10   :  { %v77_v2 = vld [vmem:[%s1968_s0 + $0x190] sm:$0xff]  ;;  %v78_v3 = vld [vmem:[%s1968_s0 + $0x198] sm:$0xff]  ;;  %v102_v4 = vpack.c.bf16 %v50_v63, %v49_v62  ;;  %v79_v5 = vld [vmem:[%s1968_s0 + $0x1a0] sm:$0xff]  ;;  %v103_v7 = vpack.c.bf16 %v52_v1, %v51_v0 }
  0x11   :  { %1369 = vmatmul.mubr.msk.bf16.gmra.mrb[4].mxu1 %vm124_vm1, %v110_v36  ;;  %v80_v6 = vld [vmem:[%s1968_s0 + $0x1a8] sm:$0xff]  ;;  %v116_v8 = vpack.c.bf16 %v78_v3, %v77_v2  ;;  %v53_v10 = vld [vmem:[%s1968_s0 + $0xd0] sm:$0xff]  ;;  %v54_v11 = vld [vmem:[%s1968_s0 + $0xd8] sm:$0xff] }
  0x12   :  { %1372 = vmatprep.mubr.msk.bf16.mxu1 %vm124_vm1, %v111_v37  ;;  %v117_v9 = vpack.c.bf16 %v80_v6, %v79_v5  ;;  %v55_v12 = vld [vmem:[%s1968_s0 + $0xe0] sm:$0xff]  ;;  %v56_v13 = vld [vmem:[%s1968_s0 + $0xe8] sm:$0xff]  ;;  %v81_v14 = vld [vmem:[%s1968_s0 + $0x1b0] sm:$0xff]  ;;  %v104_v16 = vpack.c.bf16 %v54_v11, %v53_v10 }
  0x13   :  { %v82_v15 = vld [vmem:[%s1968_s0 + $0x1b8] sm:$0xff]  ;;  %v83_v17 = vld [vmem:[%s1968_s0 + $0x1c0] sm:$0xff]  ;;  %v84_v18 = vld [vmem:[%s1968_s0 + $0x1c8] sm:$0xff]  ;;  %v105_v19 = vpack.c.bf16 %v56_v13, %v55_v12 }
  0x14   :  { %v118_v20 = vpack.c.bf16 %v82_v15, %v81_v14  ;;  %v119_v21 = vpack.c.bf16 %v84_v18, %v83_v17  ;;  %v57_v22 = vld [vmem:[%s1968_s0 + $0xf0] sm:$0xff]  ;;  %v58_v23 = vld [vmem:[%s1968_s0 + $0xf8] sm:$0xff]  ;;  %v87_v27 = vld [vmem:[%s1968_s0 + $0x1e0] sm:$0xff] }
  0x15   :  { %v85_v24 = vld [vmem:[%s1968_s0 + $0x1d0] sm:$0xff]  ;;  %v86_v25 = vld [vmem:[%s1968_s0 + $0x1d8] sm:$0xff]  ;;  %v106_v26 = vpack.c.bf16 %v58_v23, %v57_v22  ;;  %v88_v28 = vld [vmem:[%s1968_s0 + $0x1e8] sm:$0xff] }
  0x16   :  { %1341 = vmatmul.mubr.msk.bf16.gmra.mrb[8].mxu0 %vm124_vm1, %v96_v32  ;;  %v120_v29 = vpack.c.bf16 %v86_v25, %v85_v24  ;;  %v121_v30 = vpack.c.bf16 %v88_v28, %v87_v27  ;;  %v89_v31 = vld [vmem:[%s1968_s0 + $0x1f0] sm:$0xff]  ;;  %v90_v32 = vld [vmem:[%s1968_s0 + $0x1f8] sm:$0xff] }
  0x17   :  { %1344 = vmatprep.mubr.msk.bf16.mxu0 %vm124_vm1, %v97_v35  ;;  %v122_v33 = vpack.c.bf16 %v90_v32, %v89_v31 }
  0x19   :  { %1373 = vmatmul.mubr.msk.bf16.gmra.mrb[8].mxu1 %vm124_vm1, %v112_v48 }
  0x1a   :  { %1376 = vmatprep.mubr.msk.bf16.mxu1 %vm124_vm1, %v113_v49 }
  0x1e   :  { %1345 = vmatmul.mubr.msk.bf16.gmra.mrb[12].mxu0 %vm124_vm1, %v98_v44 }
  0x1f   :  { %1348 = vmatprep.mubr.msk.bf16.mxu0 %vm124_vm1, %v99_v47 }
  0x21   :  { %1377 = vmatmul.mubr.msk.bf16.gmra.mrb[12].mxu1 %vm124_vm1, %v114_v60 }
  0x22   :  { %1380 = vmatprep.mubr.msk.bf16.mxu1 %vm124_vm1, %v115_v61 }
  0x26   :  { %1349 = vmatmul.mubr.msk.bf16.gmra.mrb[16].mxu0 %vm124_vm1, %v100_v56 }
  0x27   :  { %1352 = vmatprep.mubr.msk.bf16.mxu0 %vm124_vm1, %v101_v59 }
  0x29   :  { %1381 = vmatmul.mubr.msk.bf16.gmra.mrb[16].mxu1 %vm124_vm1, %v116_v8 }
  0x2a   :  { %1384 = vmatprep.mubr.msk.bf16.mxu1 %vm124_vm1, %v117_v9 }
  0x2e   :  { %1353 = vmatmul.mubr.msk.bf16.gmra.mrb[20].mxu0 %vm124_vm1, %v102_v4 }
  0x2f   :  { %1356 = vmatprep.mubr.msk.bf16.mxu0 %vm124_vm1, %v103_v7 }
  0x31   :  { %1385 = vmatmul.mubr.msk.bf16.gmra.mrb[20].mxu1 %vm124_vm1, %v118_v20 }
  0x32   :  { %1388 = vmatprep.mubr.msk.bf16.mxu1 %vm124_vm1, %v119_v21 }
  0x36   :  { %1357 = vmatmul.mubr.msk.bf16.gmra.mrb[24].mxu0 %vm124_vm1, %v104_v16 }
  0x37   :  { %1360 = vmatprep.mubr.msk.bf16.mxu0 %vm124_vm1, %v105_v19 }
  0x39   :  { %1389 = vmatmul.mubr.msk.bf16.gmra.mrb[24].mxu1 %vm124_vm1, %v120_v29 }
  0x3a   :  { %1392 = vmatprep.mubr.msk.bf16.mxu1 %vm124_vm1, %v121_v30 }
  0x3e   :  { %1361 = vmatmul.mubr.msk.bf16.gmra.mrb[28].mxu0 %vm124_vm1, %v106_v26 }
  0x41   :  { %1393 = vmatmul.mubr.msk.bf16.gmra.mrb[28].mxu1 %vm124_vm1, %v122_v33 }
  0xd9   :  { %v1334_v35 = vpop.f32.mrb[0].mxu0 }
  0xda   :  { %v259_v36 = vpop.f32.mrb[1].mxu0  ;;  %v1042_v40 = vmul.f32 %v1334_v35, %v1334_v35  ;;  %v906_v45 = vsel %vm902_vm3, %v1334_v35, 0.0 }
  0xdb   :  { %v1040_v37 = vmul.f32 %v259_v36, %v259_v36  ;;  %v1335_v38 = vpop.f32.mrb[2].mxu0  ;;  %v903_v41 = vsel %vm902_vm3, %v259_v36, 0.0 }
  0xdc   :  { %v262_v39 = vpop.f32.mrb[3].mxu0  ;;  %v1043_v47 = vmul.f32 %v1335_v38, %v1335_v38  ;;  %v1107_v51 = vsel %vm902_vm3, %v1042_v40, 0.0  ;;  %v908_v52 = vsel %vm902_vm3, %v1335_v38, 0.0  ;;  %v1672_v61 = vpop.f32.mrb[0].mxu1 }
  0xdd   :  { %v904_v42 = vsel %vm902_vm3, %v262_v39, 0.0  ;;  %v1041_v43 = vmul.f32 %v262_v39, %v262_v39  ;;  %v1104_v46 = vsel %vm902_vm3, %v1040_v37, 0.0  ;;  %v1674_v1 = vpop.f32.mrb[1].mxu1 }
  0xde   :  { %v905_v44 = vadd.f32 %v904_v42, %v903_v41  ;;  %v1109_v57 = vsel %vm902_vm3, %v1043_v47, 0.0  ;;  %v1678_v6 = vpop.f32.mrb[2].mxu1 }
  0xdf   :  { %v1105_v48 = vsel %vm902_vm3, %v1041_v43, 0.0  ;;  %v1680_v9 = vpop.f32.mrb[3].mxu1 }
  0xe0   :  { %v907_v49 = vadd.f32 %v906_v45, %v905_v44  ;;  %v1106_v50 = vadd.f32 %v1105_v48, %v1104_v46 }
  0xe1   :  { %v1338_v53 = vpop.f32.mrb[4].mxu0 }
  0xe2   :  { %v1108_v54 = vadd.f32 %v1107_v51, %v1106_v50  ;;  %v275_v55 = vpop.f32.mrb[5].mxu0  ;;  %v909_v56 = vadd.f32 %v908_v52, %v907_v49  ;;  %v1046_v2 = vmul.f32 %v1338_v53, %v1338_v53  ;;  %v914_v10 = vsel %vm902_vm3, %v1338_v53, 0.0 }
  0xe3   :  { %v910_v58 = vsel %vm902_vm3, %v275_v55, 0.0  ;;  %v1044_v59 = vmul.f32 %v275_v55, %v275_v55  ;;  %v1339_v60 = vpop.f32.mrb[6].mxu0 }
  0xe4   :  { %v911_v62 = vadd.f32 %v910_v58, %v909_v56  ;;  %v1110_v63 = vadd.f32 %v1109_v57, %v1108_v54  ;;  %v278_v0 = vpop.f32.mrb[7].mxu0  ;;  %v1047_v11 = vmul.f32 %v1339_v60, %v1339_v60  ;;  %v1115_v15 = vsel %vm902_vm3, %v1046_v2, 0.0  ;;  %v1688_v25 = vpop.f32.mrb[4].mxu1 }
  0xe5   :  { %v1111_v3 = vsel %vm902_vm3, %v1044_v59, 0.0  ;;  %v912_v4 = vsel %vm902_vm3, %v278_v0, 0.0  ;;  %v1045_v5 = vmul.f32 %v278_v0, %v278_v0  ;;  %v916_v16 = vsel %vm902_vm3, %v1339_v60, 0.0  ;;  %v1690_v29 = vpop.f32.mrb[5].mxu1 }
  0xe6   :  { %v1112_v7 = vadd.f32 %v1111_v3, %v1110_v63  ;;  %v913_v8 = vadd.f32 %v912_v4, %v911_v62  ;;  %v1117_v21 = vsel %vm902_vm3, %v1047_v11, 0.0  ;;  %v1694_v34 = vpop.f32.mrb[6].mxu1 }
  0xe7   :  { %v1113_v12 = vsel %vm902_vm3, %v1045_v5, 0.0  ;;  %v1696_v37 = vpop.f32.mrb[7].mxu1 }
  0xe8   :  { %v915_v13 = vadd.f32 %v914_v10, %v913_v8  ;;  %v1114_v14 = vadd.f32 %v1113_v12, %v1112_v7 }
  0xe9   :  { %v1342_v17 = vpop.f32.mrb[8].mxu0 }
  0xea   :  { %v1116_v18 = vadd.f32 %v1115_v15, %v1114_v14  ;;  %v291_v19 = vpop.f32.mrb[9].mxu0  ;;  %v917_v20 = vadd.f32 %v916_v16, %v915_v13  ;;  %v1050_v30 = vmul.f32 %v1342_v17, %v1342_v17  ;;  %v922_v38 = vsel %vm902_vm3, %v1342_v17, 0.0 }
  0xeb   :  { %v918_v22 = vsel %vm902_vm3, %v291_v19, 0.0  ;;  %v1048_v23 = vmul.f32 %v291_v19, %v291_v19  ;;  %v1343_v24 = vpop.f32.mrb[10].mxu0 }
  0xec   :  { %v919_v26 = vadd.f32 %v918_v22, %v917_v20  ;;  %v1118_v27 = vadd.f32 %v1117_v21, %v1116_v18  ;;  %v294_v28 = vpop.f32.mrb[11].mxu0  ;;  %v1051_v39 = vmul.f32 %v1343_v24, %v1343_v24  ;;  %v1123_v43 = vsel %vm902_vm3, %v1050_v30, 0.0  ;;  %v1704_v53 = vpop.f32.mrb[8].mxu1 }
  0xed   :  { %v1119_v31 = vsel %vm902_vm3, %v1048_v23, 0.0  ;;  %v920_v32 = vsel %vm902_vm3, %v294_v28, 0.0  ;;  %v1049_v33 = vmul.f32 %v294_v28, %v294_v28  ;;  %v924_v44 = vsel %vm902_vm3, %v1343_v24, 0.0  ;;  %v1706_v57 = vpop.f32.mrb[9].mxu1 }
  0xee   :  { %v1120_v35 = vadd.f32 %v1119_v31, %v1118_v27  ;;  %v921_v36 = vadd.f32 %v920_v32, %v919_v26  ;;  %v1125_v49 = vsel %vm902_vm3, %v1051_v39, 0.0  ;;  %v1710_v63 = vpop.f32.mrb[10].mxu1 }
  0xef   :  { %v1121_v40 = vsel %vm902_vm3, %v1049_v33, 0.0  ;;  %v1712_v3 = vpop.f32.mrb[11].mxu1 }
  0xf0   :  { %v923_v41 = vadd.f32 %v922_v38, %v921_v36  ;;  %v1122_v42 = vadd.f32 %v1121_v40, %v1120_v35 }
  0xf1   :  { %v1346_v45 = vpop.f32.mrb[12].mxu0 }
  0xf2   :  { %v1124_v46 = vadd.f32 %v1123_v43, %v1122_v42  ;;  %v307_v47 = vpop.f32.mrb[13].mxu0  ;;  %v925_v48 = vadd.f32 %v924_v44, %v923_v41  ;;  %v1054_v58 = vmul.f32 %v1346_v45, %v1346_v45  ;;  %v930_v4 = vsel %vm902_vm3, %v1346_v45, 0.0 }
  0xf3   :  { %v926_v50 = vsel %vm902_vm3, %v307_v47, 0.0  ;;  %v1052_v51 = vmul.f32 %v307_v47, %v307_v47  ;;  %v1347_v52 = vpop.f32.mrb[14].mxu0 }
  0xf4   :  { %v927_v54 = vadd.f32 %v926_v50, %v925_v48  ;;  %v1126_v55 = vadd.f32 %v1125_v49, %v1124_v46  ;;  %v310_v56 = vpop.f32.mrb[15].mxu0  ;;  %v1055_v5 = vmul.f32 %v1347_v52, %v1347_v52  ;;  %v1131_v11 = vsel %vm902_vm3, %v1054_v58, 0.0  ;;  %v1720_v21 = vpop.f32.mrb[12].mxu1 }
  0xf5   :  { %v1127_v59 = vsel %vm902_vm3, %v1052_v51, 0.0  ;;  %v928_v60 = vsel %vm902_vm3, %v310_v56, 0.0  ;;  %v1053_v62 = vmul.f32 %v310_v56, %v310_v56  ;;  %v932_v12 = vsel %vm902_vm3, %v1347_v52, 0.0  ;;  %v1722_v26 = vpop.f32.mrb[13].mxu1 }
  0xf6   :  { %v1128_v0 = vadd.f32 %v1127_v59, %v1126_v55  ;;  %v929_v2 = vadd.f32 %v928_v60, %v927_v54  ;;  %v1133_v17 = vsel %vm902_vm3, %v1055_v5, 0.0  ;;  %v1726_v32 = vpop.f32.mrb[14].mxu1 }
  0xf7   :  { %v1129_v7 = vsel %vm902_vm3, %v1053_v62, 0.0  ;;  %v1728_v36 = vpop.f32.mrb[15].mxu1 }
  0xf8   :  { %v931_v8 = vadd.f32 %v930_v4, %v929_v2  ;;  %v1130_v10 = vadd.f32 %v1129_v7, %v1128_v0 }
  0xf9   :  { %v1350_v13 = vpop.f32.mrb[16].mxu0 }
  0xfa   :  { %v1132_v14 = vadd.f32 %v1131_v11, %v1130_v10  ;;  %v323_v15 = vpop.f32.mrb[17].mxu0  ;;  %v933_v16 = vadd.f32 %v932_v12, %v931_v8  ;;  %v1058_v27 = vmul.f32 %v1350_v13, %v1350_v13  ;;  %v938_v38 = vsel %vm902_vm3, %v1350_v13, 0.0 }
  0xfb   :  { %v934_v18 = vsel %vm902_vm3, %v323_v15, 0.0  ;;  %v1056_v19 = vmul.f32 %v323_v15, %v323_v15  ;;  %v1351_v20 = vpop.f32.mrb[18].mxu0 }
  0xfc   :  { %v935_v22 = vadd.f32 %v934_v18, %v933_v16  ;;  %v1134_v23 = vadd.f32 %v1133_v17, %v1132_v14  ;;  %v326_v24 = vpop.f32.mrb[19].mxu0  ;;  %v1059_v39 = vmul.f32 %v1351_v20, %v1351_v20  ;;  %v1139_v43 = vsel %vm902_vm3, %v1058_v27, 0.0  ;;  %v1736_v54 = vpop.f32.mrb[16].mxu1 }
  0xfd   :  { %v1135_v28 = vsel %vm902_vm3, %v1056_v19, 0.0  ;;  %v936_v30 = vsel %vm902_vm3, %v326_v24, 0.0  ;;  %v1057_v31 = vmul.f32 %v326_v24, %v326_v24  ;;  %v940_v44 = vsel %vm902_vm3, %v1351_v20, 0.0  ;;  %v1738_v59 = vpop.f32.mrb[17].mxu1 }
  0xfe   :  { %v1136_v33 = vadd.f32 %v1135_v28, %v1134_v23  ;;  %v937_v35 = vadd.f32 %v936_v30, %v935_v22  ;;  %v1141_v49 = vsel %vm902_vm3, %v1059_v39, 0.0  ;;  %v1742_v4 = vpop.f32.mrb[18].mxu1 }
  0xff   :  { %v1137_v40 = vsel %vm902_vm3, %v1057_v31, 0.0  ;;  %v1744_v8 = vpop.f32.mrb[19].mxu1 }
 0x100   :  { %v939_v41 = vadd.f32 %v938_v38, %v937_v35  ;;  %v1138_v42 = vadd.f32 %v1137_v40, %v1136_v33 }
 0x101   :  { %v1354_v45 = vpop.f32.mrb[20].mxu0 }
 0x102   :  { %v1140_v46 = vadd.f32 %v1139_v43, %v1138_v42  ;;  %v339_v47 = vpop.f32.mrb[21].mxu0  ;;  %v941_v48 = vadd.f32 %v940_v44, %v939_v41  ;;  %v1062_v60 = vmul.f32 %v1354_v45, %v1354_v45  ;;  %v946_v10 = vsel %vm902_vm3, %v1354_v45, 0.0 }
 0x103   :  { %v942_v50 = vsel %vm902_vm3, %v339_v47, 0.0  ;;  %v1060_v51 = vmul.f32 %v339_v47, %v339_v47  ;;  %v1355_v52 = vpop.f32.mrb[22].mxu0 }
 0x104   :  { %v943_v55 = vadd.f32 %v942_v50, %v941_v48  ;;  %v1142_v56 = vadd.f32 %v1141_v49, %v1140_v46  ;;  %v342_v58 = vpop.f32.mrb[23].mxu0  ;;  %v1063_v11 = vmul.f32 %v1355_v52, %v1355_v52  ;;  %v1147_v15 = vsel %vm902_vm3, %v1062_v60, 0.0  ;;  %v1752_v28 = vpop.f32.mrb[20].mxu1 }
 0x105   :  { %v1143_v62 = vsel %vm902_vm3, %v1060_v51, 0.0  ;;  %v944_v0 = vsel %vm902_vm3, %v342_v58, 0.0  ;;  %v1061_v2 = vmul.f32 %v342_v58, %v342_v58  ;;  %v948_v16 = vsel %vm902_vm3, %v1355_v52, 0.0  ;;  %v1754_v35 = vpop.f32.mrb[21].mxu1 }
 0x106   :  { %v1144_v5 = vadd.f32 %v1143_v62, %v1142_v56  ;;  %v945_v7 = vadd.f32 %v944_v0, %v943_v55  ;;  %v1149_v22 = vsel %vm902_vm3, %v1063_v11, 0.0  ;;  %v1758_v42 = vpop.f32.mrb[22].mxu1 }
 0x107   :  { %v1145_v12 = vsel %vm902_vm3, %v1061_v2, 0.0  ;;  %v1760_v45 = vpop.f32.mrb[23].mxu1 }
 0x108   :  { %v947_v13 = vadd.f32 %v946_v10, %v945_v7  ;;  %v1146_v14 = vadd.f32 %v1145_v12, %v1144_v5 }
 0x109   :  { %v1358_v17 = vpop.f32.mrb[24].mxu0 }
 0x10a   :  { %v1148_v18 = vadd.f32 %v1147_v15, %v1146_v14  ;;  %v355_v19 = vpop.f32.mrb[25].mxu0  ;;  %v949_v20 = vadd.f32 %v948_v16, %v947_v13  ;;  %v1066_v38 = vmul.f32 %v1358_v17, %v1358_v17  ;;  %v954_v46 = vsel %vm902_vm3, %v1358_v17, 0.0 }
 0x10b   :  { %v950_v23 = vsel %vm902_vm3, %v355_v19, 0.0  ;;  %v1064_v24 = vmul.f32 %v355_v19, %v355_v19  ;;  %v1359_v27 = vpop.f32.mrb[26].mxu0 }
 0x10c   :  { %v951_v30 = vadd.f32 %v950_v23, %v949_v20  ;;  %v1150_v31 = vadd.f32 %v1149_v22, %v1148_v18  ;;  %v358_v33 = vpop.f32.mrb[27].mxu0  ;;  %v1067_v47 = vmul.f32 %v1359_v27, %v1359_v27  ;;  %v1155_v51 = vsel %vm902_vm3, %v1066_v38, 0.0  ;;  %v1768_v7 = vpop.f32.mrb[24].mxu1 }
 0x10d   :  { %v1151_v39 = vsel %vm902_vm3, %v1064_v24, 0.0  ;;  %v952_v40 = vsel %vm902_vm3, %v358_v33, 0.0  ;;  %v1065_v41 = vmul.f32 %v358_v33, %v358_v33  ;;  %v956_v52 = vsel %vm902_vm3, %v1359_v27, 0.0  ;;  %v1770_v13 = vpop.f32.mrb[25].mxu1 }
 0x10e   :  { %v1152_v43 = vadd.f32 %v1151_v39, %v1150_v31  ;;  %v953_v44 = vadd.f32 %v952_v40, %v951_v30  ;;  %v1157_v62 = vsel %vm902_vm3, %v1067_v47, 0.0  ;;  %v1774_v18 = vpop.f32.mrb[26].mxu1  ;;  %v1072_v30 = vmul.f32 %v1674_v1, %v1674_v1 }
 0x10f   :  { %v1153_v48 = vsel %vm902_vm3, %v1065_v41, 0.0  ;;  %v1776_v22 = vpop.f32.mrb[27].mxu1  ;;  %v966_v40 = vsel %vm902_vm3, %v1674_v1, 0.0  ;;  %v1073_v47 = vmul.f32 %v1680_v9, %v1680_v9  ;;  %v968_v1 = vsel %vm902_vm3, %v1680_v9, 0.0 }
 0x110   :  { %v955_v49 = vadd.f32 %v954_v46, %v953_v44  ;;  %v1154_v50 = vadd.f32 %v1153_v48, %v1152_v43  ;;  %v1167_v46 = vsel %vm902_vm3, %v1072_v30, 0.0 }
 0x111   :  { %v1362_v55 = vpop.f32.mrb[28].mxu0 }
 0x112   :  { %v1156_v56 = vadd.f32 %v1155_v51, %v1154_v50  ;;  %v371_v58 = vpop.f32.mrb[29].mxu0  ;;  %v957_v60 = vadd.f32 %v956_v52, %v955_v49  ;;  %v1070_v14 = vmul.f32 %v1362_v55, %v1362_v55  ;;  %v962_v23 = vsel %vm902_vm3, %v1362_v55, 0.0 }
 0x113   :  { %v958_v0 = vsel %vm902_vm3, %v371_v58, 0.0  ;;  %v1068_v2 = vmul.f32 %v371_v58, %v371_v58  ;;  %v1363_v5 = vpop.f32.mrb[30].mxu0  ;;  %v1074_v52 = vmul.f32 %v1672_v61, %v1672_v61 }
 0x114   :  { %v959_v10 = vadd.f32 %v958_v0, %v957_v60  ;;  %v1158_v11 = vadd.f32 %v1157_v62, %v1156_v56  ;;  %v374_v12 = vpop.f32.mrb[31].mxu0  ;;  %v1071_v24 = vmul.f32 %v1363_v5, %v1363_v5  ;;  %v1163_v38 = vsel %vm902_vm3, %v1070_v14, 0.0  ;;  %v1790_v48 = vpop.f32.mrb[28].mxu1 }
 0x115   :  { %v1159_v15 = vsel %vm902_vm3, %v1068_v2, 0.0  ;;  %v960_v16 = vsel %vm902_vm3, %v374_v12, 0.0  ;;  %v1069_v17 = vmul.f32 %v374_v12, %v374_v12  ;;  %v964_v39 = vsel %vm902_vm3, %v1363_v5, 0.0  ;;  %v1792_v51 = vpop.f32.mrb[29].mxu1 }
 0x116   :  { %v1160_v19 = vadd.f32 %v1159_v15, %v1158_v11  ;;  %v961_v20 = vadd.f32 %v960_v16, %v959_v10  ;;  %v1165_v44 = vsel %vm902_vm3, %v1071_v24, 0.0  ;;  %v1798_v55 = vpop.f32.mrb[30].mxu1  ;;  %v970_v62 = vsel %vm902_vm3, %v1672_v61, 0.0 }
 0x117   :  { %v1161_v27 = vsel %vm902_vm3, %v1069_v17, 0.0  ;;  %v1800_v60 = vpop.f32.mrb[31].mxu1  ;;  %v1075_v0 = vmul.f32 %v1678_v6, %v1678_v6  ;;  %v1169_v2 = vsel %vm902_vm3, %v1073_v47, 0.0  ;;  %v1076_v5 = vmul.f32 %v1690_v29, %v1690_v29 }
 0x118   :  { %v963_v31 = vadd.f32 %v962_v23, %v961_v20  ;;  %v1162_v33 = vadd.f32 %v1161_v27, %v1160_v19  ;;  %v1171_v9 = vsel %vm902_vm3, %v1074_v52, 0.0  ;;  %v972_v12 = vsel %vm902_vm3, %v1678_v6, 0.0 }
 0x119   :  { %v974_v14 = vsel %vm902_vm3, %v1690_v29, 0.0  ;;  %v1173_v16 = vsel %vm902_vm3, %v1075_v0, 0.0  ;;  %v1175_v17 = vsel %vm902_vm3, %v1076_v5, 0.0  ;;  %v1077_v19 = vmul.f32 %v1696_v37, %v1696_v37 }
 0x11a   :  { %v1164_v41 = vadd.f32 %v1163_v38, %v1162_v33  ;;  %v965_v43 = vadd.f32 %v964_v39, %v963_v31  ;;  %v1078_v24 = vmul.f32 %v1688_v25, %v1688_v25  ;;  %v976_v6 = vsel %vm902_vm3, %v1696_v37, 0.0 }
 0x11b   :  { %v978_v29 = vsel %vm902_vm3, %v1688_v25, 0.0  ;;  %v1079_v31 = vmul.f32 %v1694_v34, %v1694_v34  ;;  %v1177_v33 = vsel %vm902_vm3, %v1077_v19, 0.0  ;;  %v1080_v38 = vmul.f32 %v1706_v57, %v1706_v57 }
 0x11c   :  { %v967_v49 = vadd.f32 %v966_v40, %v965_v43  ;;  %v1166_v50 = vadd.f32 %v1165_v44, %v1164_v41  ;;  %v1179_v41 = vsel %vm902_vm3, %v1078_v24, 0.0  ;;  %v980_v37 = vsel %vm902_vm3, %v1694_v34, 0.0 }
 0x11d   :  { %v982_v43 = vsel %vm902_vm3, %v1706_v57, 0.0  ;;  %v1183_v47 = vsel %vm902_vm3, %v1080_v38, 0.0  ;;  %v984_v34 = vsel %vm902_vm3, %v1712_v3, 0.0  ;;  %v986_v57 = vsel %vm902_vm3, %v1704_v53, 0.0 }
 0x11e   :  { %v1168_v56 = vadd.f32 %v1167_v46, %v1166_v50  ;;  %v969_v58 = vadd.f32 %v968_v1, %v967_v49  ;;  %v1181_v46 = vsel %vm902_vm3, %v1079_v31, 0.0  ;;  %v1081_v49 = vmul.f32 %v1712_v3, %v1712_v3 }
 0x11f   :  { %v1082_v1 = vmul.f32 %v1704_v53, %v1704_v53  ;;  %v988_v3 = vsel %vm902_vm3, %v1710_v63, 0.0  ;;  %v1086_v19 = vmul.f32 %v1720_v21, %v1720_v21  ;;  %v1087_v24 = vmul.f32 %v1726_v32, %v1726_v32 }
 0x120   :  { %v971_v10 = vadd.f32 %v970_v62, %v969_v58  ;;  %v1170_v11 = vadd.f32 %v1169_v2, %v1168_v56  ;;  %v1083_v62 = vmul.f32 %v1710_v63, %v1710_v63  ;;  %v1185_v0 = vsel %vm902_vm3, %v1081_v49, 0.0 }
 0x121   :  { %v1084_v2 = vmul.f32 %v1722_v26, %v1722_v26  ;;  %v992_v63 = vsel %vm902_vm3, %v1728_v36, 0.0  ;;  %v1195_v31 = vsel %vm902_vm3, %v1086_v19, 0.0 }
 0x122   :  { %v1172_v15 = vadd.f32 %v1171_v9, %v1170_v11  ;;  %v973_v61 = vadd.f32 %v972_v12, %v971_v10  ;;  %v1187_v11 = vsel %vm902_vm3, %v1082_v1, 0.0  ;;  %v990_v9 = vsel %vm902_vm3, %v1722_v26, 0.0 }
 0x123   :  { %v994_v26 = vsel %vm902_vm3, %v1720_v21, 0.0 }
 0x124   :  { %v975_v20 = vadd.f32 %v974_v14, %v973_v61  ;;  %v1174_v23 = vadd.f32 %v1173_v16, %v1172_v15  ;;  %v1189_v14 = vsel %vm902_vm3, %v1083_v62, 0.0  ;;  %v1191_v15 = vsel %vm902_vm3, %v1084_v2, 0.0 }
 0x125   :  { %v1085_v61 = vmul.f32 %v1728_v36, %v1728_v36  ;;  %v996_v36 = vsel %vm902_vm3, %v1726_v32, 0.0  ;;  %v1000_v32 = vsel %vm902_vm3, %v1744_v8, 0.0 }
 0x126   :  { %v1176_v27 = vadd.f32 %v1175_v17, %v1174_v23  ;;  %v977_v30 = vadd.f32 %v976_v6, %v975_v20 }
 0x127   :  { %v1193_v6 = vsel %vm902_vm3, %v1085_v61, 0.0 }
 0x128   :  { %v979_v39 = vadd.f32 %v978_v29, %v977_v30  ;;  %v1178_v40 = vadd.f32 %v1177_v33, %v1176_v27  ;;  %v1088_v27 = vmul.f32 %v1738_v59, %v1738_v59  ;;  %v998_v33 = vsel %vm902_vm3, %v1738_v59, 0.0 }
 0x129   :  { %v1002_v59 = vsel %vm902_vm3, %v1736_v54, 0.0 }
 0x12a   :  { %v1180_v44 = vadd.f32 %v1179_v41, %v1178_v40  ;;  %v981_v25 = vadd.f32 %v980_v37, %v979_v39  ;;  %v1197_v39 = vsel %vm902_vm3, %v1087_v24, 0.0  ;;  %v1199_v40 = vsel %vm902_vm3, %v1088_v27, 0.0 }
 0x12b   :  { %v1089_v41 = vmul.f32 %v1744_v8, %v1744_v8  ;;  %v1004_v8 = vsel %vm902_vm3, %v1742_v4, 0.0  ;;  %v1098_v24 = vmul.f32 %v1768_v7, %v1768_v7 }
 0x12c   :  { %v983_v50 = vadd.f32 %v982_v43, %v981_v25  ;;  %v1182_v52 = vadd.f32 %v1181_v46, %v1180_v44  ;;  %v1090_v44 = vmul.f32 %v1736_v54, %v1736_v54 }
 0x12d   :  { %v1201_v49 = vsel %vm902_vm3, %v1089_v41, 0.0 }
 0x12e   :  { %v1184_v56 = vadd.f32 %v1183_v47, %v1182_v52  ;;  %v985_v58 = vadd.f32 %v984_v34, %v983_v50  ;;  %v1091_v47 = vmul.f32 %v1742_v4, %v1742_v4  ;;  %v1092_v50 = vmul.f32 %v1754_v35, %v1754_v35 }
 0x12f   :  { %v1203_v34 = vsel %vm902_vm3, %v1090_v44, 0.0  ;;  %v1008_v4 = vsel %vm902_vm3, %v1760_v45, 0.0 }
 0x130   :  { %v987_v5 = vadd.f32 %v986_v57, %v985_v58  ;;  %v1186_v10 = vadd.f32 %v1185_v0, %v1184_v56  ;;  %v1006_v56 = vsel %vm902_vm3, %v1754_v35, 0.0  ;;  %v1205_v57 = vsel %vm902_vm3, %v1091_v47, 0.0 }
 0x131   :  { %v1207_v62 = vsel %vm902_vm3, %v1092_v50, 0.0  ;;  %v1093_v0 = vmul.f32 %v1760_v45, %v1760_v45  ;;  %v1010_v35 = vsel %vm902_vm3, %v1752_v28, 0.0  ;;  %v1012_v45 = vsel %vm902_vm3, %v1758_v42, 0.0 }
 0x132   :  { %v1188_v12 = vadd.f32 %v1187_v11, %v1186_v10  ;;  %v989_v53 = vadd.f32 %v988_v3, %v987_v5  ;;  %v1094_v10 = vmul.f32 %v1752_v28, %v1752_v28 }
 0x134   :  { %v991_v16 = vadd.f32 %v990_v9, %v989_v53  ;;  %v1190_v17 = vadd.f32 %v1189_v14, %v1188_v12  ;;  %v1095_v9 = vmul.f32 %v1758_v42, %v1758_v42  ;;  %v1209_v12 = vsel %vm902_vm3, %v1093_v0, 0.0 }
 0x135   :  { %v1096_v53 = vmul.f32 %v1770_v13, %v1770_v13  ;;  %v1211_v61 = vsel %vm902_vm3, %v1094_v10, 0.0  ;;  %v1016_v42 = vsel %vm902_vm3, %v1776_v22, 0.0 }
 0x136   :  { %v1192_v20 = vadd.f32 %v1191_v15, %v1190_v17  ;;  %v993_v23 = vadd.f32 %v992_v63, %v991_v16  ;;  %v1014_v16 = vsel %vm902_vm3, %v1770_v13, 0.0  ;;  %v1213_v19 = vsel %vm902_vm3, %v1095_v9, 0.0 }
 0x137   :  { %v1215_v63 = vsel %vm902_vm3, %v1096_v53, 0.0  ;;  %v1018_v13 = vsel %vm902_vm3, %v1768_v7, 0.0 }
 0x138   :  { %v995_v30 = vadd.f32 %v994_v26, %v993_v23  ;;  %v1194_v29 = vadd.f32 %v1193_v6, %v1192_v20  ;;  %v1097_v20 = vmul.f32 %v1776_v22, %v1776_v22  ;;  %v1020_v22 = vsel %vm902_vm3, %v1774_v18, 0.0 }
 0x13a   :  { %v1196_v38 = vadd.f32 %v1195_v31, %v1194_v29  ;;  %v997_v21 = vadd.f32 %v996_v36, %v995_v30  ;;  %v1099_v30 = vmul.f32 %v1774_v18, %v1774_v18  ;;  %v1217_v29 = vsel %vm902_vm3, %v1097_v20, 0.0  ;;  %v1253_v20 = vld [vmem:[%s1970_s3] sm:$0x1] }
 0x13b   :  { %v1100_v31 = vmul.f32 %v1792_v51, %v1792_v51  ;;  %v1024_v18 = vsel %vm902_vm3, %v1800_v60, 0.0 }
 0x13c   :  { %v999_v37 = vadd.f32 %v998_v33, %v997_v21  ;;  %v1198_v43 = vadd.f32 %v1197_v39, %v1196_v38  ;;  %v1219_v38 = vsel %vm902_vm3, %v1098_v24, 0.0  ;;  %v1022_v21 = vsel %vm902_vm3, %v1792_v51, 0.0 }
 0x13d   :  { %v1223_v41 = vsel %vm902_vm3, %v1100_v31, 0.0  ;;  %v1026_v51 = vsel %vm902_vm3, %v1790_v48, 0.0 }
 0x13e   :  { %v1200_v25 = vadd.f32 %v1199_v40, %v1198_v43  ;;  %v1001_v46 = vadd.f32 %v1000_v32, %v999_v37  ;;  %v1221_v40 = vsel %vm902_vm3, %v1099_v30, 0.0  ;;  %v1101_v37 = vmul.f32 %v1800_v60, %v1800_v60 }
 0x13f   :  { %v1102_v32 = vmul.f32 %v1790_v48, %v1790_v48 }
 0x140   :  { %v1003_v52 = vadd.f32 %v1002_v59, %v1001_v46  ;;  %v1202_v1 = vadd.f32 %v1201_v49, %v1200_v25  ;;  %v1103_v59 = vmul.f32 %v1798_v55, %v1798_v55  ;;  %v1225_v47 = vsel %vm902_vm3, %v1101_v37, 0.0 }
 0x142   :  { %v1204_v58 = vadd.f32 %v1203_v34, %v1202_v1  ;;  %v1005_v54 = vadd.f32 %v1004_v8, %v1003_v52  ;;  %v1227_v52 = vsel %vm902_vm3, %v1102_v32, 0.0  ;;  %v1028_v1 = vsel %vm902_vm3, %v1798_v55, 0.0 }
 0x143   :  { %v1229_v60 = vsel %vm902_vm3, %v1103_v59, 0.0 }
 0x144   :  { %v1007_v2 = vadd.f32 %v1006_v56, %v1005_v54  ;;  %v1206_v5 = vadd.f32 %v1205_v57, %v1204_v58 }
 0x146   :  { %v1208_v11 = vadd.f32 %v1207_v62, %v1206_v5  ;;  %v1009_v3 = vadd.f32 %v1008_v4, %v1007_v2  ;;  %v901_v4 = vld [vmem:[#allocation2] sm:$0x1] }
 0x148   :  { %v1011_v14 = vadd.f32 %v1010_v35, %v1009_v3  ;;  %v1210_v15 = vadd.f32 %v1209_v12, %v1208_v11  ;;  %v1039_v35 = vld [vmem:[#allocation3] sm:$0x1] }
 0x14a   :  { %v1212_v17 = vadd.f32 %v1211_v61, %v1210_v15  ;;  %v1013_v28 = vadd.f32 %v1012_v45, %v1011_v14 }
 0x14c   :  { %v1015_v23 = vadd.f32 %v1014_v16, %v1013_v28  ;;  %v1214_v26 = vadd.f32 %v1213_v19, %v1212_v17  ;;  %v1248_v28 = vld [vmem:[%s1969_s2] sm:$0x1] }
 0x14e   :  { %v1216_v6 = vadd.f32 %v1215_v63, %v1214_v26  ;;  %v1017_v27 = vadd.f32 %v1016_v42, %v1015_v23 }
 0x150   :  { %v1019_v36 = vadd.f32 %v1018_v13, %v1017_v27  ;;  %v1218_v33 = vadd.f32 %v1217_v29, %v1216_v6 }
 0x152   :  { %v1220_v39 = vadd.f32 %v1219_v38, %v1218_v33  ;;  %v1021_v7 = vadd.f32 %v1020_v22, %v1019_v36 }
 0x154   :  { %v1023_v43 = vadd.f32 %v1022_v21, %v1021_v7  ;;  %v1222_v44 = vadd.f32 %v1221_v40, %v1220_v39 }
 0x156   :  { %v1224_v25 = vadd.f32 %v1223_v41, %v1222_v44  ;;  %v1025_v46 = vadd.f32 %v1024_v18, %v1023_v43 }
 0x158   :  { %v1027_v49 = vadd.f32 %v1026_v51, %v1025_v46  ;;  %v1226_v50 = vadd.f32 %v1225_v47, %v1224_v25 }
 0x15a   :  { %v1029_v34 = vadd.f32 %v1028_v1, %v1027_v49  ;;  %v1228_v8 = vadd.f32 %v1227_v52, %v1226_v50 }
 0x15c   :  { %v1030_v56 = vrot.slane %v1029_v34, 4  ;;  %v1230_v58 = vadd.f32 %v1229_v60, %v1228_v8 }
 0x15e   :  { %v1031_v54 = vadd.f32 %v1030_v56, %v1029_v34  ;;  %v1231_v48 = vrot.slane %v1230_v58, 4 }
 0x160   :  { %v1032_v57 = vrot.slane %v1031_v54, 2  ;;  %v1232_v62 = vadd.f32 %v1231_v48, %v1230_v58 }
 0x162   :  { %v1033_v0 = vadd.f32 %v1032_v57, %v1031_v54  ;;  %v1233_v2 = vrot.slane %v1232_v62, 2 }
 0x164   :  { %v1034_v5 = vrot.slane %v1033_v0, 1  ;;  %v1234_v10 = vadd.f32 %v1233_v2, %v1232_v62 }
 0x166   :  { %v1035_v11 = vadd.f32 %v1034_v5, %v1033_v0  ;;  %v1235_v3 = vrot.slane %v1234_v10, 1 }
 0x168   :  { %v1036_v9 = vadd.f32 %v1035_v11, %v901_v4  ;;  %v1236_v55 = vadd.f32 %v1235_v3, %v1234_v10 }
 0x16a   :  { %1038 = vst.msk [vmem:[#allocation2] sm:$0x1] %vm24_vm2, %v1036_v9  ;;  %v1237_v12 = vadd.f32 %v1236_v55, %v1039_v35 }
 0x16c   :  { %1238 = vst.msk [vmem:[#allocation3] sm:$0x1] %vm24_vm2, %v1237_v12 }
 0x171   :  { %v1242_v53 = vld [vmem:[#allocation2] sm:$0x1] }
 0x172   :  { %v1243_v14 = vmul.f32 0.001953125, %v1242_v53 }
 0x173   :  { %v1244_v15 = vld [vmem:[#allocation3] sm:$0x1] }
 0x174   :  { %v1245_v61 = vmul.f32 0.001953125, %v1244_v15  ;;  %v1246_v45 = vmul.f32 %v1243_v14, %v1243_v14 }
 0x176   :  { %v1247_v16 = vsub.f32 %v1245_v61, %v1246_v45 }
 0x178   :  { %v1249_v17 = vadd.f32 1e-05, %v1247_v16 }
 0x17a   :  { %1401 = vrsqrt.f32 %v1249_v17 }
 0x184   :  { %v1402_v19 = vpop.eup %1401 }
 0x185   :  { %v1251_v63 = vmul.f32 %v1402_v19, %v1248_v28 }
 0x187   :  { %1252 = vst.msk [vmem:[%s1971_s4] sm:$0x1] %vm24_vm2, %v1251_v63  ;;  %v1254_v23 = vmul.f32 %v1251_v63, %v1243_v14 }
 0x189   :  { %v1255_v26 = vsub.f32 %v1253_v20, %v1254_v23 }
 0x18b   :  { %1256 = vst.msk [vmem:[%s1972_s5] sm:$0x1] %vm24_vm2, %v1255_v26 }

// kernel: inv_res_block.6
= control target key start
LH: loop header
LB: loop body
LE: loop exit
PB: predicated region body
PF: predicated region fallthrough
CT: control target
= control target key end

     0   :  { %vm498_vm0 = vcmask 1043456   ;;  %vm401_vm1 = vcmask 64512   ;;  %vm31_vm2 = vcmask 24576   ;;  %vm791_vm3 = vcmask 31744   ;;  %s2852_s3 = inlined_call_operand.vmem [shape: bf16[8,4], index: 3, kind: input, shape index: {}]   ;;  %s2853_s0 = inlined_call_operand.vmem [shape: bf16[512,8], index: 0, kind: input, shape index: {}]   ;;  %s2854_s1 = inlined_call_operand.vmem [shape: f32[1,8], index: 1, kind: input, shape index: {}]   ;;  %s2855_s2 = inlined_call_operand.vmem [shape: f32[1,8], index: 2, kind: input, shape index: {}]   ;;  %s2856_s6 = inlined_call_operand.vmem [shape: f32[512,4], index: 6, kind: output, shape index: {0}]   ;;  %s2857_s4 = inlined_call_operand.vmem [shape: f32[1,4], index: 4, kind: input, shape index: {}]   ;;  %s2858_s5 = inlined_call_operand.vmem [shape: f32[1,4], index: 5, kind: input, shape index: {}]   ;;  %s2859_s7 = inlined_call_operand.vmem [shape: f32[1,4], index: 7, kind: output, shape index: {1}]   ;;  %s2860_s8 = inlined_call_operand.vmem [shape: f32[1,4], index: 8, kind: output, shape index: {2}]  }
   0x1   :  { %v400_v0 = vld [vmem:[%s2852_s3] sm:$0xf]  ;;  %v1772_v6 = vld [vmem:[%s2853_s0 + $0x8] sm:$0xff]   ;;  %v1773_v7 = vld [vmem:[%s2853_s0 + $0x10] sm:$0xff]  }
   0x2   :  { %v1645_v1 = vld [vmem:[%s2853_s0] sm:$0xff]   ;;  %1904 = vmatprep.subr.msk.bf16.mxu0 %vm498_vm0, %v400_v0  ;;  %v500_v3 = vsel %vm498_vm0, %v400_v0, 0  ;;  %1905 = vmatprep.subr.msk.bf16.mxu1 %vm498_vm0, %v400_v0  ;;  %v1650_v9 = vunpack.c.l.bf16 %v1772_v6  ;;  %v1651_v10 = vunpack.c.h.bf16 %v1772_v6  ;;  %v1654_v11 = vunpack.c.l.bf16 %v1773_v7  ;;  %v1774_v13 = vld [vmem:[%s2853_s0 + $0x18] sm:$0xff]   ;;  %v1776_v35 = vld [vmem:[%s2853_s0 + $0x28] sm:$0xff]  }
   0x3   :  { %v1964_v2 = vld [vmem:[%s2854_s1] ss:$0 sm:$0xff]  ;;  %v1646_v4 = vunpack.c.l.bf16 %v1645_v1  ;;  %v1647_v5 = vunpack.c.h.bf16 %v1645_v1  ;;  %1837 = vmatpush3.bf16.msra.mxu0 %v500_v3  ;;  %v1655_v12 = vunpack.c.h.bf16 %v1773_v7  ;;  %1903 = vmatpush3.bf16.msra.mxu1 %v500_v3  ;;  %v1658_v16 = vunpack.c.l.bf16 %v1774_v13  ;;  %v1777_v40 = vld [vmem:[%s2853_s0 + $0x30] sm:$0xff]   ;;  %v1778_v51 = vld [vmem:[%s2853_s0 + $0x38] sm:$0xff]  }
   0x4   :  { %v1975_v8 = vld [vmem:[%s2855_s2] ss:$0 sm:$0xff]  ;;  %v1659_v17 = vunpack.c.h.bf16 %v1774_v13  ;;  %v171_v18 = vmul.f32 %v1650_v9, %v1964_v2  ;;  %v172_v19 = vmul.f32 %v1651_v10, %v1964_v2  ;;  %v173_v20 = vmul.f32 %v1654_v11, %v1964_v2  ;;  %v1780_v9 = vld [vmem:[%s2853_s0 + $0x48] sm:$0xff]   ;;  %v1781_v11 = vld [vmem:[%s2853_s0 + $0x50] sm:$0xff]  }
   0x5   :  { %v169_v14 = vmul.f32 %v1646_v4, %v1964_v2  ;;  %v170_v15 = vmul.f32 %v1647_v5, %v1964_v2  ;;  %v174_v21 = vmul.f32 %v1655_v12, %v1964_v2  ;;  %v175_v24 = vmul.f32 %v1658_v16, %v1964_v2  ;;  %v1775_v30 = vld [vmem:[%s2853_s0 + $0x20] sm:$0xff]  }
   0x6   :  { %v176_v25 = vmul.f32 %v1659_v17, %v1964_v2  ;;  %v242_v26 = vadd.f32 %v1975_v8, %v171_v18  ;;  %v243_v27 = vadd.f32 %v1975_v8, %v172_v19  ;;  %v244_v28 = vadd.f32 %v1975_v8, %v173_v20  ;;  %v1779_v63 = vld [vmem:[%s2853_s0 + $0x40] sm:$0xff]   ;;  %v1782_v20 = vld [vmem:[%s2853_s0 + $0x58] sm:$0xff]  }
   0x7   :  { %v240_v22 = vadd.f32 %v1975_v8, %v169_v14  ;;  %v241_v23 = vadd.f32 %v1975_v8, %v170_v15  ;;  %v245_v29 = vadd.f32 %v1975_v8, %v174_v21  ;;  %v246_v33 = vadd.f32 %v1975_v8, %v175_v24 }
   0x8   :  { %v247_v34 = vadd.f32 %v1975_v8, %v176_v25  ;;  %v306_v36 = vmax.f32 %v242_v26, 0.0  ;;  %v307_v37 = vmax.f32 %v243_v27, 0.0  ;;  %v308_v38 = vmax.f32 %v244_v28, 0.0 }
   0x9   :  { %v304_v31 = vmax.f32 %v240_v22, 0.0  ;;  %v305_v32 = vmax.f32 %v241_v23, 0.0  ;;  %v309_v39 = vmax.f32 %v245_v29, 0.0  ;;  %v1662_v42 = vunpack.c.l.bf16 %v1775_v30 }
   0xa   :  { %v369_v43 = vpack.c.bf16 %v307_v37, %v306_v36  ;;  %v1663_v45 = vunpack.c.h.bf16 %v1775_v30  ;;  %v1666_v46 = vunpack.c.l.bf16 %v1776_v35  ;;  %v310_v47 = vmax.f32 %v246_v33, 0.0 }
   0xb   :  { %v368_v41 = vpack.c.bf16 %v305_v32, %v304_v31  ;;  %v370_v44 = vpack.c.bf16 %v309_v39, %v308_v38  ;;  %v177_v48 = vmul.f32 %v1662_v42, %v1964_v2  ;;  %v1667_v49 = vunpack.c.h.bf16 %v1776_v35  ;;  %v1783_v31 = vld [vmem:[%s2853_s0 + $0x60] sm:$0xff]  }
   0xc   :  { %v1670_v50 = vunpack.c.l.bf16 %v1777_v40  ;;  %v311_v52 = vmax.f32 %v247_v34, 0.0  ;;  %v178_v53 = vmul.f32 %v1663_v45, %v1964_v2  ;;  %v179_v54 = vmul.f32 %v1666_v46, %v1964_v2 }
   0xd   :  { %1838 = vmatprep.mubr.msk.bf16.mxu0 %vm401_vm1, %v368_v41  ;;  %v1671_v55 = vunpack.c.h.bf16 %v1777_v40  ;;  %v248_v56 = vadd.f32 %v1975_v8, %v177_v48  ;;  %v180_v57 = vmul.f32 %v1667_v49, %v1964_v2  ;;  %v1674_v61 = vunpack.c.l.bf16 %v1778_v51 }
   0xe   :  { %1839 = vmatmul.mubr.msk.bf16.vlgmr.msra.gmra.mrb[0].mxu0 %vm401_vm1, %v369_v43  ;;  %v181_v58 = vmul.f32 %v1670_v50, %v1964_v2  ;;  %v249_v59 = vadd.f32 %v1975_v8, %v178_v53  ;;  %v1675_v62 = vunpack.c.h.bf16 %v1778_v51  ;;  %v250_v1 = vadd.f32 %v1975_v8, %v179_v54 }
   0xf   :  { %1842 = vmatprep.mubr.msk.bf16.mxu0 %vm401_vm1, %v370_v44  ;;  %v182_v60 = vmul.f32 %v1671_v55, %v1964_v2  ;;  %v312_v0 = vmax.f32 %v248_v56, 0.0  ;;  %v251_v3 = vadd.f32 %v1975_v8, %v180_v57  ;;  %v371_v5 = vpack.c.bf16 %v311_v52, %v310_v47  ;;  %v1784_v44 = vld [vmem:[%s2853_s0 + $0x68] sm:$0xff]   ;;  %v1785_v56 = vld [vmem:[%s2853_s0 + $0x70] sm:$0xff]  }
  0x10   :  { %v252_v4 = vadd.f32 %v1975_v8, %v181_v58  ;;  %v313_v6 = vmax.f32 %v249_v59, 0.0  ;;  %v1678_v10 = vunpack.c.l.bf16 %v1779_v63  ;;  %v183_v13 = vmul.f32 %v1674_v61, %v1964_v2 }
  0x11   :  { %v253_v7 = vadd.f32 %v1975_v8, %v182_v60  ;;  %v184_v14 = vmul.f32 %v1675_v62, %v1964_v2  ;;  %v1679_v15 = vunpack.c.h.bf16 %v1779_v63  ;;  %v314_v16 = vmax.f32 %v250_v1, 0.0  ;;  %v2074_v1 = vld [vmem:[%s2853_s0 + $0x78] sm:$0xff]  }
  0x12   :  { %v372_v12 = vpack.c.bf16 %v313_v6, %v312_v0  ;;  %v315_v17 = vmax.f32 %v251_v3, 0.0  ;;  %v316_v18 = vmax.f32 %v252_v4, 0.0  ;;  %v1682_v19 = vunpack.c.l.bf16 %v1780_v9  ;;  %v1787_v3 = vld [vmem:[%s2853_s0 + $0x80] sm:$0xff]  }
  0x13   :  { %v317_v21 = vmax.f32 %v253_v7, 0.0  ;;  %v185_v22 = vmul.f32 %v1678_v10, %v1964_v2  ;;  %v1683_v23 = vunpack.c.h.bf16 %v1780_v9  ;;  %v1686_v24 = vunpack.c.l.bf16 %v1781_v11 }
  0x14   :  { %v186_v25 = vmul.f32 %v1679_v15, %v1964_v2  ;;  %v187_v26 = vmul.f32 %v1682_v19, %v1964_v2  ;;  %v1687_v27 = vunpack.c.h.bf16 %v1781_v11  ;;  %v1690_v30 = vunpack.c.l.bf16 %v1782_v20  ;;  %v1788_v19 = vld [vmem:[%s2853_s0 + $0x88] sm:$0xff]  }
  0x15   :  { %v188_v28 = vmul.f32 %v1683_v23, %v1964_v2  ;;  %v189_v29 = vmul.f32 %v1686_v24, %v1964_v2  ;;  %v254_v32 = vadd.f32 %v1975_v8, %v183_v13  ;;  %v255_v33 = vadd.f32 %v1975_v8, %v184_v14  ;;  %v1789_v24 = vld [vmem:[%s2853_s0 + $0x90] sm:$0xff]  }
  0x16   :  { %1843 = vmatmul.mubr.msk.bf16.gmra.mrb[4].mxu0 %vm401_vm1, %v371_v5  ;;  %v190_v34 = vmul.f32 %v1687_v27, %v1964_v2  ;;  %v1691_v35 = vunpack.c.h.bf16 %v1782_v20  ;;  %v373_v36 = vpack.c.bf16 %v315_v17, %v314_v16  ;;  %v374_v37 = vpack.c.bf16 %v317_v21, %v316_v18 }
  0x17   :  { %1846 = vmatprep.mubr.msk.bf16.mxu0 %vm401_vm1, %v372_v12  ;;  %v256_v38 = vadd.f32 %v1975_v8, %v185_v22  ;;  %v191_v39 = vmul.f32 %v1690_v30, %v1964_v2  ;;  %v257_v40 = vadd.f32 %v1975_v8, %v186_v25  ;;  %v258_v41 = vadd.f32 %v1975_v8, %v187_v26 }
  0x18   :  { %v192_v42 = vmul.f32 %v1691_v35, %v1964_v2  ;;  %v1694_v43 = vunpack.c.l.bf16 %v1783_v31  ;;  %v259_v45 = vadd.f32 %v1975_v8, %v188_v28  ;;  %v260_v46 = vadd.f32 %v1975_v8, %v189_v29 }
  0x19   :  { %v261_v47 = vadd.f32 %v1975_v8, %v190_v34  ;;  %v262_v48 = vadd.f32 %v1975_v8, %v191_v39  ;;  %v1695_v50 = vunpack.c.h.bf16 %v1783_v31  ;;  %v318_v52 = vmax.f32 %v254_v32, 0.0 }
  0x1a   :  { %v263_v49 = vadd.f32 %v1975_v8, %v192_v42  ;;  %v193_v51 = vmul.f32 %v1694_v43, %v1964_v2  ;;  %v319_v53 = vmax.f32 %v255_v33, 0.0  ;;  %v1698_v54 = vunpack.c.l.bf16 %v1784_v44  ;;  %v1790_v33 = vld [vmem:[%s2853_s0 + $0x98] sm:$0xff]  }
  0x1b   :  { %v1699_v55 = vunpack.c.h.bf16 %v1784_v44  ;;  %v320_v57 = vmax.f32 %v256_v38, 0.0  ;;  %v321_v58 = vmax.f32 %v257_v40, 0.0  ;;  %v322_v59 = vmax.f32 %v258_v41, 0.0 }
  0x1c   :  { %v194_v60 = vmul.f32 %v1695_v50, %v1964_v2  ;;  %v323_v61 = vmax.f32 %v259_v45, 0.0  ;;  %v324_v62 = vmax.f32 %v260_v46, 0.0  ;;  %v325_v63 = vmax.f32 %v261_v47, 0.0  ;;  %v1791_v46 = vld [vmem:[%s2853_s0 + $0xa0] sm:$0xff]  }
  0x1d   :  { %v195_v0 = vmul.f32 %v1698_v54, %v1964_v2  ;;  %v326_v4 = vmax.f32 %v262_v48, 0.0  ;;  %v327_v5 = vmax.f32 %v263_v49, 0.0  ;;  %v2080_v6 = vadd.f32 %v1975_v8, %v193_v51 }
  0x1e   :  { %1847 = vmatmul.mubr.msk.bf16.gmra.mrb[8].mxu0 %vm401_vm1, %v373_v36  ;;  %v1702_v7 = vunpack.c.l.bf16 %v1785_v56  ;;  %v375_v9 = vpack.c.bf16 %v319_v53, %v318_v52  ;;  %v2083_v10 = vadd.f32 %v1975_v8, %v194_v60  ;;  %v196_v11 = vmul.f32 %v1699_v55, %v1964_v2  ;;  %v1792_v55 = vld [vmem:[%s2853_s0 + $0xa8] sm:$0xff]  }
  0x1f   :  { %1850 = vmatprep.mubr.msk.bf16.mxu0 %vm401_vm1, %v374_v37  ;;  %v1703_v12 = vunpack.c.h.bf16 %v1785_v56  ;;  %v376_v13 = vpack.c.bf16 %v321_v58, %v320_v57  ;;  %v1706_v14 = vunpack.c.l.bf16 %v2074_v1  ;;  %v1710_v15 = vunpack.c.l.bf16 %v1787_v3 }
  0x20   :  { %v377_v16 = vpack.c.bf16 %v323_v61, %v322_v59  ;;  %v378_v17 = vpack.c.bf16 %v325_v63, %v324_v62  ;;  %v2088_v18 = vadd.f32 %v1975_v8, %v195_v0  ;;  %v2093_v20 = vpack.c.bf16 %v327_v5, %v326_v4 }
  0x21   :  { %v328_v21 = vmax.f32 %v2080_v6, 0.0  ;;  %v197_v22 = vmul.f32 %v1702_v7, %v1964_v2  ;;  %v1711_v23 = vunpack.c.h.bf16 %v1787_v3  ;;  %v329_v25 = vmax.f32 %v2083_v10, 0.0  ;;  %v1793_v7 = vld [vmem:[%s2853_s0 + $0xb0] sm:$0xff]   ;;  %v1795_v6 = vld [vmem:[%s2853_s0 + $0xc0] sm:$0xff]  }
  0x22   :  { %v2103_v26 = vadd.f32 %v1975_v8, %v196_v11  ;;  %v198_v27 = vmul.f32 %v1703_v12, %v1964_v2  ;;  %v201_v28 = vmul.f32 %v1710_v15, %v1964_v2  ;;  %v1707_v29 = vunpack.c.h.bf16 %v2074_v1 }
  0x23   :  { %v2110_v30 = vmul.f32 %v1706_v14, %v1964_v2  ;;  %v202_v31 = vmul.f32 %v1711_v23, %v1964_v2  ;;  %v1714_v32 = vunpack.c.l.bf16 %v1788_v19  ;;  %v330_v34 = vmax.f32 %v2088_v18, 0.0  ;;  %v1797_v18 = vld [vmem:[%s2853_s0 + $0xd0] sm:$0xff]  }
  0x24   :  { %v272_v35 = vadd.f32 %v1975_v8, %v201_v28  ;;  %v1715_v36 = vunpack.c.h.bf16 %v1788_v19  ;;  %v1718_v37 = vunpack.c.l.bf16 %v1789_v24  ;;  %v2119_v38 = vadd.f32 %v1975_v8, %v197_v22 }
  0x25   :  { %v273_v39 = vadd.f32 %v1975_v8, %v202_v31  ;;  %v203_v40 = vmul.f32 %v1714_v32, %v1964_v2  ;;  %v1719_v41 = vunpack.c.h.bf16 %v1789_v24  ;;  %v1722_v45 = vunpack.c.l.bf16 %v1790_v33  ;;  %v1794_v24 = vld [vmem:[%s2853_s0 + $0xb8] sm:$0xff]  }
  0x26   :  { %1851 = vmatmul.mubr.msk.bf16.gmra.mrb[12].mxu0 %vm401_vm1, %v375_v9  ;;  %v336_v42 = vmax.f32 %v272_v35, 0.0  ;;  %v204_v43 = vmul.f32 %v1715_v36, %v1964_v2  ;;  %v205_v44 = vmul.f32 %v1718_v37, %v1964_v2  ;;  %v2129_v47 = vadd.f32 %v1975_v8, %v198_v27 }
  0x27   :  { %1854 = vmatprep.mubr.msk.bf16.mxu0 %vm401_vm1, %v376_v13  ;;  %v337_v48 = vmax.f32 %v273_v39, 0.0  ;;  %v274_v49 = vadd.f32 %v1975_v8, %v203_v40  ;;  %v206_v50 = vmul.f32 %v1719_v41, %v1964_v2  ;;  %v1723_v53 = vunpack.c.h.bf16 %v1790_v33 }
  0x28   :  { %v275_v51 = vadd.f32 %v1975_v8, %v204_v43  ;;  %v276_v52 = vadd.f32 %v1975_v8, %v205_v44  ;;  %v207_v54 = vmul.f32 %v1722_v45, %v1964_v2  ;;  %v1726_v59 = vunpack.c.l.bf16 %v1791_v46 }
  0x29   :  { %v384_v56 = vpack.c.bf16 %v337_v48, %v336_v42  ;;  %v338_v57 = vmax.f32 %v274_v49, 0.0  ;;  %v277_v58 = vadd.f32 %v1975_v8, %v206_v50  ;;  %v208_v62 = vmul.f32 %v1723_v53, %v1964_v2 }
  0x2a   :  { %v339_v60 = vmax.f32 %v275_v51, 0.0  ;;  %v340_v61 = vmax.f32 %v276_v52, 0.0  ;;  %v278_v63 = vadd.f32 %v1975_v8, %v207_v54  ;;  %v1727_v3 = vunpack.c.h.bf16 %v1791_v46  ;;  %v1796_v52 = vld [vmem:[%s2853_s0 + $0xc8] sm:$0xff]  }
  0x2b   :  { %1870 = vmatprep.mubr.msk.bf16.mxu1 %vm401_vm1, %v384_v56  ;;  %v341_v0 = vmax.f32 %v277_v58, 0.0  ;;  %v209_v4 = vmul.f32 %v1726_v59, %v1964_v2  ;;  %v1730_v5 = vunpack.c.l.bf16 %v1792_v55  ;;  %v279_v10 = vadd.f32 %v1975_v8, %v208_v62 }
  0x2c   :  { %v385_v9 = vpack.c.bf16 %v339_v60, %v338_v57  ;;  %v342_v11 = vmax.f32 %v278_v63, 0.0  ;;  %v1731_v12 = vunpack.c.h.bf16 %v1792_v55  ;;  %v210_v14 = vmul.f32 %v1727_v3, %v1964_v2 }
  0x2d   :  { %v386_v13 = vpack.c.bf16 %v341_v0, %v340_v61  ;;  %v280_v15 = vadd.f32 %v1975_v8, %v209_v4  ;;  %v1734_v22 = vunpack.c.l.bf16 %v1793_v7  ;;  %v1735_v23 = vunpack.c.h.bf16 %v1793_v7 }
  0x2e   :  { %1855 = vmatmul.mubr.msk.bf16.gmra.mrb[16].mxu0 %vm401_vm1, %v377_v16  ;;  %v211_v16 = vmul.f32 %v1730_v5, %v1964_v2  ;;  %1871 = vmatmul.mubr.msk.bf16.vlgmr.msra.gmra.mrb[0].mxu1 %vm401_vm1, %v385_v9  ;;  %v212_v19 = vmul.f32 %v1731_v12, %v1964_v2  ;;  %v380_v27 = vpack.c.bf16 %v329_v25, %v328_v21  ;;  %v331_v28 = vmax.f32 %v2103_v26, 0.0 }
  0x2f   :  { %1858 = vmatprep.mubr.msk.bf16.mxu0 %vm401_vm1, %v378_v17  ;;  %v343_v17 = vmax.f32 %v279_v10, 0.0  ;;  %1874 = vmatprep.mubr.msk.bf16.mxu1 %vm401_vm1, %v386_v13  ;;  %v281_v31 = vadd.f32 %v1975_v8, %v210_v14  ;;  %v344_v32 = vmax.f32 %v280_v15, 0.0  ;;  %v332_v33 = vmax.f32 %v2119_v38, 0.0  ;;  %v1798_v14 = vld [vmem:[%s2853_s0 + $0xd8] sm:$0xff]  }
  0x30   :  { %v200_v35 = vmul.f32 %v1707_v29, %v1964_v2  ;;  %v213_v36 = vmul.f32 %v1734_v22, %v1964_v2  ;;  %v214_v37 = vmul.f32 %v1735_v23, %v1964_v2  ;;  %v333_v21 = vmax.f32 %v2129_v47, 0.0 }
  0x31   :  { %v345_v25 = vmax.f32 %v281_v31, 0.0  ;;  %v1738_v26 = vunpack.c.l.bf16 %v1794_v24  ;;  %v1739_v39 = vunpack.c.h.bf16 %v1794_v24  ;;  %v387_v38 = vpack.c.bf16 %v343_v17, %v342_v11  ;;  %v1799_v17 = vld [vmem:[%s2853_s0 + $0xe0] sm:$0xff]  }
  0x32   :  { %v282_v1 = vadd.f32 %v1975_v8, %v211_v16  ;;  %v283_v29 = vadd.f32 %v1975_v8, %v212_v19  ;;  %v284_v40 = vadd.f32 %v1975_v8, %v213_v36  ;;  %v285_v42 = vadd.f32 %v1975_v8, %v214_v37 }
  0x33   :  { %v388_v41 = vpack.c.bf16 %v345_v25, %v344_v32  ;;  %v1742_v43 = vunpack.c.l.bf16 %v1795_v6  ;;  %v1743_v44 = vunpack.c.h.bf16 %v1795_v6  ;;  %v270_v45 = vadd.f32 %v1975_v8, %v2110_v30 }
  0x34   :  { %v271_v46 = vadd.f32 %v1975_v8, %v200_v35  ;;  %v216_v47 = vmul.f32 %v1739_v39, %v1964_v2  ;;  %v381_v48 = vpack.c.bf16 %v331_v28, %v330_v34  ;;  %v382_v49 = vpack.c.bf16 %v333_v21, %v332_v33  ;;  %v1800_v39 = vld [vmem:[%s2853_s0 + $0xe8] sm:$0xff]  }
  0x35   :  { %v346_v50 = vmax.f32 %v282_v1, 0.0  ;;  %v347_v51 = vmax.f32 %v283_v29, 0.0  ;;  %v348_v30 = vmax.f32 %v284_v40, 0.0  ;;  %v349_v53 = vmax.f32 %v285_v42, 0.0  ;;  %v1801_v29 = vld [vmem:[%s2853_s0 + $0xf0] sm:$0xff]  }
  0x36   :  { %1859 = vmatmul.mubr.msk.bf16.gmra.mrb[20].mxu0 %vm401_vm1, %v2093_v20  ;;  %v215_v20 = vmul.f32 %v1738_v26, %v1964_v2  ;;  %1875 = vmatmul.mubr.msk.bf16.gmra.mrb[4].mxu1 %vm401_vm1, %v387_v38  ;;  %v217_v54 = vmul.f32 %v1742_v43, %v1964_v2  ;;  %v218_v55 = vmul.f32 %v1743_v44, %v1964_v2  ;;  %v334_v34 = vmax.f32 %v270_v45, 0.0 }
  0x37   :  { %1862 = vmatprep.mubr.msk.bf16.mxu0 %vm401_vm1, %v380_v27  ;;  %1878 = vmatprep.mubr.msk.bf16.mxu1 %vm401_vm1, %v388_v41  ;;  %v335_v56 = vmax.f32 %v271_v46, 0.0  ;;  %v287_v58 = vadd.f32 %v1975_v8, %v216_v47  ;;  %v1746_v59 = vunpack.c.l.bf16 %v1796_v52  ;;  %v389_v60 = vpack.c.bf16 %v347_v51, %v346_v50 }
  0x38   :  { %v286_v57 = vadd.f32 %v1975_v8, %v215_v20  ;;  %v1747_v61 = vunpack.c.h.bf16 %v1796_v52  ;;  %v1750_v62 = vunpack.c.l.bf16 %v1797_v18  ;;  %v1751_v63 = vunpack.c.h.bf16 %v1797_v18  ;;  %v1802_v18 = vld [vmem:[%s2853_s0 + $0xf8] sm:$0xff]  }
  0x39   :  { %v390_v0 = vpack.c.bf16 %v349_v53, %v348_v30  ;;  %v288_v3 = vadd.f32 %v1975_v8, %v217_v54  ;;  %v289_v4 = vadd.f32 %v1975_v8, %v218_v55  ;;  %v351_v7 = vmax.f32 %v287_v58, 0.0 }
  0x3a   :  { %v350_v5 = vmax.f32 %v286_v57, 0.0  ;;  %v219_v9 = vmul.f32 %v1746_v59, %v1964_v2  ;;  %v383_v10 = vpack.c.bf16 %v335_v56, %v334_v34  ;;  %v220_v11 = vmul.f32 %v1747_v61, %v1964_v2 }
  0x3b   :  { %v221_v12 = vmul.f32 %v1750_v62, %v1964_v2  ;;  %v222_v13 = vmul.f32 %v1751_v63, %v1964_v2  ;;  %v352_v15 = vmax.f32 %v288_v3, 0.0  ;;  %v353_v16 = vmax.f32 %v289_v4, 0.0 }
  0x3c   :  { %v391_v19 = vpack.c.bf16 %v351_v7, %v350_v5  ;;  %v290_v22 = vadd.f32 %v1975_v8, %v219_v9  ;;  %v1754_v23 = vunpack.c.l.bf16 %v1798_v14  ;;  %v291_v24 = vadd.f32 %v1975_v8, %v220_v11 }
  0x3d   :  { %v292_v27 = vadd.f32 %v1975_v8, %v221_v12  ;;  %v293_v28 = vadd.f32 %v1975_v8, %v222_v13  ;;  %v1755_v31 = vunpack.c.h.bf16 %v1798_v14  ;;  %v392_v32 = vpack.c.bf16 %v353_v16, %v352_v15 }
  0x3e   :  { %1863 = vmatmul.mubr.msk.bf16.gmra.mrb[24].mxu0 %vm401_vm1, %v381_v48  ;;  %1879 = vmatmul.mubr.msk.bf16.gmra.mrb[8].mxu1 %vm401_vm1, %v389_v60  ;;  %v1758_v33 = vunpack.c.l.bf16 %v1799_v17  ;;  %v1759_v35 = vunpack.c.h.bf16 %v1799_v17  ;;  %v354_v36 = vmax.f32 %v290_v22, 0.0  ;;  %v223_v37 = vmul.f32 %v1754_v23, %v1964_v2 }
  0x3f   :  { %1866 = vmatprep.mubr.msk.bf16.mxu0 %vm401_vm1, %v382_v49  ;;  %1882 = vmatprep.mubr.msk.bf16.mxu1 %vm401_vm1, %v390_v0  ;;  %v355_v6 = vmax.f32 %v291_v24, 0.0  ;;  %v356_v21 = vmax.f32 %v292_v27, 0.0  ;;  %v357_v25 = vmax.f32 %v293_v28, 0.0  ;;  %v224_v26 = vmul.f32 %v1755_v31, %v1964_v2 }
  0x40   :  { %v225_v38 = vmul.f32 %v1758_v33, %v1964_v2  ;;  %v226_v1 = vmul.f32 %v1759_v35, %v1964_v2  ;;  %v294_v40 = vadd.f32 %v1975_v8, %v223_v37  ;;  %v1762_v41 = vunpack.c.l.bf16 %v1800_v39 }
  0x41   :  { %v393_v42 = vpack.c.bf16 %v355_v6, %v354_v36  ;;  %v394_v43 = vpack.c.bf16 %v357_v25, %v356_v21  ;;  %v295_v44 = vadd.f32 %v1975_v8, %v224_v26  ;;  %v1763_v45 = vunpack.c.h.bf16 %v1800_v39 }
  0x42   :  { %v296_v46 = vadd.f32 %v1975_v8, %v225_v38  ;;  %v297_v20 = vadd.f32 %v1975_v8, %v226_v1  ;;  %v1766_v47 = vunpack.c.l.bf16 %v1801_v29  ;;  %v1767_v48 = vunpack.c.h.bf16 %v1801_v29 }
  0x43   :  { %v227_v49 = vmul.f32 %v1762_v41, %v1964_v2  ;;  %v358_v50 = vmax.f32 %v294_v40, 0.0  ;;  %v359_v51 = vmax.f32 %v295_v44, 0.0  ;;  %v228_v52 = vmul.f32 %v1763_v45, %v1964_v2 }
  0x44   :  { %v360_v30 = vmax.f32 %v296_v46, 0.0  ;;  %v361_v53 = vmax.f32 %v297_v20, 0.0  ;;  %v229_v54 = vmul.f32 %v1766_v47, %v1964_v2  ;;  %v230_v55 = vmul.f32 %v1767_v48, %v1964_v2 }
  0x45   :  { %v298_v34 = vadd.f32 %v1975_v8, %v227_v49  ;;  %v395_v56 = vpack.c.bf16 %v359_v51, %v358_v50  ;;  %v299_v57 = vadd.f32 %v1975_v8, %v228_v52  ;;  %v1770_v58 = vunpack.c.l.bf16 %v1802_v18 }
  0x46   :  { %1867 = vmatmul.mubr.msk.bf16.gmra.mrb[28].mxu0 %vm401_vm1, %v383_v10  ;;  %1883 = vmatmul.mubr.msk.bf16.gmra.mrb[12].mxu1 %vm401_vm1, %v391_v19  ;;  %v1771_v59 = vunpack.c.h.bf16 %v1802_v18  ;;  %v396_v60 = vpack.c.bf16 %v361_v53, %v360_v30  ;;  %v300_v61 = vadd.f32 %v1975_v8, %v229_v54  ;;  %v301_v62 = vadd.f32 %v1975_v8, %v230_v55 }
  0x47   :  { %1886 = vmatprep.mubr.msk.bf16.mxu1 %vm401_vm1, %v392_v32  ;;  %v362_v63 = vmax.f32 %v298_v34, 0.0  ;;  %v363_v0 = vmax.f32 %v299_v57, 0.0  ;;  %v231_v3 = vmul.f32 %v1770_v58, %v1964_v2 }
  0x48   :  { %v232_v4 = vmul.f32 %v1771_v59, %v1964_v2  ;;  %v364_v5 = vmax.f32 %v300_v61, 0.0  ;;  %v365_v7 = vmax.f32 %v301_v62, 0.0  ;;  %v1909_v2 = vmov 0.0  }
  0x49   :  { %v397_v9 = vpack.c.bf16 %v363_v0, %v362_v63  ;;  %v302_v10 = vadd.f32 %v1975_v8, %v231_v3  ;;  %32 = vst.msk [vmem:[#allocation2] sm:$0x1] %vm31_vm2, %v1909_v2  ;;  %33 = vst.msk [vmem:[#allocation3] sm:$0x1] %vm31_vm2, %v1909_v2 }
  0x4a   :  { %v303_v11 = vadd.f32 %v1975_v8, %v232_v4  ;;  %v398_v12 = vpack.c.bf16 %v365_v7, %v364_v5 }
  0x4b   :  { %v366_v13 = vmax.f32 %v302_v10, 0.0 }
  0x4c   :  { %v367_v14 = vmax.f32 %v303_v11, 0.0 }
  0x4e   :  { %1887 = vmatmul.mubr.msk.bf16.gmra.mrb[16].mxu1 %vm401_vm1, %v393_v42  ;;  %v399_v15 = vpack.c.bf16 %v367_v14, %v366_v13 }
  0x4f   :  { %1890 = vmatprep.mubr.msk.bf16.mxu1 %vm401_vm1, %v394_v43 }
  0x56   :  { %1891 = vmatmul.mubr.msk.bf16.gmra.mrb[20].mxu1 %vm401_vm1, %v395_v56 }
  0x57   :  { %1894 = vmatprep.mubr.msk.bf16.mxu1 %vm401_vm1, %v396_v60 }
  0x5e   :  { %1895 = vmatmul.mubr.msk.bf16.gmra.mrb[24].mxu1 %vm401_vm1, %v397_v9 }
  0x5f   :  { %1898 = vmatprep.mubr.msk.bf16.mxu1 %vm401_vm1, %v398_v12 }
  0x66   :  { %1899 = vmatmul.mubr.msk.bf16.gmra.mrb[28].mxu1 %vm401_vm1, %v399_v15 }
  0xe1   :  { %v1840_v16 = vpop.f32.mrb[0].mxu0 }
  0xe2   :  { %794 = vst.msk [vmem:[%s2856_s6 + $0x10] sm:$0xff] %vm791_vm3, %v1840_v16  ;;  %v536_v8 = vpop.f32.mrb[1].mxu0  ;;  %v1383_v23 = vmul.f32 %v1840_v16, %v1840_v16  ;;  %v1247_v32 = vsel %vm791_vm3, %v1840_v16, 0.0 }
  0xe3   :  { %792 = vst.msk [vmem:[%s2856_s6] sm:$0xff] %vm791_vm3, %v536_v8  ;;  %v1381_v17 = vmul.f32 %v536_v8, %v536_v8  ;;  %v1841_v19 = vpop.f32.mrb[2].mxu0  ;;  %v1244_v24 = vsel %vm791_vm3, %v536_v8, 0.0 }
  0xe4   :  { %795 = vst.msk [vmem:[%s2856_s6 + $0x18] sm:$0xff] %vm791_vm3, %v1841_v19  ;;  %v539_v22 = vpop.f32.mrb[3].mxu0  ;;  %v1384_v35 = vmul.f32 %v1841_v19, %v1841_v19  ;;  %v1448_v21 = vsel %vm791_vm3, %v1383_v23, 0.0  ;;  %v1249_v25 = vsel %vm791_vm3, %v1841_v19, 0.0 }
  0xe5   :  { %793 = vst.msk [vmem:[%s2856_s6 + $0x8] sm:$0xff] %vm791_vm3, %v539_v22  ;;  %v1245_v27 = vsel %vm791_vm3, %v539_v22, 0.0  ;;  %v1382_v28 = vmul.f32 %v539_v22, %v539_v22  ;;  %v1445_v33 = vsel %vm791_vm3, %v1381_v17, 0.0 }
  0xe6   :  { %v1246_v31 = vadd.f32 %v1245_v27, %v1244_v24  ;;  %v1450_v29 = vsel %vm791_vm3, %v1384_v35, 0.0 }
  0xe7   :  { %v1446_v36 = vsel %vm791_vm3, %v1382_v28, 0.0 }
  0xe8   :  { %v1248_v37 = vadd.f32 %v1247_v32, %v1246_v31  ;;  %v1447_v6 = vadd.f32 %v1446_v36, %v1445_v33 }
  0xe9   :  { %v1844_v26 = vpop.f32.mrb[4].mxu0 }
  0xea   :  { %v1449_v39 = vadd.f32 %v1448_v21, %v1447_v6  ;;  %798 = vst.msk [vmem:[%s2856_s6 + $0x30] sm:$0xff] %vm791_vm3, %v1844_v26  ;;  %v552_v38 = vpop.f32.mrb[5].mxu0  ;;  %v1250_v1 = vadd.f32 %v1249_v25, %v1248_v37  ;;  %v1387_v46 = vmul.f32 %v1844_v26, %v1844_v26  ;;  %v1255_v51 = vsel %vm791_vm3, %v1844_v26, 0.0 }
  0xeb   :  { %796 = vst.msk [vmem:[%s2856_s6 + $0x20] sm:$0xff] %vm791_vm3, %v552_v38  ;;  %v1251_v40 = vsel %vm791_vm3, %v552_v38, 0.0  ;;  %v1385_v41 = vmul.f32 %v552_v38, %v552_v38  ;;  %v1845_v42 = vpop.f32.mrb[6].mxu0 }
  0xec   :  { %v1252_v43 = vadd.f32 %v1251_v40, %v1250_v1  ;;  %v1451_v44 = vadd.f32 %v1450_v29, %v1449_v39  ;;  %799 = vst.msk [vmem:[%s2856_s6 + $0x38] sm:$0xff] %vm791_vm3, %v1845_v42  ;;  %v555_v45 = vpop.f32.mrb[7].mxu0  ;;  %v1388_v52 = vmul.f32 %v1845_v42, %v1845_v42  ;;  %v1456_v55 = vsel %vm791_vm3, %v1387_v46, 0.0 }
  0xed   :  { %v1452_v20 = vsel %vm791_vm3, %v1385_v41, 0.0  ;;  %797 = vst.msk [vmem:[%s2856_s6 + $0x28] sm:$0xff] %vm791_vm3, %v555_v45  ;;  %v1253_v47 = vsel %vm791_vm3, %v555_v45, 0.0  ;;  %v1386_v48 = vmul.f32 %v555_v45, %v555_v45  ;;  %v1257_v18 = vsel %vm791_vm3, %v1845_v42, 0.0 }
  0xee   :  { %v1453_v49 = vadd.f32 %v1452_v20, %v1451_v44  ;;  %v1254_v50 = vadd.f32 %v1253_v47, %v1252_v43  ;;  %v1458_v59 = vsel %vm791_vm3, %v1388_v52, 0.0 }
  0xef   :  { %v1454_v30 = vsel %vm791_vm3, %v1386_v48, 0.0 }
  0xf0   :  { %v1256_v53 = vadd.f32 %v1255_v51, %v1254_v50  ;;  %v1455_v54 = vadd.f32 %v1454_v30, %v1453_v49 }
  0xf1   :  { %v1848_v34 = vpop.f32.mrb[8].mxu0 }
  0xf2   :  { %v1457_v56 = vadd.f32 %v1456_v55, %v1455_v54  ;;  %802 = vst.msk [vmem:[%s2856_s6 + $0x50] sm:$0xff] %vm791_vm3, %v1848_v34  ;;  %v568_v57 = vpop.f32.mrb[9].mxu0  ;;  %v1258_v58 = vadd.f32 %v1257_v18, %v1256_v53  ;;  %v1391_v4 = vmul.f32 %v1848_v34, %v1848_v34  ;;  %v1263_v12 = vsel %vm791_vm3, %v1848_v34, 0.0 }
  0xf3   :  { %800 = vst.msk [vmem:[%s2856_s6 + $0x40] sm:$0xff] %vm791_vm3, %v568_v57  ;;  %v1259_v60 = vsel %vm791_vm3, %v568_v57, 0.0  ;;  %v1389_v61 = vmul.f32 %v568_v57, %v568_v57  ;;  %v1849_v62 = vpop.f32.mrb[10].mxu0 }
  0xf4   :  { %v1260_v63 = vadd.f32 %v1259_v60, %v1258_v58  ;;  %v1459_v0 = vadd.f32 %v1458_v59, %v1457_v56  ;;  %803 = vst.msk [vmem:[%s2856_s6 + $0x58] sm:$0xff] %vm791_vm3, %v1849_v62  ;;  %v571_v3 = vpop.f32.mrb[11].mxu0  ;;  %v1392_v13 = vmul.f32 %v1849_v62, %v1849_v62  ;;  %v1464_v16 = vsel %vm791_vm3, %v1391_v4, 0.0 }
  0xf5   :  { %v1460_v5 = vsel %vm791_vm3, %v1389_v61, 0.0  ;;  %801 = vst.msk [vmem:[%s2856_s6 + $0x48] sm:$0xff] %vm791_vm3, %v571_v3  ;;  %v1261_v7 = vsel %vm791_vm3, %v571_v3, 0.0  ;;  %v1390_v9 = vmul.f32 %v571_v3, %v571_v3  ;;  %v1265_v8 = vsel %vm791_vm3, %v1849_v62, 0.0 }
  0xf6   :  { %v1461_v10 = vadd.f32 %v1460_v5, %v1459_v0  ;;  %v1262_v11 = vadd.f32 %v1261_v7, %v1260_v63  ;;  %v1466_v24 = vsel %vm791_vm3, %v1392_v13, 0.0 }
  0xf7   :  { %v1462_v14 = vsel %vm791_vm3, %v1390_v9, 0.0 }
  0xf8   :  { %v1264_v15 = vadd.f32 %v1263_v12, %v1262_v11  ;;  %v1463_v2 = vadd.f32 %v1462_v14, %v1461_v10 }
  0xf9   :  { %v1852_v17 = vpop.f32.mrb[12].mxu0 }
  0xfa   :  { %v1465_v19 = vadd.f32 %v1464_v16, %v1463_v2  ;;  %806 = vst.msk [vmem:[%s2856_s6 + $0x70] sm:$0xff] %vm791_vm3, %v1852_v17  ;;  %v584_v22 = vpop.f32.mrb[13].mxu0  ;;  %v1266_v23 = vadd.f32 %v1265_v8, %v1264_v15  ;;  %v1395_v36 = vmul.f32 %v1852_v17, %v1852_v17  ;;  %v1271_v39 = vsel %vm791_vm3, %v1852_v17, 0.0 }
  0xfb   :  { %804 = vst.msk [vmem:[%s2856_s6 + $0x60] sm:$0xff] %vm791_vm3, %v584_v22  ;;  %v1267_v27 = vsel %vm791_vm3, %v584_v22, 0.0  ;;  %v1393_v28 = vmul.f32 %v584_v22, %v584_v22  ;;  %v1853_v31 = vpop.f32.mrb[14].mxu0 }
  0xfc   :  { %v1268_v32 = vadd.f32 %v1267_v27, %v1266_v23  ;;  %v1467_v33 = vadd.f32 %v1466_v24, %v1465_v19  ;;  %807 = vst.msk [vmem:[%s2856_s6 + $0x78] sm:$0xff] %vm791_vm3, %v1853_v31  ;;  %v587_v35 = vpop.f32.mrb[15].mxu0  ;;  %v1396_v38 = vmul.f32 %v1853_v31, %v1853_v31  ;;  %v1472_v41 = vsel %vm791_vm3, %v1395_v36, 0.0 }
  0xfd   :  { %v1468_v37 = vsel %vm791_vm3, %v1393_v28, 0.0  ;;  %805 = vst.msk [vmem:[%s2856_s6 + $0x68] sm:$0xff] %vm791_vm3, %v587_v35  ;;  %v1269_v6 = vsel %vm791_vm3, %v587_v35, 0.0  ;;  %v1394_v21 = vmul.f32 %v587_v35, %v587_v35  ;;  %v1273_v42 = vsel %vm791_vm3, %v1853_v31, 0.0 }
  0xfe   :  { %v1469_v25 = vadd.f32 %v1468_v37, %v1467_v33  ;;  %v1270_v26 = vadd.f32 %v1269_v6, %v1268_v32  ;;  %v1474_v20 = vsel %vm791_vm3, %v1396_v38, 0.0 }
  0xff   :  { %v1470_v1 = vsel %vm791_vm3, %v1394_v21, 0.0 }
 0x100   :  { %v1272_v29 = vadd.f32 %v1271_v39, %v1270_v26  ;;  %v1471_v40 = vadd.f32 %v1470_v1, %v1469_v25 }
 0x101   :  { %v1856_v43 = vpop.f32.mrb[16].mxu0  ;;  %v2375_v18 = vpop.f32.mrb[0].mxu1 }
 0x102   :  { %v1473_v44 = vadd.f32 %v1472_v41, %v1471_v40  ;;  %810 = vst.msk [vmem:[%s2856_s6 + $0x90] sm:$0xff] %vm791_vm3, %v1856_v43  ;;  %v600_v45 = vpop.f32.mrb[17].mxu0  ;;  %v1274_v46 = vadd.f32 %v1273_v42, %v1272_v29  ;;  %v1399_v30 = vmul.f32 %v1856_v43, %v1856_v43  ;;  %826 = vst.msk [vmem:[%s2856_s6 + $0x110] sm:$0xff] %vm791_vm3, %v2375_v18  ;;  %v2382_v57 = vpop.f32.mrb[1].mxu1  ;;  %v1279_v58 = vsel %vm791_vm3, %v1856_v43, 0.0 }
 0x103   :  { %808 = vst.msk [vmem:[%s2856_s6 + $0x80] sm:$0xff] %vm791_vm3, %v600_v45  ;;  %v1275_v47 = vsel %vm791_vm3, %v600_v45, 0.0  ;;  %v1397_v48 = vmul.f32 %v600_v45, %v600_v45  ;;  %v1857_v49 = vpop.f32.mrb[18].mxu0  ;;  %824 = vst.msk [vmem:[%s2856_s6 + $0x100] sm:$0xff] %vm791_vm3, %v2382_v57  ;;  %v2391_v61 = vpop.f32.mrb[2].mxu1 }
 0x104   :  { %v1276_v50 = vadd.f32 %v1275_v47, %v1274_v46  ;;  %v1475_v51 = vadd.f32 %v1474_v20, %v1473_v44  ;;  %811 = vst.msk [vmem:[%s2856_s6 + $0x98] sm:$0xff] %vm791_vm3, %v1857_v49  ;;  %v603_v52 = vpop.f32.mrb[19].mxu0  ;;  %v1400_v59 = vmul.f32 %v1857_v49, %v1857_v49  ;;  %827 = vst.msk [vmem:[%s2856_s6 + $0x118] sm:$0xff] %vm791_vm3, %v2391_v61  ;;  %v2398_v0 = vpop.f32.mrb[3].mxu1  ;;  %v1480_v3 = vsel %vm791_vm3, %v1399_v30, 0.0 }
 0x105   :  { %v1476_v53 = vsel %vm791_vm3, %v1397_v48, 0.0  ;;  %809 = vst.msk [vmem:[%s2856_s6 + $0x88] sm:$0xff] %vm791_vm3, %v603_v52  ;;  %v1277_v54 = vsel %vm791_vm3, %v603_v52, 0.0  ;;  %v1398_v55 = vmul.f32 %v603_v52, %v603_v52  ;;  %v1281_v4 = vsel %vm791_vm3, %v1857_v49, 0.0  ;;  %825 = vst.msk [vmem:[%s2856_s6 + $0x108] sm:$0xff] %vm791_vm3, %v2398_v0 }
 0x106   :  { %v1477_v34 = vadd.f32 %v1476_v53, %v1475_v51  ;;  %v1278_v56 = vadd.f32 %v1277_v54, %v1276_v50  ;;  %v1482_v11 = vsel %vm791_vm3, %v1400_v59, 0.0 }
 0x107   :  { %v1478_v60 = vsel %vm791_vm3, %v1398_v55, 0.0 }
 0x108   :  { %v1280_v62 = vadd.f32 %v1279_v58, %v1278_v56  ;;  %v1479_v63 = vadd.f32 %v1478_v60, %v1477_v34 }
 0x109   :  { %v1860_v5 = vpop.f32.mrb[20].mxu0  ;;  %v2427_v23 = vpop.f32.mrb[4].mxu1 }
 0x10a   :  { %v1481_v7 = vadd.f32 %v1480_v3, %v1479_v63  ;;  %814 = vst.msk [vmem:[%s2856_s6 + $0xb0] sm:$0xff] %vm791_vm3, %v1860_v5  ;;  %v616_v9 = vpop.f32.mrb[21].mxu0  ;;  %v1282_v10 = vadd.f32 %v1281_v4, %v1280_v62  ;;  %v1403_v8 = vmul.f32 %v1860_v5, %v1860_v5  ;;  %830 = vst.msk [vmem:[%s2856_s6 + $0x130] sm:$0xff] %vm791_vm3, %v2427_v23  ;;  %v2434_v28 = vpop.f32.mrb[5].mxu1  ;;  %v1287_v31 = vsel %vm791_vm3, %v1860_v5, 0.0 }
 0x10b   :  { %812 = vst.msk [vmem:[%s2856_s6 + $0xa0] sm:$0xff] %vm791_vm3, %v616_v9  ;;  %v1283_v12 = vsel %vm791_vm3, %v616_v9, 0.0  ;;  %v1401_v13 = vmul.f32 %v616_v9, %v616_v9  ;;  %v1861_v14 = vpop.f32.mrb[22].mxu0  ;;  %828 = vst.msk [vmem:[%s2856_s6 + $0x120] sm:$0xff] %vm791_vm3, %v2434_v28  ;;  %v2443_v35 = vpop.f32.mrb[6].mxu1 }
 0x10c   :  { %v1284_v15 = vadd.f32 %v1283_v12, %v1282_v10  ;;  %v1483_v2 = vadd.f32 %v1482_v11, %v1481_v7  ;;  %815 = vst.msk [vmem:[%s2856_s6 + $0xb8] sm:$0xff] %vm791_vm3, %v1861_v14  ;;  %v619_v16 = vpop.f32.mrb[23].mxu0  ;;  %v1404_v32 = vmul.f32 %v1861_v14, %v1861_v14  ;;  %831 = vst.msk [vmem:[%s2856_s6 + $0x138] sm:$0xff] %vm791_vm3, %v2443_v35  ;;  %v2450_v6 = vpop.f32.mrb[7].mxu1  ;;  %v1488_v21 = vsel %vm791_vm3, %v1403_v8, 0.0 }
 0x10d   :  { %v1484_v17 = vsel %vm791_vm3, %v1401_v13, 0.0  ;;  %813 = vst.msk [vmem:[%s2856_s6 + $0xa8] sm:$0xff] %vm791_vm3, %v619_v16  ;;  %v1285_v19 = vsel %vm791_vm3, %v619_v16, 0.0  ;;  %v1402_v22 = vmul.f32 %v619_v16, %v619_v16  ;;  %v1289_v25 = vsel %vm791_vm3, %v1861_v14, 0.0  ;;  %829 = vst.msk [vmem:[%s2856_s6 + $0x128] sm:$0xff] %vm791_vm3, %v2450_v6 }
 0x10e   :  { %v1485_v24 = vadd.f32 %v1484_v17, %v1483_v2  ;;  %v1286_v27 = vadd.f32 %v1285_v19, %v1284_v15  ;;  %v1490_v29 = vsel %vm791_vm3, %v1404_v32, 0.0  ;;  %v1413_v32 = vmul.f32 %v2382_v57, %v2382_v57 }
 0x10f   :  { %v1486_v33 = vsel %vm791_vm3, %v1402_v22, 0.0 }
 0x110   :  { %v1288_v36 = vadd.f32 %v1287_v31, %v1286_v27  ;;  %v1487_v37 = vadd.f32 %v1486_v33, %v1485_v24 }
 0x111   :  { %v1864_v26 = vpop.f32.mrb[24].mxu0  ;;  %v2479_v49 = vpop.f32.mrb[8].mxu1 }
 0x112   :  { %v1489_v39 = vadd.f32 %v1488_v21, %v1487_v37  ;;  %818 = vst.msk [vmem:[%s2856_s6 + $0xd0] sm:$0xff] %vm791_vm3, %v1864_v26  ;;  %v632_v38 = vpop.f32.mrb[25].mxu0  ;;  %v1290_v1 = vadd.f32 %v1289_v25, %v1288_v36  ;;  %v1407_v46 = vmul.f32 %v1864_v26, %v1864_v26  ;;  %834 = vst.msk [vmem:[%s2856_s6 + $0x150] sm:$0xff] %vm791_vm3, %v2479_v49  ;;  %v2486_v52 = vpop.f32.mrb[9].mxu1  ;;  %v1295_v30 = vsel %vm791_vm3, %v1864_v26, 0.0 }
 0x113   :  { %816 = vst.msk [vmem:[%s2856_s6 + $0xc0] sm:$0xff] %vm791_vm3, %v632_v38  ;;  %v1291_v40 = vsel %vm791_vm3, %v632_v38, 0.0  ;;  %v1405_v41 = vmul.f32 %v632_v38, %v632_v38  ;;  %v1865_v42 = vpop.f32.mrb[26].mxu0  ;;  %832 = vst.msk [vmem:[%s2856_s6 + $0x140] sm:$0xff] %vm791_vm3, %v2486_v52  ;;  %v2495_v55 = vpop.f32.mrb[10].mxu1 }
 0x114   :  { %v1292_v43 = vadd.f32 %v1291_v40, %v1290_v1  ;;  %v1491_v44 = vadd.f32 %v1490_v29, %v1489_v39  ;;  %819 = vst.msk [vmem:[%s2856_s6 + $0xd8] sm:$0xff] %vm791_vm3, %v1865_v42  ;;  %v635_v45 = vpop.f32.mrb[27].mxu0  ;;  %v1408_v53 = vmul.f32 %v1865_v42, %v1865_v42  ;;  %835 = vst.msk [vmem:[%s2856_s6 + $0x158] sm:$0xff] %vm791_vm3, %v2495_v55  ;;  %v2502_v58 = vpop.f32.mrb[11].mxu1  ;;  %v1496_v59 = vsel %vm791_vm3, %v1407_v46, 0.0 }
 0x115   :  { %v1492_v20 = vsel %vm791_vm3, %v1405_v41, 0.0  ;;  %817 = vst.msk [vmem:[%s2856_s6 + $0xc8] sm:$0xff] %vm791_vm3, %v635_v45  ;;  %v1293_v47 = vsel %vm791_vm3, %v635_v45, 0.0  ;;  %v1406_v48 = vmul.f32 %v635_v45, %v635_v45  ;;  %v1297_v60 = vsel %vm791_vm3, %v1865_v42, 0.0  ;;  %833 = vst.msk [vmem:[%s2856_s6 + $0x148] sm:$0xff] %vm791_vm3, %v2502_v58 }
 0x116   :  { %v1493_v50 = vadd.f32 %v1492_v20, %v1491_v44  ;;  %v1294_v51 = vadd.f32 %v1293_v47, %v1292_v43  ;;  %v1498_v5 = vsel %vm791_vm3, %v1408_v53, 0.0  ;;  %v1307_v39 = vsel %vm791_vm3, %v2382_v57, 0.0 }
 0x117   :  { %v1494_v54 = vsel %vm791_vm3, %v1406_v48, 0.0  ;;  %v1508_v40 = vsel %vm791_vm3, %v1413_v32, 0.0  ;;  %v1414_v41 = vmul.f32 %v2398_v0, %v2398_v0  ;;  %v1415_v57 = vmul.f32 %v2375_v18, %v2375_v18 }
 0x118   :  { %v1296_v34 = vadd.f32 %v1295_v30, %v1294_v51  ;;  %v1495_v56 = vadd.f32 %v1494_v54, %v1493_v50  ;;  %v1309_v44 = vsel %vm791_vm3, %v2398_v0, 0.0  ;;  %v1311_v48 = vsel %vm791_vm3, %v2375_v18, 0.0 }
 0x119   :  { %v1868_v62 = vpop.f32.mrb[28].mxu0  ;;  %v2531_v8 = vpop.f32.mrb[12].mxu1  ;;  %v1416_v50 = vmul.f32 %v2391_v61, %v2391_v61  ;;  %v1510_v0 = vsel %vm791_vm3, %v1414_v41, 0.0  ;;  %v1417_v51 = vmul.f32 %v2434_v28, %v2434_v28  ;;  %v1327_v41 = vsel %vm791_vm3, %v2479_v49, 0.0 }
 0x11a   :  { %v1497_v63 = vadd.f32 %v1496_v59, %v1495_v56  ;;  %822 = vst.msk [vmem:[%s2856_s6 + $0xf0] sm:$0xff] %vm791_vm3, %v1868_v62  ;;  %v648_v3 = vpop.f32.mrb[29].mxu0  ;;  %v1298_v4 = vadd.f32 %v1297_v60, %v1296_v34  ;;  %v1411_v14 = vmul.f32 %v1868_v62, %v1868_v62  ;;  %838 = vst.msk [vmem:[%s2856_s6 + $0x170] sm:$0xff] %vm791_vm3, %v2531_v8  ;;  %v2538_v22 = vpop.f32.mrb[13].mxu1  ;;  %v1303_v24 = vsel %vm791_vm3, %v1868_v62, 0.0 }
 0x11b   :  { %820 = vst.msk [vmem:[%s2856_s6 + $0xe0] sm:$0xff] %vm791_vm3, %v648_v3  ;;  %v1299_v7 = vsel %vm791_vm3, %v648_v3, 0.0  ;;  %v1409_v9 = vmul.f32 %v648_v3, %v648_v3  ;;  %v1869_v10 = vpop.f32.mrb[30].mxu0  ;;  %836 = vst.msk [vmem:[%s2856_s6 + $0x160] sm:$0xff] %vm791_vm3, %v2538_v22  ;;  %v2549_v33 = vpop.f32.mrb[14].mxu1  ;;  %v1512_v34 = vsel %vm791_vm3, %v1415_v57, 0.0 }
 0x11c   :  { %v1300_v11 = vadd.f32 %v1299_v7, %v1298_v4  ;;  %v1499_v12 = vadd.f32 %v1498_v5, %v1497_v63  ;;  %823 = vst.msk [vmem:[%s2856_s6 + $0xf8] sm:$0xff] %vm791_vm3, %v1869_v10  ;;  %v651_v13 = vpop.f32.mrb[31].mxu0  ;;  %v1412_v27 = vmul.f32 %v1869_v10, %v1869_v10  ;;  %839 = vst.msk [vmem:[%s2856_s6 + $0x178] sm:$0xff] %vm791_vm3, %v2549_v33  ;;  %v2556_v21 = vpop.f32.mrb[15].mxu1  ;;  %v1504_v25 = vsel %vm791_vm3, %v1411_v14, 0.0 }
 0x11d   :  { %v1500_v15 = vsel %vm791_vm3, %v1409_v9, 0.0  ;;  %821 = vst.msk [vmem:[%s2856_s6 + $0xe8] sm:$0xff] %vm791_vm3, %v651_v13  ;;  %v1301_v2 = vsel %vm791_vm3, %v651_v13, 0.0  ;;  %v1410_v16 = vmul.f32 %v651_v13, %v651_v13  ;;  %v1305_v26 = vsel %vm791_vm3, %v1869_v10, 0.0  ;;  %837 = vst.msk [vmem:[%s2856_s6 + $0x168] sm:$0xff] %vm791_vm3, %v2556_v21 }
 0x11e   :  { %v1501_v17 = vadd.f32 %v1500_v15, %v1499_v12  ;;  %v1302_v19 = vadd.f32 %v1301_v2, %v1300_v11  ;;  %v1506_v29 = vsel %vm791_vm3, %v1412_v27, 0.0  ;;  %v1313_v56 = vsel %vm791_vm3, %v2391_v61, 0.0 }
 0x11f   :  { %v1502_v31 = vsel %vm791_vm3, %v1410_v16, 0.0  ;;  %v1315_v59 = vsel %vm791_vm3, %v2434_v28, 0.0  ;;  %v1514_v63 = vsel %vm791_vm3, %v1416_v50, 0.0  ;;  %v1516_v3 = vsel %vm791_vm3, %v1417_v51, 0.0 }
 0x120   :  { %v1304_v36 = vadd.f32 %v1303_v24, %v1302_v19  ;;  %v1503_v37 = vadd.f32 %v1502_v31, %v1501_v17  ;;  %v1418_v4 = vmul.f32 %v2450_v6, %v2450_v6  ;;  %v1419_v28 = vmul.f32 %v2427_v23, %v2427_v23 }
 0x121   :  { %v2575_v45 = vpop.f32.mrb[16].mxu1  ;;  %v1317_v7 = vsel %vm791_vm3, %v2450_v6, 0.0  ;;  %v1319_v13 = vsel %vm791_vm3, %v2427_v23, 0.0  ;;  %v1420_v14 = vmul.f32 %v2443_v35, %v2443_v35  ;;  %v1421_v15 = vmul.f32 %v2486_v52, %v2486_v52 }
 0x122   :  { %v1505_v38 = vadd.f32 %v1504_v25, %v1503_v37  ;;  %v1306_v1 = vadd.f32 %v1305_v26, %v1304_v36  ;;  %842 = vst.msk [vmem:[%s2856_s6 + $0x190] sm:$0xff] %vm791_vm3, %v2575_v45  ;;  %v2582_v47 = vpop.f32.mrb[17].mxu1  ;;  %v1518_v6 = vsel %vm791_vm3, %v1418_v4, 0.0  ;;  %v1520_v19 = vsel %vm791_vm3, %v1419_v28, 0.0 }
 0x123   :  { %840 = vst.msk [vmem:[%s2856_s6 + $0x180] sm:$0xff] %vm791_vm3, %v2582_v47  ;;  %v2596_v30 = vpop.f32.mrb[18].mxu1  ;;  %v1321_v24 = vsel %vm791_vm3, %v2443_v35, 0.0  ;;  %v1323_v27 = vsel %vm791_vm3, %v2486_v52, 0.0  ;;  %v1522_v36 = vsel %vm791_vm3, %v1420_v14, 0.0  ;;  %v1524_v37 = vsel %vm791_vm3, %v1421_v15, 0.0 }
 0x124   :  { %v1308_v42 = vadd.f32 %v1307_v39, %v1306_v1  ;;  %v1507_v43 = vadd.f32 %v1506_v29, %v1505_v38  ;;  %843 = vst.msk [vmem:[%s2856_s6 + $0x198] sm:$0xff] %vm791_vm3, %v2596_v30  ;;  %v2603_v18 = vpop.f32.mrb[19].mxu1  ;;  %v1422_v25 = vmul.f32 %v2502_v58, %v2502_v58  ;;  %v1423_v52 = vmul.f32 %v2479_v49, %v2479_v49 }
 0x125   :  { %841 = vst.msk [vmem:[%s2856_s6 + $0x188] sm:$0xff] %vm791_vm3, %v2603_v18  ;;  %v1325_v39 = vsel %vm791_vm3, %v2502_v58, 0.0  ;;  %v1331_v50 = vsel %vm791_vm3, %v2538_v22, 0.0  ;;  %v1335_v4 = vsel %vm791_vm3, %v2531_v8, 0.0  ;;  %v1339_v14 = vsel %vm791_vm3, %v2582_v47, 0.0 }
 0x126   :  { %v1509_v46 = vadd.f32 %v1508_v40, %v1507_v43  ;;  %v1310_v20 = vadd.f32 %v1309_v44, %v1308_v42  ;;  %v1424_v42 = vmul.f32 %v2495_v55, %v2495_v55  ;;  %v1526_v58 = vsel %vm791_vm3, %v1422_v25, 0.0 }
 0x127   :  { %v1425_v43 = vmul.f32 %v2538_v22, %v2538_v22  ;;  %v1427_v22 = vmul.f32 %v2531_v8, %v2531_v8 }
 0x128   :  { %v1312_v53 = vadd.f32 %v1311_v48, %v1310_v20  ;;  %v1511_v54 = vadd.f32 %v1510_v0, %v1509_v46  ;;  %v1528_v20 = vsel %vm791_vm3, %v1423_v52, 0.0  ;;  %v1329_v48 = vsel %vm791_vm3, %v2495_v55, 0.0 }
 0x129   :  { %v2623_v9 = vpop.f32.mrb[20].mxu1 }
 0x12a   :  { %v1513_v60 = vadd.f32 %v1512_v34, %v1511_v54  ;;  %v1314_v62 = vadd.f32 %v1313_v56, %v1312_v53  ;;  %846 = vst.msk [vmem:[%s2856_s6 + $0x1b0] sm:$0xff] %vm791_vm3, %v2623_v9  ;;  %v2630_v12 = vpop.f32.mrb[21].mxu1  ;;  %v1530_v53 = vsel %vm791_vm3, %v1424_v42, 0.0  ;;  %v1532_v54 = vsel %vm791_vm3, %v1425_v43, 0.0 }
 0x12b   :  { %844 = vst.msk [vmem:[%s2856_s6 + $0x1a0] sm:$0xff] %vm791_vm3, %v2630_v12  ;;  %v2644_v2 = vpop.f32.mrb[22].mxu1  ;;  %v1426_v34 = vmul.f32 %v2556_v21, %v2556_v21 }
 0x12c   :  { %v1316_v5 = vadd.f32 %v1315_v59, %v1314_v62  ;;  %v1515_v61 = vadd.f32 %v1514_v63, %v1513_v60  ;;  %847 = vst.msk [vmem:[%s2856_s6 + $0x1b8] sm:$0xff] %vm791_vm3, %v2644_v2  ;;  %v2651_v23 = vpop.f32.mrb[23].mxu1  ;;  %v1333_v59 = vsel %vm791_vm3, %v2556_v21, 0.0 }
 0x12d   :  { %845 = vst.msk [vmem:[%s2856_s6 + $0x1a8] sm:$0xff] %vm791_vm3, %v2651_v23  ;;  %v1534_v21 = vsel %vm791_vm3, %v1426_v34, 0.0 }
 0x12e   :  { %v1517_v10 = vadd.f32 %v1516_v3, %v1515_v61  ;;  %v1318_v11 = vadd.f32 %v1317_v7, %v1316_v5  ;;  %v1428_v5 = vmul.f32 %v2549_v33, %v2549_v33  ;;  %v1429_v61 = vmul.f32 %v2582_v47, %v2582_v47 }
 0x12f   :  { %v1431_v47 = vmul.f32 %v2575_v45, %v2575_v45 }
 0x130   :  { %v1320_v16 = vadd.f32 %v1319_v13, %v1318_v11  ;;  %v1519_v17 = vadd.f32 %v1518_v6, %v1517_v10  ;;  %v1536_v11 = vsel %vm791_vm3, %v1427_v22, 0.0  ;;  %v1337_v13 = vsel %vm791_vm3, %v2549_v33, 0.0 }
 0x131   :  { %v2671_v38 = vpop.f32.mrb[24].mxu1 }
 0x132   :  { %v1521_v31 = vadd.f32 %v1520_v19, %v1519_v17  ;;  %v1322_v32 = vadd.f32 %v1321_v24, %v1320_v16  ;;  %850 = vst.msk [vmem:[%s2856_s6 + $0x1d0] sm:$0xff] %vm791_vm3, %v2671_v38  ;;  %v2678_v40 = vpop.f32.mrb[25].mxu1  ;;  %v1538_v16 = vsel %vm791_vm3, %v1428_v5, 0.0  ;;  %v1540_v17 = vsel %vm791_vm3, %v1429_v61, 0.0 }
 0x133   :  { %848 = vst.msk [vmem:[%s2856_s6 + $0x1c0] sm:$0xff] %vm791_vm3, %v2678_v40  ;;  %v2692_v57 = vpop.f32.mrb[26].mxu1  ;;  %v1430_v19 = vmul.f32 %v2603_v18, %v2603_v18  ;;  %v1439_v5 = vmul.f32 %v2671_v38, %v2671_v38 }
 0x134   :  { %v1324_v26 = vadd.f32 %v1323_v27, %v1322_v32  ;;  %v1523_v35 = vadd.f32 %v1522_v36, %v1521_v31  ;;  %851 = vst.msk [vmem:[%s2856_s6 + $0x1d8] sm:$0xff] %vm791_vm3, %v2692_v57  ;;  %v2699_v49 = vpop.f32.mrb[27].mxu1  ;;  %v1341_v27 = vsel %vm791_vm3, %v2603_v18, 0.0  ;;  %v1343_v36 = vsel %vm791_vm3, %v2575_v45, 0.0 }
 0x135   :  { %849 = vst.msk [vmem:[%s2856_s6 + $0x1c8] sm:$0xff] %vm791_vm3, %v2699_v49  ;;  %v1542_v25 = vsel %vm791_vm3, %v1430_v19, 0.0  ;;  %v1345_v18 = vsel %vm791_vm3, %v2596_v30, 0.0 }
 0x136   :  { %v1525_v1 = vadd.f32 %v1524_v37, %v1523_v35  ;;  %v1326_v29 = vadd.f32 %v1325_v39, %v1324_v26  ;;  %v1432_v37 = vmul.f32 %v2596_v30, %v2596_v30  ;;  %v1433_v26 = vmul.f32 %v2630_v12, %v2630_v12 }
 0x137   :  { %v1544_v39 = vsel %vm791_vm3, %v1431_v47, 0.0  ;;  %v1349_v30 = vsel %vm791_vm3, %v2651_v23, 0.0 }
 0x138   :  { %v1328_v44 = vadd.f32 %v1327_v41, %v1326_v29  ;;  %v1527_v46 = vadd.f32 %v1526_v58, %v1525_v1  ;;  %v1347_v1 = vsel %vm791_vm3, %v2630_v12, 0.0  ;;  %v1546_v41 = vsel %vm791_vm3, %v1432_v37, 0.0 }
 0x139   :  { %v2719_v60 = vpop.f32.mrb[28].mxu1  ;;  %v1548_v42 = vsel %vm791_vm3, %v1433_v26, 0.0  ;;  %v1434_v58 = vmul.f32 %v2651_v23, %v2651_v23  ;;  %v1351_v12 = vsel %vm791_vm3, %v2623_v9, 0.0  ;;  %v1353_v23 = vsel %vm791_vm3, %v2644_v2, 0.0 }
 0x13a   :  { %v1529_v0 = vadd.f32 %v1528_v20, %v1527_v46  ;;  %v1330_v51 = vadd.f32 %v1329_v48, %v1328_v44  ;;  %854 = vst.msk [vmem:[%s2856_s6 + $0x1f0] sm:$0xff] %vm791_vm3, %v2719_v60  ;;  %v2726_v3 = vpop.f32.mrb[29].mxu1  ;;  %v1435_v46 = vmul.f32 %v2623_v9, %v2623_v9 }
 0x13b   :  { %852 = vst.msk [vmem:[%s2856_s6 + $0x1e0] sm:$0xff] %vm791_vm3, %v2726_v3  ;;  %v2740_v28 = vpop.f32.mrb[30].mxu1 }
 0x13c   :  { %v1332_v56 = vadd.f32 %v1331_v50, %v1330_v51  ;;  %v1531_v55 = vadd.f32 %v1530_v53, %v1529_v0  ;;  %855 = vst.msk [vmem:[%s2856_s6 + $0x1f8] sm:$0xff] %vm791_vm3, %v2740_v28  ;;  %v2747_v8 = vpop.f32.mrb[31].mxu1  ;;  %v1436_v50 = vmul.f32 %v2644_v2, %v2644_v2  ;;  %v1550_v0 = vsel %vm791_vm3, %v1434_v58, 0.0 }
 0x13d   :  { %853 = vst.msk [vmem:[%s2856_s6 + $0x1e8] sm:$0xff] %vm791_vm3, %v2747_v8  ;;  %v1437_v51 = vmul.f32 %v2678_v40, %v2678_v40  ;;  %v1552_v34 = vsel %vm791_vm3, %v1435_v46, 0.0  ;;  %v1357_v2 = vsel %vm791_vm3, %v2699_v49, 0.0 }
 0x13e   :  { %v1533_v62 = vadd.f32 %v1532_v54, %v1531_v55  ;;  %v1334_v63 = vadd.f32 %v1333_v59, %v1332_v56  ;;  %v1355_v56 = vsel %vm791_vm3, %v2678_v40, 0.0  ;;  %v1554_v22 = vsel %vm791_vm3, %v1436_v50, 0.0 }
 0x13f   :  { %v1556_v59 = vsel %vm791_vm3, %v1437_v51, 0.0  ;;  %v1359_v40 = vsel %vm791_vm3, %v2671_v38, 0.0 }
 0x140   :  { %v1336_v7 = vadd.f32 %v1335_v4, %v1334_v63  ;;  %v1535_v10 = vadd.f32 %v1534_v21, %v1533_v62  ;;  %v1438_v62 = vmul.f32 %v2699_v49, %v2699_v49  ;;  %v1361_v49 = vsel %vm791_vm3, %v2692_v57, 0.0 }
 0x142   :  { %v1537_v6 = vadd.f32 %v1536_v11, %v1535_v10  ;;  %v1338_v15 = vadd.f32 %v1337_v13, %v1336_v7  ;;  %v1440_v7 = vmul.f32 %v2692_v57, %v2692_v57  ;;  %v1558_v10 = vsel %vm791_vm3, %v1438_v62, 0.0  ;;  %v1594_v62 = vld [vmem:[%s2858_s5] sm:$0x1] }
 0x143   :  { %v1441_v11 = vmul.f32 %v2726_v3, %v2726_v3  ;;  %v1365_v57 = vsel %vm791_vm3, %v2747_v8, 0.0 }
 0x144   :  { %v1340_v24 = vadd.f32 %v1339_v14, %v1338_v15  ;;  %v1539_v33 = vadd.f32 %v1538_v16, %v1537_v6  ;;  %v1560_v6 = vsel %vm791_vm3, %v1439_v5, 0.0  ;;  %v1363_v15 = vsel %vm791_vm3, %v2726_v3, 0.0 }
 0x145   :  { %v1564_v19 = vsel %vm791_vm3, %v1441_v11, 0.0  ;;  %v1367_v3 = vsel %vm791_vm3, %v2719_v60, 0.0 }
 0x146   :  { %v1541_v31 = vadd.f32 %v1540_v17, %v1539_v33  ;;  %v1342_v32 = vadd.f32 %v1341_v27, %v1340_v24  ;;  %v1562_v17 = vsel %vm791_vm3, %v1440_v7, 0.0  ;;  %v1442_v24 = vmul.f32 %v2747_v8, %v2747_v8 }
 0x147   :  { %v1443_v27 = vmul.f32 %v2719_v60, %v2719_v60 }
 0x148   :  { %v1344_v35 = vadd.f32 %v1343_v36, %v1342_v32  ;;  %v1543_v52 = vadd.f32 %v1542_v25, %v1541_v31  ;;  %v1444_v36 = vmul.f32 %v2740_v28, %v2740_v28  ;;  %v1566_v37 = vsel %vm791_vm3, %v1442_v24, 0.0 }
 0x14a   :  { %v1545_v29 = vadd.f32 %v1544_v39, %v1543_v52  ;;  %v1346_v45 = vadd.f32 %v1345_v18, %v1344_v35  ;;  %v1568_v35 = vsel %vm791_vm3, %v1443_v27, 0.0  ;;  %v1369_v52 = vsel %vm791_vm3, %v2740_v28, 0.0 }
 0x14b   :  { %v1570_v8 = vsel %vm791_vm3, %v1444_v36, 0.0 }
 0x14c   :  { %v1348_v43 = vadd.f32 %v1347_v1, %v1346_v45  ;;  %v1547_v44 = vadd.f32 %v1546_v41, %v1545_v29 }
 0x14e   :  { %v1549_v20 = vadd.f32 %v1548_v42, %v1547_v44  ;;  %v1350_v48 = vadd.f32 %v1349_v30, %v1348_v43  ;;  %v1243_v30 = vld [vmem:[#allocation2] sm:$0x1] }
 0x150   :  { %v1352_v53 = vadd.f32 %v1351_v12, %v1350_v48  ;;  %v1551_v54 = vadd.f32 %v1550_v0, %v1549_v20  ;;  %v1380_v12 = vld [vmem:[#allocation3] sm:$0x1] }
 0x152   :  { %v1553_v55 = vadd.f32 %v1552_v34, %v1551_v54  ;;  %v1354_v9 = vadd.f32 %v1353_v23, %v1352_v53 }
 0x154   :  { %v1356_v63 = vadd.f32 %v1355_v56, %v1354_v9  ;;  %v1555_v4 = vadd.f32 %v1554_v22, %v1553_v55  ;;  %v1589_v9 = vld [vmem:[%s2857_s4] sm:$0x1] }
 0x156   :  { %v1557_v21 = vadd.f32 %v1556_v59, %v1555_v4  ;;  %v1358_v61 = vadd.f32 %v1357_v2, %v1356_v63 }
 0x158   :  { %v1360_v13 = vadd.f32 %v1359_v40, %v1358_v61  ;;  %v1559_v14 = vadd.f32 %v1558_v10, %v1557_v21 }
 0x15a   :  { %v1561_v16 = vadd.f32 %v1560_v6, %v1559_v14  ;;  %v1362_v38 = vadd.f32 %v1361_v49, %v1360_v13 }
 0x15c   :  { %v1364_v33 = vadd.f32 %v1363_v15, %v1362_v38  ;;  %v1563_v47 = vadd.f32 %v1562_v17, %v1561_v16 }
 0x15e   :  { %v1565_v31 = vadd.f32 %v1564_v19, %v1563_v47  ;;  %v1366_v32 = vadd.f32 %v1365_v57, %v1364_v33 }
 0x160   :  { %v1368_v25 = vadd.f32 %v1367_v3, %v1366_v32  ;;  %v1567_v26 = vadd.f32 %v1566_v37, %v1565_v31 }
 0x162   :  { %v1370_v39 = vadd.f32 %v1369_v52, %v1368_v25  ;;  %v1569_v18 = vadd.f32 %v1568_v35, %v1567_v26 }
 0x164   :  { %v1371_v1 = vrot.slane %v1370_v39, 4  ;;  %v1571_v29 = vadd.f32 %v1570_v8, %v1569_v18 }
 0x166   :  { %v1372_v45 = vadd.f32 %v1371_v1, %v1370_v39  ;;  %v1572_v60 = vrot.slane %v1571_v29, 4 }
 0x168   :  { %v1373_v41 = vrot.slane %v1372_v45, 2  ;;  %v1573_v42 = vadd.f32 %v1572_v60, %v1571_v29 }
 0x16a   :  { %v1374_v58 = vadd.f32 %v1373_v41, %v1372_v45  ;;  %v1574_v43 = vrot.slane %v1573_v42, 2 }
 0x16c   :  { %v1375_v44 = vrot.slane %v1374_v58, 1  ;;  %v1575_v46 = vadd.f32 %v1574_v43, %v1573_v42 }
 0x16e   :  { %v1376_v20 = vadd.f32 %v1375_v44, %v1374_v58  ;;  %v1576_v48 = vrot.slane %v1575_v46, 1 }
 0x170   :  { %v1377_v50 = vadd.f32 %v1376_v20, %v1243_v30  ;;  %v1577_v28 = vadd.f32 %v1576_v48, %v1575_v46 }
 0x172   :  { %1379 = vst.msk [vmem:[#allocation2] sm:$0x1] %vm31_vm2, %v1377_v50  ;;  %v1578_v0 = vadd.f32 %v1577_v28, %v1380_v12 }
 0x174   :  { %1579 = vst.msk [vmem:[#allocation3] sm:$0x1] %vm31_vm2, %v1578_v0 }
 0x179   :  { %v1583_v51 = vld [vmem:[#allocation2] sm:$0x1] }
 0x17a   :  { %v1584_v53 = vmul.f32 0.001953125, %v1583_v51 }
 0x17b   :  { %v1585_v54 = vld [vmem:[#allocation3] sm:$0x1] }
 0x17c   :  { %v1586_v34 = vmul.f32 0.001953125, %v1585_v54  ;;  %v1587_v23 = vmul.f32 %v1584_v53, %v1584_v53 }
 0x17e   :  { %v1588_v56 = vsub.f32 %v1586_v34, %v1587_v23 }
 0x180   :  { %v1590_v55 = vadd.f32 1e-05, %v1588_v56 }
 0x182   :  { %1907 = vrsqrt.f32 %v1590_v55 }
 0x18c   :  { %v1908_v22 = vpop.eup %1907 }
 0x18d   :  { %v1592_v59 = vmul.f32 %v1908_v22, %v1589_v9 }
 0x18f   :  { %1593 = vst.msk [vmem:[%s2859_s7] sm:$0x1] %vm31_vm2, %v1592_v59  ;;  %v1595_v63 = vmul.f32 %v1592_v59, %v1584_v53 }
 0x191   :  { %v1596_v4 = vsub.f32 %v1594_v62, %v1595_v63 }
 0x193   :  { %1597 = vst.msk [vmem:[%s2860_s8] sm:$0x1] %vm31_vm2, %v1596_v4 }

// kernel: inv_res_block.5
= control target key start
LH: loop header
LB: loop body
LE: loop exit
PB: predicated region body
PF: predicated region fallthrough
CT: control target
= control target key end

     0   :  { %s2369_s30 = smov 0   ;;  %s3680_s0 = inlined_call_operand.vmem [shape: f32[512,4], index: 0, kind: input, shape index: {}]   ;;  %s3681_s1 = inlined_call_operand.vmem [shape: bf16[4,8], index: 1, kind: input, shape index: {}]   ;;  %s3682_s2 = inlined_call_operand.vmem [shape: f32[1,8], index: 2, kind: input, shape index: {}]   ;;  %s3683_s3 = inlined_call_operand.vmem [shape: f32[1,8], index: 3, kind: input, shape index: {}]   ;;  %s3684_s4 = inlined_call_operand.vmem [shape: f32[3,3,8], index: 4, kind: input, shape index: {}]   ;;  %s3685_s5 = inlined_call_operand.vmem [shape: f32[1,8], index: 5, kind: input, shape index: {}]   ;;  %s3686_s6 = inlined_call_operand.vmem [shape: f32[1,8], index: 6, kind: input, shape index: {}]   ;;  %s3687_s7 = inlined_call_operand.vmem [shape: bf16[2,16,16,8], index: 7, kind: output, shape index: {0}]   ;;  %s3688_s8 = inlined_call_operand.vmem [shape: f32[1,8], index: 8, kind: output, shape index: {1}]   ;;  %s3689_s9 = inlined_call_operand.vmem [shape: f32[1,8], index: 9, kind: output, shape index: {2}]  }
   0x1 LB: > { %s2375_s10 = sadd.s32 4294967295, %s2316_s30   ;;  %p2150_p0 = scmp.ge.s32.totalorder %s2316_s30, 1  ;;  %s2316_s30 = sphi %s2369_s30, %s20_s30  }
   0x2   : > { %p283_p1 = scmp.lt.s32.totalorder %s2316_s30, 3 }
   0x4   : > { %p284_p2 = pnand %p2150_p0, %p283_p1 }
   0x6   : > { %287 = sbr.rel (%p284_p2) target bundleno = 536 (0x218), region = 48 }
   0xd   : > { %s2151_s11 = sshll.u32 %s2375_s10, 5  ;;  %p325_p3 = scmp.lt.s32.totalorder %s2375_s10, 1 }
   0xe   : > { %p320_p4 = scmp.lt.s32.totalorder %s2151_s11, 63  ;;  %p2155_p5 = scmp.ne.s32.totalorder %s2375_s10, 0 }
   0xf   : > { %s326_s12 = scalar_select %p325_p3, %s2375_s10, 1 }
  0x10   : > { %s3753_s11 = smov (!%p320_p4, %s2151_s11), 63  ;;  %334 = sbr.rel (%p2155_p5) target bundleno = 55 (0x37), region = 52 }
  0x11   : > { %s2209_s13 = sshll.u32 %s326_s12, 7  ;;  %s2152_s14 = sshll.u32 %s3753_s11, 3  ;;  %vm335_vm0 = vcmask (!%p2155_p5), 64512   ;;  %vm339_vm1 = vcmask (!%p2155_p5), 57344   ;;  %v2318_v0 = vmov (!%p2155_p5), 0.0  }
  0x12   : > { %s2385_s17 = scalar_lea.vmem %s3687_s7, %s2209_s13  ;;  %s2390_s20 = scalar_lea.vmem %s3680_s0, %s2152_s14  ;;  %336 = vst.msk [vmem:[#allocation2] sm:$0xff] (!%p2155_p5), %vm335_vm0, %v2318_v0  ;;  %337 = vst.msk [vmem:[#allocation2 + $0x8] sm:$0xff] (!%p2155_p5), %vm335_vm0, %v2318_v0 }
  0x13   : > { %338 = vst.msk [vmem:[#allocation2 + $0x10] sm:$0xff] (!%p2155_p5), %vm335_vm0, %v2318_v0  ;;  %341 = vst.msk [vmem:[#allocation2 + $0x20] sm:$0xff] (!%p2155_p5), %vm335_vm0, %v2318_v0 }
  0x14   : > { %342 = vst.msk [vmem:[#allocation2 + $0x28] sm:$0xff] (!%p2155_p5), %vm335_vm0, %v2318_v0  ;;  %343 = vst.msk [vmem:[#allocation2 + $0x30] sm:$0xff] (!%p2155_p5), %vm335_vm0, %v2318_v0 }
  0x15   : > { %345 = vst.msk [vmem:[#allocation2 + $0x40] sm:$0xff] (!%p2155_p5), %vm335_vm0, %v2318_v0  ;;  %346 = vst.msk [vmem:[#allocation2 + $0x48] sm:$0xff] (!%p2155_p5), %vm335_vm0, %v2318_v0 }
  0x16   : > { %347 = vst.msk [vmem:[#allocation2 + $0x50] sm:$0xff] (!%p2155_p5), %vm335_vm0, %v2318_v0  ;;  %349 = vst.msk [vmem:[#allocation2 + $0x60] sm:$0xff] (!%p2155_p5), %vm335_vm0, %v2318_v0 }
  0x17   : > { %350 = vst.msk [vmem:[#allocation2 + $0x68] sm:$0xff] %vm335_vm0, %v2318_v0  ;;  %351 = vst.msk [vmem:[#allocation2 + $0x70] sm:$0xff] %vm335_vm0, %v2318_v0 }
  0x18   : > { %353 = vst.msk [vmem:[#allocation2 + $0x80] sm:$0xff] %vm335_vm0, %v2318_v0  ;;  %354 = vst.msk [vmem:[#allocation2 + $0x88] sm:$0xff] %vm335_vm0, %v2318_v0 }
  0x19   : > { %355 = vst.msk [vmem:[#allocation2 + $0x90] sm:$0xff] %vm335_vm0, %v2318_v0  ;;  %357 = vst.msk [vmem:[#allocation2 + $0xa0] sm:$0xff] %vm335_vm0, %v2318_v0 }
  0x1a   : > { %358 = vst.msk [vmem:[#allocation2 + $0xa8] sm:$0xff] %vm335_vm0, %v2318_v0  ;;  %359 = vst.msk [vmem:[#allocation2 + $0xb0] sm:$0xff] %vm335_vm0, %v2318_v0 }
  0x1b   : > { %361 = vst.msk [vmem:[#allocation2 + $0xc0] sm:$0xff] %vm335_vm0, %v2318_v0  ;;  %362 = vst.msk [vmem:[#allocation2 + $0xc8] sm:$0xff] %vm335_vm0, %v2318_v0 }
  0x1c   : > { %363 = vst.msk [vmem:[#allocation2 + $0xd0] sm:$0xff] %vm335_vm0, %v2318_v0  ;;  %365 = vst.msk [vmem:[#allocation2 + $0xe0] sm:$0xff] %vm335_vm0, %v2318_v0 }
  0x1d   : > { %366 = vst.msk [vmem:[#allocation2 + $0xe8] sm:$0xff] %vm335_vm0, %v2318_v0  ;;  %367 = vst.msk [vmem:[#allocation2 + $0xf0] sm:$0xff] %vm335_vm0, %v2318_v0 }
  0x1e   : > { %369 = vst.msk [vmem:[#allocation2 + $0x100] sm:$0xff] %vm335_vm0, %v2318_v0  ;;  %370 = vst.msk [vmem:[#allocation2 + $0x108] sm:$0xff] %vm335_vm0, %v2318_v0 }
  0x1f   : > { %371 = vst.msk [vmem:[#allocation2 + $0x110] sm:$0xff] %vm335_vm0, %v2318_v0  ;;  %373 = vst.msk [vmem:[#allocation2 + $0x120] sm:$0xff] %vm335_vm0, %v2318_v0 }
  0x20   : > { %374 = vst.msk [vmem:[#allocation2 + $0x128] sm:$0xff] %vm335_vm0, %v2318_v0  ;;  %375 = vst.msk [vmem:[#allocation2 + $0x130] sm:$0xff] %vm335_vm0, %v2318_v0 }
  0x21   : > { %377 = vst.msk [vmem:[#allocation2 + $0x140] sm:$0xff] %vm335_vm0, %v2318_v0  ;;  %378 = vst.msk [vmem:[#allocation2 + $0x148] sm:$0xff] %vm335_vm0, %v2318_v0 }
  0x22   : > { %379 = vst.msk [vmem:[#allocation2 + $0x150] sm:$0xff] %vm335_vm0, %v2318_v0  ;;  %381 = vst.msk [vmem:[#allocation2 + $0x160] sm:$0xff] %vm335_vm0, %v2318_v0 }
  0x23   : > { %382 = vst.msk [vmem:[#allocation2 + $0x168] sm:$0xff] %vm335_vm0, %v2318_v0  ;;  %383 = vst.msk [vmem:[#allocation2 + $0x170] sm:$0xff] %vm335_vm0, %v2318_v0 }
  0x24   : > { %385 = vst.msk [vmem:[#allocation2 + $0x180] sm:$0xff] %vm335_vm0, %v2318_v0  ;;  %386 = vst.msk [vmem:[#allocation2 + $0x188] sm:$0xff] %vm335_vm0, %v2318_v0 }
  0x25   : > { %387 = vst.msk [vmem:[#allocation2 + $0x190] sm:$0xff] %vm335_vm0, %v2318_v0  ;;  %389 = vst.msk [vmem:[#allocation2 + $0x1a0] sm:$0xff] %vm335_vm0, %v2318_v0 }
  0x26   : > { %390 = vst.msk [vmem:[#allocation2 + $0x1a8] sm:$0xff] %vm335_vm0, %v2318_v0  ;;  %391 = vst.msk [vmem:[#allocation2 + $0x1b0] sm:$0xff] %vm335_vm0, %v2318_v0 }
  0x27   : > { %393 = vst.msk [vmem:[#allocation2 + $0x1c0] sm:$0xff] %vm335_vm0, %v2318_v0  ;;  %394 = vst.msk [vmem:[#allocation2 + $0x1c8] sm:$0xff] %vm335_vm0, %v2318_v0 }
  0x28   : > { %395 = vst.msk [vmem:[#allocation2 + $0x1d0] sm:$0xff] %vm335_vm0, %v2318_v0  ;;  %397 = vst.msk [vmem:[#allocation2 + $0x1e0] sm:$0xff] %vm335_vm0, %v2318_v0 }
  0x29   : > { %398 = vst.msk [vmem:[#allocation2 + $0x1e8] sm:$0xff] %vm335_vm0, %v2318_v0  ;;  %399 = vst.msk [vmem:[#allocation2 + $0x1f0] sm:$0xff] %vm335_vm0, %v2318_v0 }
  0x2a   : > { %401 = vst.msk [vmem:[#allocation2 + $0x200] sm:$0xff] %vm335_vm0, %v2318_v0  ;;  %402 = vst.msk [vmem:[#allocation2 + $0x208] sm:$0xff] %vm335_vm0, %v2318_v0 }
  0x2b   : > { %403 = vst.msk [vmem:[#allocation2 + $0x210] sm:$0xff] %vm335_vm0, %v2318_v0  ;;  %405 = vst.msk [vmem:[#allocation2 + $0x220] sm:$0xff] %vm335_vm0, %v2318_v0 }
  0x2c   : > { %406 = vst.msk [vmem:[#allocation2 + $0x228] sm:$0xff] %vm335_vm0, %v2318_v0  ;;  %407 = vst.msk [vmem:[#allocation2 + $0x230] sm:$0xff] %vm335_vm0, %v2318_v0 }
  0x2d   : > { %340 = vst.msk [vmem:[#allocation2 + $0x18] sm:$0x1] %vm339_vm1, %v2318_v0  ;;  %344 = vst.msk [vmem:[#allocation2 + $0x38] sm:$0x1] %vm339_vm1, %v2318_v0 }
  0x2e   : > { %348 = vst.msk [vmem:[#allocation2 + $0x58] sm:$0x1] %vm339_vm1, %v2318_v0  ;;  %352 = vst.msk [vmem:[#allocation2 + $0x78] sm:$0x1] %vm339_vm1, %v2318_v0 }
  0x2f   : > { %356 = vst.msk [vmem:[#allocation2 + $0x98] sm:$0x1] %vm339_vm1, %v2318_v0  ;;  %360 = vst.msk [vmem:[#allocation2 + $0xb8] sm:$0x1] %vm339_vm1, %v2318_v0 }
  0x30   : > { %364 = vst.msk [vmem:[#allocation2 + $0xd8] sm:$0x1] %vm339_vm1, %v2318_v0  ;;  %368 = vst.msk [vmem:[#allocation2 + $0xf8] sm:$0x1] %vm339_vm1, %v2318_v0 }
  0x31   : > { %372 = vst.msk [vmem:[#allocation2 + $0x118] sm:$0x1] %vm339_vm1, %v2318_v0  ;;  %376 = vst.msk [vmem:[#allocation2 + $0x138] sm:$0x1] %vm339_vm1, %v2318_v0 }
  0x32   : > { %380 = vst.msk [vmem:[#allocation2 + $0x158] sm:$0x1] %vm339_vm1, %v2318_v0  ;;  %384 = vst.msk [vmem:[#allocation2 + $0x178] sm:$0x1] %vm339_vm1, %v2318_v0 }
  0x33   : > { %388 = vst.msk [vmem:[#allocation2 + $0x198] sm:$0x1] %vm339_vm1, %v2318_v0  ;;  %392 = vst.msk [vmem:[#allocation2 + $0x1b8] sm:$0x1] %vm339_vm1, %v2318_v0 }
  0x34   : > { %396 = vst.msk [vmem:[#allocation2 + $0x1d8] sm:$0x1] %vm339_vm1, %v2318_v0  ;;  %400 = vst.msk [vmem:[#allocation2 + $0x1f8] sm:$0x1] %vm339_vm1, %v2318_v0 }
  0x35   : > { %404 = vst.msk [vmem:[#allocation2 + $0x218] sm:$0x1] %vm339_vm1, %v2318_v0  ;;  %408 = vst.msk [vmem:[#allocation2 + $0x238] sm:$0x1] %vm339_vm1, %v2318_v0 }
  0x36   : > { %409 = vst.msk [vmem:[#allocation3] sm:$0x1] %vm339_vm1, %v2318_v0  ;;  %410 = vst.msk [vmem:[#allocation4] sm:$0x1] %vm339_vm1, %v2318_v0 }
  0x37 PF: > { %v459_v1 = vld [vmem:[%s3681_s1] sm:$0x3]  ;;  %vm509_vm2 = vcmask 1041408   ;;  %v412_v3 = vld [vmem:[%s2390_s20 + $0x8] sm:$0xff]  ;;  %vm460_vm3 = vcmask 31744   ;;  %v413_v6 = vld [vmem:[%s2390_s20 + $0x10] sm:$0xff]  ;;  %v853_v51 = vlaneseq }
  0x38   : > { %v411_v2 = vld [vmem:[%s2390_s20] sm:$0xff]  ;;  %2295 = vmatprep.subr.msk.bf16.mxu0 %vm509_vm2, %v459_v1  ;;  %v511_v4 = vsel %vm509_vm2, %v459_v1, 0  ;;  %v414_v7 = vld [vmem:[%s2390_s20 + $0x18] sm:$0xff]  ;;  %2296 = vmatprep.subr.msk.bf16.mxu1 %vm509_vm2, %v459_v1  ;;  %v416_v10 = vld [vmem:[%s2390_s20 + $0x28] sm:$0xff]  ;;  %vm785_vm4 = vcmask 64512   ;;  %vm2027_vm5 = vcmask 60416  }
  0x39   : > { %v443_v5 = vpack.c.bf16 %v412_v3, %v411_v2  ;;  %v415_v8 = vld [vmem:[%s2390_s20 + $0x20] sm:$0xff]  ;;  %2260 = vmatpush3.bf16.msra.mxu0 %v511_v4  ;;  %v444_v9 = vpack.c.bf16 %v414_v7, %v413_v6  ;;  %2294 = vmatpush3.bf16.msra.mxu1 %v511_v4  ;;  %v428_v13 = vld [vmem:[%s2390_s20 + $0x88] sm:$0xff]  ;;  %v429_v15 = vld [vmem:[%s2390_s20 + $0x90] sm:$0xff]  ;;  %v854_v52 = vshrl.u32 %v853_v51, 7  ;;  %vm1793_vm6 = vcmask 57344   ;;  %p2206_p6 = scmp.ne.s32.totalorder %s2375_s10, 1 }
  0x3a   : > { %v445_v11 = vpack.c.bf16 %v416_v10, %v415_v8  ;;  %v427_v12 = vld [vmem:[%s2390_s20 + $0x80] sm:$0xff]  ;;  %v430_v16 = vld [vmem:[%s2390_s20 + $0x98] sm:$0xff]  ;;  %v417_v17 = vld [vmem:[%s2390_s20 + $0x30] sm:$0xff] }
  0x3b   : > { %2261 = vmatprep.mubr.msk.bf16.mxu0 %vm460_vm3, %v443_v5  ;;  %v451_v14 = vpack.c.bf16 %v428_v13, %v427_v12  ;;  %v418_v18 = vld [vmem:[%s2390_s20 + $0x38] sm:$0xff]  ;;  %v419_v19 = vld [vmem:[%s2390_s20 + $0x40] sm:$0xff]  ;;  %v452_v20 = vpack.c.bf16 %v430_v16, %v429_v15  ;;  %v420_v21 = vld [vmem:[%s2390_s20 + $0x48] sm:$0xff]  ;;  %v2592_v53 = vsub.s32 0, %v854_v52  ;;  %v2597_v55 = vsub.s32 1, %v854_v52 }
  0x3c   : > { %2262 = vmatmul.mubr.msk.bf16.vlgmr.msra.gmra.mrb[0].mxu0 %vm460_vm3, %v444_v9  ;;  %v431_v22 = vld [vmem:[%s2390_s20 + $0xa0] sm:$0xff]  ;;  %v432_v23 = vld [vmem:[%s2390_s20 + $0xa8] sm:$0xff]  ;;  %v446_v25 = vpack.c.bf16 %v418_v18, %v417_v17  ;;  %v433_v26 = vld [vmem:[%s2390_s20 + $0xb0] sm:$0xff]  ;;  %v447_v28 = vpack.c.bf16 %v420_v21, %v419_v19  ;;  %v2618_v4 = vsub.s32 2, %v854_v52 }
  0x3d   : > { %2265 = vmatprep.mubr.msk.bf16.mxu0 %vm460_vm3, %v445_v11  ;;  %2277 = vmatprep.mubr.msk.bf16.mxu1 %vm460_vm3, %v451_v14  ;;  %v453_v24 = vpack.c.bf16 %v432_v23, %v431_v22  ;;  %v434_v27 = vld [vmem:[%s2390_s20 + $0xb8] sm:$0xff]  ;;  %v435_v29 = vld [vmem:[%s2390_s20 + $0xc0] sm:$0xff]  ;;  %v436_v30 = vld [vmem:[%s2390_s20 + $0xc8] sm:$0xff] }
  0x3e   : > { %2278 = vmatmul.mubr.msk.bf16.vlgmr.msra.gmra.mrb[0].mxu1 %vm460_vm3, %v452_v20  ;;  %v454_v31 = vpack.c.bf16 %v434_v27, %v433_v26  ;;  %v455_v32 = vpack.c.bf16 %v436_v30, %v435_v29  ;;  %v421_v33 = vld [vmem:[%s2390_s20 + $0x50] sm:$0xff]  ;;  %v422_v34 = vld [vmem:[%s2390_s20 + $0x58] sm:$0xff]  ;;  %v423_v35 = vld [vmem:[%s2390_s20 + $0x60] sm:$0xff] }
  0x3f   : > { %2281 = vmatprep.mubr.msk.bf16.mxu1 %vm460_vm3, %v453_v24  ;;  %v424_v36 = vld [vmem:[%s2390_s20 + $0x68] sm:$0xff]  ;;  %v448_v37 = vpack.c.bf16 %v422_v34, %v421_v33  ;;  %v437_v38 = vld [vmem:[%s2390_s20 + $0xd0] sm:$0xff]  ;;  %v438_v39 = vld [vmem:[%s2390_s20 + $0xd8] sm:$0xff] }
  0x40   : > { %v449_v40 = vpack.c.bf16 %v424_v36, %v423_v35  ;;  %v439_v41 = vld [vmem:[%s2390_s20 + $0xe0] sm:$0xff]  ;;  %v440_v42 = vld [vmem:[%s2390_s20 + $0xe8] sm:$0xff]  ;;  %v456_v43 = vpack.c.bf16 %v438_v39, %v437_v38  ;;  %v425_v45 = vld [vmem:[%s2390_s20 + $0x70] sm:$0xff] }
  0x41   : > { %v457_v44 = vpack.c.bf16 %v440_v42, %v439_v41  ;;  %v426_v46 = vld [vmem:[%s2390_s20 + $0x78] sm:$0xff]  ;;  %v441_v48 = vld [vmem:[%s2390_s20 + $0xf0] sm:$0xff]  ;;  %v818_v54 = vld [vmem:[%s3684_s4] sm:$0x7] }
  0x42   : > { %v450_v47 = vpack.c.bf16 %v426_v46, %v425_v45  ;;  %v442_v49 = vld [vmem:[%s2390_s20 + $0xf8] sm:$0xff]  ;;  %v2602_v56 = vld [vmem:[%s3682_s2] ss:$0 sm:$0xff]  ;;  %v2610_v59 = vrot.slane %v818_v54, %v2592_v53  ;;  %v2614_v61 = vrot.slane %v818_v54, %v2597_v55  ;;  %v821_v63 = vld [vmem:[#allocation2 + $0x7] sm:$0xff]  ;;  %v2633_v23 = vrot.slane %v818_v54, %v2618_v4 }
  0x43   : > { %v458_v50 = vpack.c.bf16 %v442_v49, %v441_v48  ;;  %v2607_v58 = vld [vmem:[%s3683_s3] ss:$0 sm:$0xff]  ;;  %v921_v1 = vld [vmem:[#allocation2 + $0x8] sm:$0xff]  ;;  %v922_v26 = vld [vmem:[#allocation2 + $0x10] sm:$0xff] }
  0x44   : > { %2266 = vmatmul.mubr.msk.bf16.gmra.mrb[4].mxu0 %vm460_vm3, %v446_v25  ;;  %3700 = vst [vmem:[#allocation5_spill] sm:$0xff] %v2610_v59  ;;  %3701 = vst [vmem:[#allocation6_spill] sm:$0xff] %v2614_v61  ;;  %v857_v9 = vmul.f32 %v2610_v59, %v821_v63  ;;  %v957_v14 = vmul.f32 %v2614_v61, %v921_v1  ;;  %v822_v25 = vld [vmem:[#allocation2 + $0xf] sm:$0xff]  ;;  %v819_v38 = vld [vmem:[%s3684_s4 + $0x4] sm:$0x7] }
  0x45   : > { %2269 = vmatprep.mubr.msk.bf16.mxu0 %vm460_vm3, %v447_v28  ;;  %3702 = vst [vmem:[#allocation7_spill] sm:$0xff] %v2633_v23  ;;  %v1021_v29 = vld [vmem:[#allocation2 + $0x9] sm:$0xff]  ;;  %v858_v39 = vmul.f32 %v2610_v59, %v822_v25  ;;  %v1022_v46 = vld [vmem:[#allocation2 + $0x11] sm:$0xff]  ;;  %v2656_v54 = vrot.slane %v819_v38, %v2592_v53 }
  0x46   : > { %2282 = vmatmul.mubr.msk.bf16.gmra.mrb[4].mxu1 %vm460_vm3, %v454_v31  ;;  %v1057_v45 = vmul.f32 %v2633_v23, %v1021_v29 }
  0x47   : > { %2285 = vmatprep.mubr.msk.bf16.mxu1 %vm460_vm3, %v455_v32  ;;  %3703 = vst [vmem:[#allocation8_spill] sm:$0xff] %v2656_v54 }
  0x4c   : > { %2270 = vmatmul.mubr.msk.bf16.gmra.mrb[8].mxu0 %vm460_vm3, %v448_v37 }
  0x4d   : > { %2273 = vmatprep.mubr.msk.bf16.mxu0 %vm460_vm3, %v449_v40  ;;  %v958_v40 = vmul.f32 %v2614_v61, %v922_v26 }
  0x4e   : > { %2286 = vmatmul.mubr.msk.bf16.gmra.mrb[8].mxu1 %vm460_vm3, %v456_v43 }
  0x4f   : > { %2289 = vmatprep.mubr.msk.bf16.mxu1 %vm460_vm3, %v457_v44  ;;  %v989_v44 = vadd.f32 %v957_v14, %v857_v9  ;;  %v990_v63 = vadd.f32 %v958_v40, %v858_v39 }
  0x54   : > { %2274 = vmatmul.mubr.msk.bf16.gmra.mrb[12].mxu0 %vm460_vm3, %v450_v47 }
  0x56   : > { %2290 = vmatmul.mubr.msk.bf16.gmra.mrb[12].mxu1 %vm460_vm3, %v458_v50 }
 0x10f   : > { %v2263_v57 = vpop.f32.mrb[0].mxu0 }
 0x110   : > { %v683_v60 = vmul.f32 %v2263_v57, %v2602_v56  ;;  %v547_v62 = vpop.f32.mrb[1].mxu0 }
 0x111   : > { %v681_v0 = vmul.f32 %v2602_v56, %v547_v62  ;;  %v2264_v2 = vpop.f32.mrb[2].mxu0  ;;  %v2279_v7 = vpop.f32.mrb[0].mxu1  ;;  %v820_v62 = vld [vmem:[%s3684_s4 + $0x8] sm:$0x7] }
 0x112   : > { %v722_v3 = vadd.f32 %v2607_v58, %v683_v60  ;;  %v684_v5 = vmul.f32 %v2264_v2, %v2602_v56  ;;  %v550_v6 = vpop.f32.mrb[3].mxu0  ;;  %v699_v11 = vmul.f32 %v2279_v7, %v2602_v56  ;;  %v611_v12 = vpop.f32.mrb[1].mxu1 }
 0x113   : > { %v720_v8 = vadd.f32 %v2607_v58, %v681_v0  ;;  %v682_v10 = vmul.f32 %v2602_v56, %v550_v6  ;;  %v697_v16 = vmul.f32 %v2602_v56, %v611_v12  ;;  %v2280_v17 = vpop.f32.mrb[2].mxu1  ;;  %v1058_v0 = vmul.f32 %v2633_v23, %v1022_v46 }
 0x114   : > { %v754_v13 = vmax.f32 %v722_v3, 0.0  ;;  %v723_v15 = vadd.f32 %v2607_v58, %v684_v5  ;;  %v738_v20 = vadd.f32 %v2607_v58, %v699_v11  ;;  %v700_v21 = vmul.f32 %v2280_v17, %v2602_v56  ;;  %v614_v22 = vpop.f32.mrb[3].mxu1 }
 0x115   : > { %v752_v18 = vmax.f32 %v720_v8, 0.0  ;;  %v721_v19 = vadd.f32 %v2607_v58, %v682_v10  ;;  %v736_v27 = vadd.f32 %v2607_v58, %v697_v16  ;;  %v698_v28 = vmul.f32 %v2602_v56, %v614_v22 }
 0x116   : > { %788 = vst.msk [vmem:[#allocation2 + $0x48] sm:$0xff] %vm785_vm4, %v754_v13  ;;  %v755_v24 = vmax.f32 %v723_v15, 0.0  ;;  %v770_v32 = vmax.f32 %v738_v20, 0.0  ;;  %v739_v33 = vadd.f32 %v2607_v58, %v700_v21  ;;  %v2667_v5 = vrot.slane %v819_v38, %v2597_v55 }
 0x117   : > { %786 = vst.msk [vmem:[#allocation2 + $0x28] sm:$0xff] %vm785_vm4, %v752_v18  ;;  %v753_v30 = vmax.f32 %v721_v19, 0.0  ;;  %v2267_v31 = vpop.f32.mrb[4].mxu0  ;;  %v768_v36 = vmax.f32 %v736_v27, 0.0  ;;  %v737_v37 = vadd.f32 %v2607_v58, %v698_v28  ;;  %v1089_v8 = vadd.f32 %v1057_v45, %v989_v44 }
 0x118   : > { %789 = vst.msk [vmem:[#allocation2 + $0x50] sm:$0xff] %vm785_vm4, %v755_v24  ;;  %v687_v34 = vmul.f32 %v2267_v31, %v2602_v56  ;;  %v563_v35 = vpop.f32.mrb[5].mxu0  ;;  %804 = vst.msk [vmem:[#allocation2 + $0x148] sm:$0xff] %vm785_vm4, %v770_v32  ;;  %v771_v43 = vmax.f32 %v739_v33, 0.0  ;;  %v2678_v16 = vrot.slane %v820_v62, %v2592_v53  ;;  %v2681_v17 = vrot.slane %v820_v62, %v2597_v55 }
 0x119   : > { %787 = vst.msk [vmem:[#allocation2 + $0x30] sm:$0xff] %vm785_vm4, %v753_v30  ;;  %v685_v41 = vmul.f32 %v2602_v56, %v563_v35  ;;  %v2268_v42 = vpop.f32.mrb[6].mxu0  ;;  %802 = vst.msk [vmem:[#allocation2 + $0x128] sm:$0xff] %vm785_vm4, %v768_v36  ;;  %v769_v49 = vmax.f32 %v737_v37, 0.0  ;;  %v2283_v50 = vpop.f32.mrb[4].mxu1  ;;  %v2685_v19 = vrot.slane %v819_v38, %v2618_v4  ;;  %v2690_v21 = vrot.slane %v820_v62, %v2618_v4 }
 0x11a   : > { %v726_v47 = vadd.f32 %v2607_v58, %v687_v34  ;;  %v566_v48 = vpop.f32.mrb[7].mxu0  ;;  %805 = vst.msk [vmem:[#allocation2 + $0x150] sm:$0xff] %vm785_vm4, %v771_v43  ;;  %v627_v52 = vpop.f32.mrb[5].mxu1  ;;  %v688_v2 = vmul.f32 %v2268_v42, %v2602_v56  ;;  %3705 = vst [vmem:[#allocation10_spill] sm:$0xff] %v2667_v5  ;;  %v703_v15 = vmul.f32 %v2283_v50, %v2602_v56 }
 0x11b   : > { %v724_v51 = vadd.f32 %v2607_v58, %v685_v41  ;;  %803 = vst.msk [vmem:[#allocation2 + $0x130] sm:$0xff] %vm785_vm4, %v769_v49  ;;  %v2284_v60 = vpop.f32.mrb[6].mxu1  ;;  %v686_v13 = vmul.f32 %v2602_v56, %v566_v48  ;;  %v1090_v22 = vadd.f32 %v1058_v0, %v990_v63  ;;  %v2698_v53 = vmul.f32 %v2602_v56, %v627_v52 }
 0x11c   : > { %v758_v57 = vmax.f32 %v726_v47, 0.0  ;;  %v2664_v3 = vpop.f32.mrb[7].mxu1  ;;  %v2693_v24 = vadd.f32 %v2607_v58, %v688_v2  ;;  %v2711_v36 = vadd.f32 %v2607_v58, %v703_v15  ;;  %v2714_v37 = vmul.f32 %v2284_v60, %v2602_v56 }
 0x11d   : > { %v756_v1 = vmax.f32 %v724_v51, 0.0  ;;  %3704 = vst [vmem:[#allocation9_spill] sm:$0xff] %v2664_v3  ;;  %v825_v9 = vld [vmem:[#allocation2 + $0x47] sm:$0xff]  ;;  %v2708_v35 = vadd.f32 %v2607_v58, %v686_v13 }
 0x11e   : > { %v823_v6 = vld [vmem:[#allocation2 + $0x27] sm:$0xff]  ;;  %792 = vst.msk [vmem:[#allocation2 + $0x88] sm:$0xff] %vm785_vm4, %v758_v57  ;;  %v861_v55 = vmul.f32 %v2610_v59, %v825_v9  ;;  %3707 = vst [vmem:[#allocation12_spill] sm:$0xff] %v2714_v37  ;;  %v1159_v39 = vmul.f32 %v2656_v54, %v825_v9  ;;  %v1458_v41 = vmul.f32 %v2678_v16, %v825_v9 }
 0x11f   : > { %v923_v7 = vld [vmem:[#allocation2 + $0x28] sm:$0xff]  ;;  %v859_v11 = vmul.f32 %v2610_v59, %v823_v6  ;;  %790 = vst.msk [vmem:[#allocation2 + $0x68] sm:$0xff] %vm785_vm4, %v756_v1  ;;  %v2674_v14 = vpop.f32.mrb[8].mxu0  ;;  %v1157_v18 = vmul.f32 %v2656_v54, %v823_v6  ;;  %v926_v43 = vld [vmem:[#allocation2 + $0x50] sm:$0xff] }
 0x120   : > { %v925_v10 = vld [vmem:[#allocation2 + $0x48] sm:$0xff]  ;;  %v959_v12 = vmul.f32 %v2614_v61, %v923_v7  ;;  %v2687_v20 = vpop.f32.mrb[9].mxu0  ;;  %v1257_v28 = vmul.f32 %v2667_v5, %v923_v7  ;;  %v924_v30 = vld [vmem:[#allocation2 + $0x30] sm:$0xff]  ;;  %v962_v0 = vmul.f32 %v2614_v61, %v926_v43  ;;  %v1260_v15 = vmul.f32 %v2667_v5, %v926_v43 }
 0x121   : > { %v2695_v25 = vpop.f32.mrb[10].mxu0  ;;  %v961_v26 = vmul.f32 %v2614_v61, %v925_v10  ;;  %v1189_v27 = vadd.f32 %v1157_v18, %v1089_v8  ;;  %v824_v29 = vld [vmem:[#allocation2 + $0x2f] sm:$0xff]  ;;  %v2705_v32 = vpop.f32.mrb[8].mxu1  ;;  %v1259_v40 = vmul.f32 %v2667_v5, %v925_v10  ;;  %v1558_v46 = vmul.f32 %v2681_v17, %v925_v10 }
 0x122   : > { %v1023_v4 = vld [vmem:[#allocation2 + $0x29] sm:$0xff]  ;;  %v2703_v31 = vpop.f32.mrb[11].mxu0  ;;  %3706 = vst [vmem:[#allocation11_spill] sm:$0xff] %v2705_v32  ;;  %v991_v33 = vadd.f32 %v959_v12, %v859_v11  ;;  %v2716_v38 = vpop.f32.mrb[9].mxu1  ;;  %v1026_v47 = vld [vmem:[#allocation2 + $0x51] sm:$0xff]  ;;  %v860_v48 = vmul.f32 %v2610_v59, %v824_v29  ;;  %v960_v49 = vmul.f32 %v2614_v61, %v924_v30  ;;  %v1158_v62 = vmul.f32 %v2656_v54, %v824_v29 }
 0x123   : > { %v826_v34 = vld [vmem:[#allocation2 + $0x4f] sm:$0xff]  ;;  %3708 = vst [vmem:[#allocation13_spill] sm:$0xff] %v2716_v38  ;;  %v1289_v42 = vadd.f32 %v1257_v28, %v1189_v27  ;;  %v2721_v45 = vpop.f32.mrb[10].mxu1  ;;  %v1059_v50 = vmul.f32 %v2633_v23, %v1023_v4  ;;  %v993_v52 = vadd.f32 %v961_v26, %v861_v55  ;;  %v1357_v63 = vmul.f32 %v2685_v19, %v1023_v4 }
 0x124   : > { %v1025_v44 = vld [vmem:[#allocation2 + $0x49] sm:$0xff]  ;;  %3709 = vst [vmem:[#allocation14_spill] sm:$0xff] %v2721_v45  ;;  %v2727_v51 = vpop.f32.mrb[11].mxu1  ;;  %v862_v57 = vmul.f32 %v2610_v59, %v826_v34  ;;  %v1024_v60 = vld [vmem:[#allocation2 + $0x31] sm:$0xff]  ;;  %v992_v2 = vadd.f32 %v960_v49, %v860_v48  ;;  %v2737_v8 = vmul.f32 %v2633_v23, %v1026_v47  ;;  %v1190_v9 = vadd.f32 %v1158_v62, %v1090_v22 }
 0x125   : > { %3710 = vst [vmem:[#allocation15_spill] sm:$0xff] %v2727_v51  ;;  %v1061_v1 = vmul.f32 %v2633_v23, %v1025_v44  ;;  %v1091_v6 = vadd.f32 %v1059_v50, %v991_v33  ;;  %v1258_v10 = vmul.f32 %v2667_v5, %v924_v30  ;;  %v1389_v11 = vadd.f32 %v1357_v63, %v1289_v42  ;;  %v2749_v4 = vld [vmem:[#allocation2 + $0x87] sm:$0xff] }
 0x126   : > { %v1160_v13 = vmul.f32 %v2656_v54, %v826_v34  ;;  %v1359_v18 = vmul.f32 %v2685_v19, %v1025_v44  ;;  %v1060_v55 = vmul.f32 %v2633_v23, %v1024_v60  ;;  %v1358_v29 = vmul.f32 %v2685_v19, %v1024_v60  ;;  %v827_v30 = vld [vmem:[#allocation2 + $0x67] sm:$0xff] }
 0x127   : > { %v2734_v7 = vpop.f32.mrb[12].mxu0  ;;  %v1191_v27 = vadd.f32 %v1159_v39, %v1091_v6  ;;  %v1290_v28 = vadd.f32 %v1258_v10, %v1190_v9  ;;  %v1490_v22 = vadd.f32 %v1458_v41, %v1389_v11  ;;  %v2753_v42 = vadd.f32 %v962_v0, %v862_v57  ;;  %v2760_v60 = vld [vmem:[#allocation2 + $0x88] sm:$0xff] }
 0x128   : > { %v2740_v12 = vpop.f32.mrb[13].mxu0  ;;  %v1093_v48 = vadd.f32 %v1061_v1, %v993_v52  ;;  %v2756_v49 = vmul.f32 %v2685_v19, %v1026_v47  ;;  %v1092_v50 = vadd.f32 %v1060_v55, %v992_v2  ;;  %v1459_v62 = vmul.f32 %v2678_v16, %v826_v34  ;;  %v927_v52 = vld [vmem:[#allocation2 + $0x68] sm:$0xff] }
 0x129   : > { %v2746_v26 = vpop.f32.mrb[14].mxu0  ;;  %v1658_v39 = vmul.f32 %v2690_v21, %v1025_v44  ;;  %v1390_v63 = vadd.f32 %v1358_v29, %v1290_v28  ;;  %v1590_v6 = vadd.f32 %v1558_v46, %v1490_v22  ;;  %v1559_v41 = vmul.f32 %v2681_v17, %v926_v43 }
 0x12a   : > { %v2751_v33 = vpop.f32.mrb[15].mxu0  ;;  %v1659_v9 = vmul.f32 %v2690_v21, %v1026_v47  ;;  %v865_v57 = vmul.f32 %v2610_v59, %v2749_v4  ;;  %v1161_v0 = vmul.f32 %v2656_v54, %v827_v30  ;;  %v1291_v10 = vadd.f32 %v1259_v40, %v1191_v27 }
 0x12b   : > { %v1491_v1 = vadd.f32 %v1459_v62, %v1390_v63  ;;  %v1690_v2 = vadd.f32 %v1658_v39, %v1590_v6  ;;  %v759_v34 = vmax.f32 %v2693_v24, 0.0  ;;  %v1192_v44 = vadd.f32 %v1160_v13, %v1092_v50 }
 0x12c   : > { %v965_v46 = vmul.f32 %v2614_v61, %v2760_v60  ;;  %v757_v43 = vmax.f32 %v2708_v35, 0.0  ;;  %v691_v47 = vmul.f32 %v2674_v14, %v2602_v56  ;;  %v863_v28 = vmul.f32 %v2610_v59, %v827_v30 }
 0x12d   : > { %v1591_v11 = vadd.f32 %v1559_v41, %v1491_v1  ;;  %v2210_v55 = vpack.c.bf16 %v1690_v2, %v1690_v2  ;;  %v963_v29 = vmul.f32 %v2614_v61, %v927_v52  ;;  %793 = vst.msk [vmem:[#allocation2 + $0x90] sm:$0xff] %vm785_vm4, %v759_v34  ;;  %v1193_v40 = vadd.f32 %v1161_v0, %v1093_v48  ;;  %v2793_v0 = vpop.f32.mrb[12].mxu1 }
 0x12e   : > { %v1460_v24 = vmul.f32 %v2678_v16, %v827_v30  ;;  %791 = vst.msk [vmem:[#allocation2 + $0x70] sm:$0xff] %vm785_vm4, %v757_v43  ;;  %v730_v13 = vadd.f32 %v2607_v58, %v691_v47  ;;  %v689_v35 = vmul.f32 %v2602_v56, %v2687_v20  ;;  %v1796_v14 = vmul.f32 %v1690_v2, %v1690_v2 }
 0x12f   : > { %v1691_v27 = vadd.f32 %v1659_v9, %v1591_v11  ;;  %2028 = vst.msk [vmem:[%s2385_s17] sm:$0xf] %vm2027_vm5, %v2210_v55  ;;  %v1391_v22 = vadd.f32 %v1359_v18, %v1291_v10  ;;  %v692_v50 = vmul.f32 %v2695_v25, %v2602_v56  ;;  %v1723_v62 = vsel %vm785_vm4, %v1690_v2, 0.0  ;;  %v841_v9 = vld [vmem:[#allocation2 + $0x147] sm:$0xff]  ;;  %3711 = vst [vmem:[#allocation16_spill] sm:$0xff] %v2793_v0 }
 0x130   : > { %v762_v48 = vmax.f32 %v730_v13, 0.0  ;;  %v728_v30 = vadd.f32 %v2607_v58, %v689_v35  ;;  %v690_v39 = vmul.f32 %v2602_v56, %v2703_v31  ;;  %v2791_v18 = vld [vmem:[#allocation2 + $0x148] sm:$0xff]  ;;  %v1292_v25 = vadd.f32 %v1260_v15, %v1192_v44  ;;  %v2799_v31 = vpop.f32.mrb[13].mxu1 }
 0x131   : > { %v1797_v63 = vmul.f32 %v1691_v27, %v1691_v27  ;;  %v2211_v6 = vpack.c.bf16 %v1691_v27, %v1691_v27  ;;  %v1724_v20 = vsel %vm785_vm4, %v1691_v27, 0.0  ;;  %v731_v41 = vadd.f32 %v2607_v58, %v692_v50  ;;  %3712 = vst [vmem:[#allocation17_spill] sm:$0xff] %v2799_v31 }
 0x132   : > { %v2795_v1 = vadd.f32 %v1724_v20, %v1723_v62  ;;  %796 = vst.msk [vmem:[#allocation2 + $0xc8] sm:$0xff] %vm785_vm4, %v762_v48  ;;  %v760_v2 = vmax.f32 %v728_v30, 0.0  ;;  %v729_v10 = vadd.f32 %v2607_v58, %v690_v39  ;;  %v1492_v34 = vadd.f32 %v1460_v24, %v1391_v22 }
 0x133   : > { %2029 = vst.msk [vmem:[%s2385_s17 + $0x4] sm:$0xf] %vm2027_vm5, %v2211_v6  ;;  %v1828_v43 = vsel %vm785_vm4, %v1796_v14, 0.0  ;;  %v1829_v47 = vsel %vm785_vm4, %v1797_v63, 0.0  ;;  %v763_v11 = vmax.f32 %v731_v41, 0.0  ;;  %v877_v44 = vmul.f32 %v2610_v59, %v841_v9 }
 0x134   : > { %v2805_v55 = vadd.f32 %v1829_v47, %v1828_v43  ;;  %794 = vst.msk [vmem:[#allocation2 + $0xa8] sm:$0xff] %vm785_vm4, %v760_v2  ;;  %v761_v15 = vmax.f32 %v729_v10, 0.0  ;;  %v977_v13 = vmul.f32 %v2614_v61, %v2791_v18  ;;  %v1094_v35 = vadd.f32 %v2737_v8, %v2753_v42  ;;  %v830_v22 = vld [vmem:[#allocation2 + $0x8f] sm:$0xff]  ;;  %v2846_v10 = vpop.f32.mrb[14].mxu1 }
 0x135   : > { %v2815_v24 = vmul.f32 %v2656_v54, %v2749_v4  ;;  %v1261_v27 = vmul.f32 %v2667_v5, %v927_v52  ;;  %v1560_v14 = vmul.f32 %v2681_v17, %v927_v52  ;;  %797 = vst.msk [vmem:[#allocation2 + $0xd0] sm:$0xff] %vm785_vm4, %v763_v11  ;;  %v2820_v50 = vadd.f32 %v965_v46, %v865_v57  ;;  %v2830_v48 = vld [vmem:[#allocation2 + $0x90] sm:$0xff] }
 0x136   : > { %v2824_v62 = vmul.f32 %v2667_v5, %v2760_v60  ;;  %v1462_v8 = vmul.f32 %v2678_v16, %v2749_v4  ;;  %v1562_v42 = vmul.f32 %v2681_v17, %v2760_v60  ;;  %v1029_v30 = vld [vmem:[#allocation2 + $0x89] sm:$0xff]  ;;  %795 = vst.msk [vmem:[#allocation2 + $0xb0] sm:$0xff] %vm785_vm4, %v761_v15  ;;  %v995_v52 = vadd.f32 %v963_v29, %v863_v28  ;;  %v1028_v43 = vld [vmem:[#allocation2 + $0x71] sm:$0xff] }
 0x137   : > { %v828_v39 = vld [vmem:[#allocation2 + $0x6f] sm:$0xff]  ;;  %v1293_v63 = vadd.f32 %v1261_v27, %v1193_v40  ;;  %v1592_v57 = vadd.f32 %v1560_v14, %v1492_v34  ;;  %v1392_v6 = vadd.f32 %v2756_v49, %v1292_v25  ;;  %v2834_v41 = vadd.f32 %v977_v13, %v877_v44  ;;  %3717 = vst [vmem:[#allocation22_spill] sm:$0xff] %v2846_v10  ;;  %v2855_v25 = vpop.f32.mrb[15].mxu1 }
 0x138   : > { %v1027_v46 = vld [vmem:[#allocation2 + $0x69] sm:$0xff]  ;;  %v2837_v4 = vmul.f32 %v2656_v54, %v841_v9  ;;  %v2841_v60 = vmul.f32 %v2667_v5, %v2791_v18  ;;  %v2844_v2 = vmul.f32 %v2678_v16, %v841_v9  ;;  %v866_v28 = vmul.f32 %v2610_v59, %v830_v22  ;;  %3718 = vst [vmem:[#allocation23_spill] sm:$0xff] %v2855_v25 }
 0x139   : > { %v928_v20 = vld [vmem:[#allocation2 + $0x70] sm:$0xff]  ;;  %3713 = vst [vmem:[#allocation18_spill] sm:$0xff] %v2834_v41  ;;  %v966_v49 = vmul.f32 %v2614_v61, %v2830_v48  ;;  %v2852_v29 = vmul.f32 %v2633_v23, %v1029_v30  ;;  %v1162_v40 = vmul.f32 %v2656_v54, %v828_v39  ;;  %v2858_v34 = vmul.f32 %v2656_v54, %v830_v22 }
 0x13a   : > { %3714 = vst [vmem:[#allocation19_spill] sm:$0xff] %v2837_v4  ;;  %3715 = vst [vmem:[#allocation20_spill] sm:$0xff] %v2841_v60  ;;  %v2861_v9 = vmul.f32 %v2685_v19, %v1029_v30  ;;  %v1063_v47 = vmul.f32 %v2633_v23, %v1027_v46  ;;  %v1361_v11 = vmul.f32 %v2685_v19, %v1027_v46 }
 0x13b   : > { %3716 = vst [vmem:[#allocation21_spill] sm:$0xff] %v2844_v2  ;;  %v1463_v15 = vmul.f32 %v2678_v16, %v830_v22  ;;  %v1194_v44 = vadd.f32 %v1162_v40, %v1094_v35  ;;  %v1262_v13 = vmul.f32 %v2667_v5, %v928_v20  ;;  %v1461_v27 = vmul.f32 %v2678_v16, %v828_v39  ;;  %v2874_v22 = vld [vmem:[#allocation2 + $0x91] sm:$0xff] }
 0x13c   : > { %v1563_v14 = vmul.f32 %v2681_v17, %v2830_v48  ;;  %v864_v25 = vmul.f32 %v2610_v59, %v828_v39  ;;  %v1393_v10 = vadd.f32 %v1361_v11, %v1293_v63  ;;  %v1660_v31 = vmul.f32 %v2690_v21, %v1027_v46 }
 0x13d   : > { %v1294_v0 = vadd.f32 %v1262_v13, %v1194_v44  ;;  %v1362_v51 = vmul.f32 %v2685_v19, %v1028_v43  ;;  %v1493_v41 = vadd.f32 %v1461_v27, %v1392_v6  ;;  %v1561_v60 = vmul.f32 %v2681_v17, %v928_v20 }
 0x13e   : > { %v964_v35 = vmul.f32 %v2614_v61, %v928_v20  ;;  %v1095_v40 = vadd.f32 %v1063_v47, %v995_v52  ;;  %v1494_v2 = vadd.f32 %v1462_v8, %v1393_v10  ;;  %v1692_v4 = vadd.f32 %v1660_v31, %v1592_v57  ;;  %v831_v10 = vld [vmem:[#allocation2 + $0xa7] sm:$0xff] }
 0x13f   : > { %v1662_v45 = vmul.f32 %v2690_v21, %v1029_v30  ;;  %v1394_v39 = vadd.f32 %v1362_v51, %v1294_v0  ;;  %v1593_v63 = vadd.f32 %v1561_v60, %v1493_v41  ;;  %v1661_v46 = vmul.f32 %v2690_v21, %v1028_v43  ;;  %v2894_v47 = vld [vmem:[#allocation2 + $0xc7] sm:$0xff] }
 0x140   : > { %v1594_v11 = vadd.f32 %v1562_v42, %v1494_v2  ;;  %v1726_v44 = vsel %vm785_vm4, %v1692_v4, 0.0  ;;  %v1798_v6 = vmul.f32 %v1692_v4, %v1692_v4  ;;  %v2212_v13 = vpack.c.bf16 %v1692_v4, %v1692_v4 }
 0x141   : > { %v1663_v27 = vmul.f32 %v2690_v21, %v2874_v22  ;;  %v1495_v38 = vadd.f32 %v1463_v15, %v1394_v39  ;;  %v1693_v20 = vadd.f32 %v1661_v46, %v1593_v63  ;;  %v1727_v8 = vadd.f32 %v1726_v44, %v2795_v1  ;;  %v2896_v15 = vld [vmem:[#allocation2 + $0xc8] sm:$0xff] }
 0x142   : > { %v996_v31 = vadd.f32 %v964_v35, %v864_v25  ;;  %v1195_v30 = vadd.f32 %v2815_v24, %v1095_v40  ;;  %v1694_v52 = vadd.f32 %v1662_v45, %v1594_v11  ;;  %v1831_v51 = vsel %vm785_vm4, %v1798_v6, 0.0  ;;  %2030 = vst.msk [vmem:[%s2385_s17 + $0x8] sm:$0xf] %vm2027_vm5, %v2212_v13  ;;  %v931_v39 = vld [vmem:[#allocation2 + $0xa8] sm:$0xff]  ;;  %v2912_v11 = vld [vmem:[#allocation2 + $0xd0] sm:$0xff] }
 0x143   : > { %v1595_v0 = vadd.f32 %v1563_v14, %v1495_v38  ;;  %v1728_v42 = vsel %vm785_vm4, %v1693_v20, 0.0  ;;  %v1799_v57 = vmul.f32 %v1693_v20, %v1693_v20  ;;  %v1832_v41 = vadd.f32 %v1831_v51, %v2805_v55 }
 0x144   : > { %v1729_v4 = vadd.f32 %v1728_v42, %v1727_v8  ;;  %v1730_v60 = vsel %vm785_vm4, %v1694_v52, 0.0  ;;  %v1800_v2 = vmul.f32 %v1694_v52, %v1694_v52  ;;  %v2213_v1 = vpack.c.bf16 %v1693_v20, %v1693_v20 }
 0x145   : > { %v1064_v45 = vmul.f32 %v2633_v23, %v1028_v43  ;;  %v2891_v24 = vadd.f32 %v1663_v27, %v1595_v0  ;;  %v1833_v25 = vsel %vm785_vm4, %v1799_v57, 0.0  ;;  %v2214_v38 = vpack.c.bf16 %v1694_v52, %v1694_v52 }
 0x146   : > { %v998_v55 = vadd.f32 %v966_v49, %v866_v28  ;;  %v2898_v14 = vadd.f32 %v1730_v60, %v1729_v4  ;;  %v1834_v35 = vadd.f32 %v1833_v25, %v1832_v41  ;;  %v1835_v40 = vsel %vm785_vm4, %v1800_v2, 0.0  ;;  %2031 = vst.msk [vmem:[%s2385_s17 + $0xc] sm:$0xf] %vm2027_vm5, %v2213_v1  ;;  %v2910_v49 = vld [vmem:[#allocation2 + $0xcf] sm:$0xff] }
 0x147   : > { %v1097_v43 = vadd.f32 %v2852_v29, %v2820_v50  ;;  %v1096_v63 = vadd.f32 %v1064_v45, %v996_v31  ;;  %v2215_v46 = vpack.c.bf16 %v2891_v24, %v2891_v24  ;;  %2032 = vst.msk [vmem:[%s2385_s17 + $0x10] sm:$0xf] %vm2027_vm5, %v2214_v38  ;;  %v1165_v28 = vmul.f32 %v2656_v54, %v831_v10  ;;  %v2938_v41 = vld [vmem:[#allocation2 + $0xc9] sm:$0xff]  ;;  %v2950_v45 = vld [vmem:[#allocation2 + $0xd1] sm:$0xff] }
 0x148   : > { %v2914_v44 = vadd.f32 %v1835_v40, %v1834_v35  ;;  %v869_v6 = vmul.f32 %v2610_v59, %v2894_v47  ;;  %v969_v50 = vmul.f32 %v2614_v61, %v2896_v15  ;;  %v1295_v29 = vadd.f32 %v2824_v62, %v1195_v30  ;;  %v832_v1 = vld [vmem:[#allocation2 + $0xaf] sm:$0xff] }
 0x149   : > { %v1066_v13 = vmul.f32 %v2633_v23, %v2874_v22  ;;  %2033 = vst.msk [vmem:[%s2385_s17 + $0x14] sm:$0xf] %vm2027_vm5, %v2215_v46  ;;  %v867_v27 = vmul.f32 %v2610_v59, %v831_v10  ;;  %v967_v20 = vmul.f32 %v2614_v61, %v931_v39  ;;  %v1464_v8 = vmul.f32 %v2678_v16, %v831_v10  ;;  %v1031_v25 = vld [vmem:[#allocation2 + $0xa9] sm:$0xff]  ;;  %v1032_v46 = vld [vmem:[#allocation2 + $0xb1] sm:$0xff] }
 0x14a   : > { %v1197_v31 = vadd.f32 %v1165_v28, %v1097_v43  ;;  %v1395_v52 = vadd.f32 %v2861_v9, %v1295_v29  ;;  %v870_v51 = vmul.f32 %v2610_v59, %v2910_v49  ;;  %v970_v62 = vmul.f32 %v2614_v61, %v2912_v11  ;;  %v932_v43 = vld [vmem:[#allocation2 + $0xb0] sm:$0xff] }
 0x14b   : > { %v1098_v30 = vadd.f32 %v1066_v13, %v998_v55  ;;  %v1264_v0 = vmul.f32 %v2667_v5, %v2830_v48  ;;  %v1364_v42 = vmul.f32 %v2685_v19, %v2874_v22  ;;  %v1196_v57 = vadd.f32 %v2858_v34, %v1096_v63 }
 0x14c   : > { %v2940_v4 = vadd.f32 %v969_v50, %v869_v6  ;;  %v1466_v9 = vmul.f32 %v2678_v16, %v2894_v47  ;;  %v1265_v60 = vmul.f32 %v2667_v5, %v931_v39  ;;  %v1496_v2 = vadd.f32 %v1464_v8, %v1395_v52 }
 0x14d   : > { %v1801_v10 = vmul.f32 %v2891_v24, %v2891_v24  ;;  %v1566_v48 = vmul.f32 %v2681_v17, %v2896_v15  ;;  %v999_v22 = vadd.f32 %v967_v20, %v867_v27  ;;  %v1564_v34 = vmul.f32 %v2681_v17, %v931_v39 }
 0x14e   : > { %v1297_v38 = vadd.f32 %v1265_v60, %v1197_v31  ;;  %v2952_v55 = vadd.f32 %v970_v62, %v870_v51  ;;  %v2956_v35 = vmul.f32 %v2633_v23, %v2938_v41  ;;  %v1467_v40 = vmul.f32 %v2678_v16, %v2910_v49 }
 0x14f   : > { %v1567_v63 = vmul.f32 %v2681_v17, %v2912_v11  ;;  %v1666_v39 = vmul.f32 %v2690_v21, %v2938_v41  ;;  %v1166_v28 = vmul.f32 %v2656_v54, %v832_v1  ;;  %v1296_v6 = vadd.f32 %v1264_v0, %v1196_v57 }
 0x150   : > { %v1596_v50 = vadd.f32 %v1564_v34, %v1496_v2  ;;  %v1667_v29 = vmul.f32 %v2690_v21, %v2950_v45  ;;  %v868_v13 = vmul.f32 %v2610_v59, %v832_v1  ;;  %v1365_v27 = vmul.f32 %v2685_v19, %v1031_v25 }
 0x151   : > { %v1198_v20 = vadd.f32 %v1166_v28, %v1098_v30  ;;  %v1266_v8 = vmul.f32 %v2667_v5, %v932_v43  ;;  %v1396_v31 = vadd.f32 %v1364_v42, %v1296_v6  ;;  %v1465_v52 = vmul.f32 %v2678_v16, %v832_v1 }
 0x152   : > { %v968_v51 = vmul.f32 %v2614_v61, %v932_v43  ;;  %v1366_v62 = vmul.f32 %v2685_v19, %v1032_v46  ;;  %v1397_v60 = vadd.f32 %v1365_v27, %v1297_v38  ;;  %v1664_v0 = vmul.f32 %v2690_v21, %v1031_v25 }
 0x153   : > { %v1298_v57 = vadd.f32 %v1266_v8, %v1198_v20  ;;  %v1497_v2 = vadd.f32 %v1465_v52, %v1396_v31  ;;  %v1565_v34 = vmul.f32 %v2681_v17, %v932_v43  ;;  %v1732_v32 = vsel %vm785_vm4, %v2891_v24, 0.0 }
 0x154   : > { %v1067_v30 = vmul.f32 %v2633_v23, %v1031_v25  ;;  %v1498_v28 = vadd.f32 %v1466_v9, %v1397_v60  ;;  %v1696_v42 = vadd.f32 %v1664_v0, %v1596_v50  ;;  %v1733_v1 = vadd.f32 %v1732_v32, %v2898_v14 }
 0x155   : > { %v1398_v6 = vadd.f32 %v1366_v62, %v1298_v57  ;;  %v1597_v3 = vadd.f32 %v1565_v34, %v1497_v2  ;;  %v1665_v37 = vmul.f32 %v2690_v21, %v1032_v46  ;;  %v1837_v38 = vsel %vm785_vm4, %v1801_v10, 0.0 }
 0x156   : > { %v1598_v27 = vadd.f32 %v1566_v48, %v1498_v28  ;;  %v1734_v20 = vsel %vm785_vm4, %v1696_v42, 0.0  ;;  %v1802_v43 = vmul.f32 %v1696_v42, %v1696_v42  ;;  %v1838_v8 = vadd.f32 %v1837_v38, %v2914_v44 }
 0x157   : > { %v1499_v24 = vadd.f32 %v1467_v40, %v1398_v6  ;;  %v1697_v31 = vadd.f32 %v1665_v37, %v1597_v3  ;;  %v1735_v25 = vadd.f32 %v1734_v20, %v1733_v1  ;;  %v2216_v9 = vpack.c.bf16 %v1696_v42, %v1696_v42  ;;  %v839_v40 = vld [vmem:[#allocation2 + $0x127] sm:$0xff]  ;;  %v942_v20 = vld [vmem:[#allocation2 + $0x150] sm:$0xff] }
 0x158   : > { %v1000_v50 = vadd.f32 %v968_v51, %v868_v13  ;;  %v1068_v32 = vmul.f32 %v2633_v23, %v1032_v46  ;;  %v1698_v14 = vadd.f32 %v1666_v39, %v1598_v27  ;;  %v1839_v52 = vsel %vm785_vm4, %v1802_v43, 0.0  ;;  %v939_v13 = vld [vmem:[#allocation2 + $0x128] sm:$0xff] }
 0x159   : > { %v1599_v62 = vadd.f32 %v1567_v63, %v1499_v24  ;;  %v1736_v10 = vsel %vm785_vm4, %v1697_v31, 0.0  ;;  %v1803_v48 = vmul.f32 %v1697_v31, %v1697_v31  ;;  %v1840_v60 = vadd.f32 %v1839_v52, %v1838_v8  ;;  %2034 = vst.msk [vmem:[%s2385_s17 + $0x18] sm:$0xf] %vm2027_vm5, %v2216_v9  ;;  %v842_v27 = vld [vmem:[#allocation2 + $0x14f] sm:$0xff] }
 0x15a   : > { %v1737_v0 = vadd.f32 %v1736_v10, %v1735_v25  ;;  %v1738_v44 = vsel %vm785_vm4, %v1698_v14, 0.0  ;;  %v1804_v3 = vmul.f32 %v1698_v14, %v1698_v14  ;;  %v2217_v37 = vpack.c.bf16 %v1697_v31, %v1697_v31 }
 0x15b   : > { %v1099_v46 = vadd.f32 %v1067_v30, %v999_v22  ;;  %v2989_v39 = vadd.f32 %v1667_v29, %v1599_v62  ;;  %v1841_v63 = vsel %vm785_vm4, %v1803_v48, 0.0  ;;  %v2218_v51 = vpack.c.bf16 %v1698_v14, %v1698_v14 }
 0x15c   : > { %v1100_v57 = vadd.f32 %v1068_v32, %v1000_v50  ;;  %v2992_v2 = vadd.f32 %v1738_v44, %v1737_v0  ;;  %v1842_v34 = vadd.f32 %v1841_v63, %v1840_v60  ;;  %v1843_v28 = vsel %vm785_vm4, %v1804_v3, 0.0  ;;  %2035 = vst.msk [vmem:[%s2385_s17 + $0x1c] sm:$0xf] %vm2027_vm5, %v2217_v37  ;;  %v3051_v50 = vld [vmem:[#allocation2 + $0x12f] sm:$0xff] }
 0x15d   : > { %v1167_v42 = vmul.f32 %v2656_v54, %v2894_v47  ;;  %v2219_v22 = vpack.c.bf16 %v2989_v39, %v2989_v39  ;;  %2036 = vst.msk [vmem:[%s2385_s17 + $0x20] sm:$0xf] %vm2027_vm5, %v2218_v51  ;;  %v875_v29 = vmul.f32 %v2610_v59, %v839_v40  ;;  %v975_v30 = vmul.f32 %v2614_v61, %v939_v13  ;;  %v3053_v32 = vld [vmem:[#allocation2 + $0x130] sm:$0xff] }
 0x15e   : > { %v3007_v1 = vmul.f32 %v2667_v5, %v2896_v15  ;;  %v1070_v6 = vmul.f32 %v2633_v23, %v2950_v45  ;;  %v1168_v38 = vmul.f32 %v2656_v54, %v2910_v49  ;;  %v1844_v47 = vadd.f32 %v1843_v28, %v1842_v34  ;;  %v1039_v44 = vld [vmem:[#allocation2 + $0x129] sm:$0xff] }
 0x15f   : > { %v3015_v43 = vadd.f32 %v2956_v35, %v2940_v4  ;;  %v3019_v8 = vmul.f32 %v2667_v5, %v2912_v11  ;;  %v3023_v15 = vmul.f32 %v2685_v19, %v2938_v41  ;;  %v3027_v24 = vmul.f32 %v2685_v19, %v2950_v45  ;;  %2037 = vst.msk [vmem:[%s2385_s17 + $0x24] sm:$0xf] %vm2027_vm5, %v2219_v22  ;;  %v3042_v35 = vld [vmem:[#allocation2 + $0x149] sm:$0xff]  ;;  %v3044_v41 = vld [vmem:[#allocation2 + $0x151] sm:$0xff] }
 0x160   : > { %v3032_v49 = vadd.f32 %v1070_v6, %v2952_v55  ;;  %v3034_v31 = vadd.f32 %v1167_v42, %v1099_v46  ;;  %v3036_v4 = vadd.f32 %v1168_v38, %v1100_v57  ;;  %v3040_v11 = vmul.f32 %v2681_v17, %v2791_v18 }
 0x161   : > { %v1007_v25 = vadd.f32 %v975_v30, %v875_v29  ;;  %v3047_v45 = vmul.f32 %v2656_v54, %v839_v40  ;;  %v878_v9 = vmul.f32 %v2610_v59, %v842_v27  ;;  %v978_v55 = vmul.f32 %v2614_v61, %v942_v20 }
 0x162   : > { %v1805_v18 = vmul.f32 %v2989_v39, %v2989_v39  ;;  %v3058_v14 = vmul.f32 %v2667_v5, %v939_v13  ;;  %v3061_v52 = vmul.f32 %v2678_v16, %v839_v40  ;;  %v695_v62 = vmul.f32 %v2734_v7, %v2602_v56 }
 0x163   : > { %v3066_v10 = vmul.f32 %v2681_v17, %v939_v13  ;;  %v3070_v48 = vmul.f32 %v2633_v23, %v3042_v35  ;;  %v3074_v60 = vmul.f32 %v2633_v23, %v3044_v41  ;;  %v3077_v0 = vmul.f32 %v2656_v54, %v842_v27  ;;  %v3087_v13 = vld [vmem:[#allocation2 + $0x131] sm:$0xff] }
 0x164   : > { %v3080_v3 = vmul.f32 %v2667_v5, %v942_v20  ;;  %v734_v7 = vadd.f32 %v2607_v58, %v695_v62  ;;  %v876_v37 = vmul.f32 %v2610_v59, %v3051_v50  ;;  %v976_v40 = vmul.f32 %v2614_v61, %v3053_v32 }
 0x165   : > { %3719 = vst [vmem:[#allocation24_spill] sm:$0xff] %v3070_v48  ;;  %3720 = vst [vmem:[#allocation25_spill] sm:$0xff] %v3074_v60  ;;  %v3089_v46 = vadd.f32 %v978_v55, %v878_v9  ;;  %v3092_v63 = vmul.f32 %v2678_v16, %v842_v27  ;;  %v3095_v51 = vmul.f32 %v2681_v17, %v942_v20  ;;  %v1740_v9 = vsel %vm785_vm4, %v2989_v39, 0.0 }
 0x166   : > { %3721 = vst [vmem:[#allocation26_spill] sm:$0xff] %v3080_v3  ;;  %v3099_v57 = vmul.f32 %v2690_v21, %v3042_v35  ;;  %v3103_v34 = vmul.f32 %v2690_v21, %v3044_v41  ;;  %v766_v28 = vmax.f32 %v734_v7, 0.0  ;;  %v1075_v42 = vmul.f32 %v2633_v23, %v1039_v44 }
 0x167   : > { %3722 = vst [vmem:[#allocation27_spill] sm:$0xff] %v3089_v46  ;;  %v693_v22 = vmul.f32 %v2602_v56, %v2740_v12  ;;  %v1076_v29 = vmul.f32 %v2633_v23, %v3087_v13  ;;  %v3112_v30 = vmul.f32 %v2656_v54, %v3051_v50  ;;  %v696_v6 = vmul.f32 %v2746_v26, %v2602_v56 }
 0x168   : > { %v694_v38 = vmul.f32 %v2602_v56, %v2751_v33  ;;  %800 = vst.msk [vmem:[#allocation2 + $0x108] sm:$0xff] %vm785_vm4, %v766_v28  ;;  %v1008_v27 = vadd.f32 %v976_v40, %v876_v37  ;;  %v3121_v20 = vmul.f32 %v2667_v5, %v3053_v32  ;;  %v3127_v55 = vmul.f32 %v2685_v19, %v1039_v44 }
 0x169   : > { %v732_v12 = vadd.f32 %v2607_v58, %v693_v22  ;;  %v735_v26 = vadd.f32 %v2607_v58, %v696_v6  ;;  %v3132_v33 = vadd.f32 %v1740_v9, %v2992_v2  ;;  %v3136_v7 = vmul.f32 %v2685_v19, %v3087_v13  ;;  %v3724_v2 = vld [vmem:[#allocation12_spill] sm:$0xff]  ;;  %v3725_v9 = vld [vmem:[#allocation9_spill] sm:$0xff] }
 0x16a   : > { %v733_v62 = vadd.f32 %v2607_v58, %v694_v38  ;;  %v1845_v40 = vsel %vm785_vm4, %v1805_v18, 0.0  ;;  %v774_v28 = vmax.f32 %v2711_v36, 0.0  ;;  %v740_v6 = vadd.f32 %v2607_v58, %v2698_v53 }
 0x16b   : > { %v764_v37 = vmax.f32 %v732_v12, 0.0  ;;  %v767_v39 = vmax.f32 %v735_v26, 0.0  ;;  %v3140_v60 = vadd.f32 %v1845_v40, %v1844_v47  ;;  %v1107_v38 = vadd.f32 %v1075_v42, %v1007_v25  ;;  %v3726_v47 = vld [vmem:[#allocation11_spill] sm:$0xff]  ;;  %v3727_v25 = vld [vmem:[#allocation13_spill] sm:$0xff] }
 0x16c   : > { %v765_v22 = vmax.f32 %v733_v62, 0.0  ;;  %v1108_v46 = vadd.f32 %v1076_v29, %v1008_v27  ;;  %808 = vst.msk [vmem:[#allocation2 + $0x188] sm:$0xff] %vm785_vm4, %v774_v28  ;;  %v743_v12 = vadd.f32 %v2607_v58, %v3724_v2  ;;  %v702_v18 = vmul.f32 %v2602_v56, %v3725_v9  ;;  %v3728_v29 = vld [vmem:[#allocation14_spill] sm:$0xff] }
 0x16d   : > { %3723 = vst [vmem:[#allocation28_spill] sm:$0xff] %v3140_v60  ;;  %798 = vst.msk [vmem:[#allocation2 + $0xe8] sm:$0xff] %vm785_vm4, %v764_v37  ;;  %v772_v36 = vmax.f32 %v740_v6, 0.0  ;;  %v707_v53 = vmul.f32 %v3726_v47, %v2602_v56  ;;  %v705_v42 = vmul.f32 %v2602_v56, %v3727_v25  ;;  %v708_v27 = vmul.f32 %v3728_v29, %v2602_v56 }
 0x16e   : > { %801 = vst.msk [vmem:[#allocation2 + $0x110] sm:$0xff] %vm785_vm4, %v767_v39  ;;  %799 = vst.msk [vmem:[#allocation2 + $0xf0] sm:$0xff] %vm785_vm4, %v765_v22  ;;  %v1299_v26 = vadd.f32 %v3007_v1, %v3034_v31  ;;  %v1300_v62 = vadd.f32 %v3019_v8, %v3036_v4  ;;  %v775_v37 = vmax.f32 %v743_v12, 0.0  ;;  %v741_v40 = vadd.f32 %v2607_v58, %v702_v18 }
 0x16f   : > { %v837_v28 = vld [vmem:[#allocation2 + $0x107] sm:$0xff]  ;;  %v3165_v22 = vmul.f32 %v2678_v16, %v3051_v50  ;;  %806 = vst.msk [vmem:[#allocation2 + $0x168] sm:$0xff] %vm785_vm4, %v772_v36  ;;  %v746_v6 = vadd.f32 %v2607_v58, %v707_v53  ;;  %v744_v56 = vadd.f32 %v2607_v58, %v705_v42  ;;  %v747_v1 = vadd.f32 %v2607_v58, %v708_v27  ;;  %v3729_v50 = vld [vmem:[#allocation19_spill] sm:$0xff] }
 0x170   : > { %v937_v39 = vld [vmem:[#allocation2 + $0x108] sm:$0xff]  ;;  %v873_v31 = vmul.f32 %v2610_v59, %v837_v28  ;;  %v3175_v4 = vmul.f32 %v2681_v17, %v3053_v32  ;;  %v3178_v2 = vmul.f32 %v2690_v21, %v1039_v44  ;;  %809 = vst.msk [vmem:[#allocation2 + $0x190] sm:$0xff] %vm785_vm4, %v775_v37  ;;  %v3182_v12 = vadd.f32 %v3729_v50, %v1107_v38 }
 0x171   : > { %v973_v8 = vmul.f32 %v2614_v61, %v937_v39  ;;  %v3185_v9 = vadd.f32 %v3077_v0, %v1108_v46  ;;  %v773_v58 = vmax.f32 %v741_v40, 0.0  ;;  %v778_v18 = vmax.f32 %v746_v6, 0.0 }
 0x172   : > { %3730 = vst [vmem:[#allocation12_spill] sm:$0xff] %v3182_v12  ;;  %v1399_v36 = vadd.f32 %v3023_v15, %v1299_v26  ;;  %v3189_v47 = vadd.f32 %v3027_v24, %v1300_v62  ;;  %v776_v32 = vmax.f32 %v744_v56, 0.0  ;;  %v779_v53 = vmax.f32 %v747_v1, 0.0  ;;  %v3732_v12 = vld [vmem:[#allocation21_spill] sm:$0xff] }
 0x173   : > { %3731 = vst [vmem:[#allocation9_spill] sm:$0xff] %v3185_v9  ;;  %v3192_v44 = vmul.f32 %v2656_v54, %v837_v28  ;;  %v3195_v25 = vmul.f32 %v2667_v5, %v937_v39  ;;  %v3198_v38 = vmul.f32 %v2678_v16, %v837_v28  ;;  %v3201_v0 = vmul.f32 %v2681_v17, %v937_v39 }
 0x174   : > { %v835_v46 = vld [vmem:[#allocation2 + $0xe7] sm:$0xff]  ;;  %807 = vst.msk [vmem:[#allocation2 + $0x170] sm:$0xff] %vm785_vm4, %v773_v58  ;;  %812 = vst.msk [vmem:[#allocation2 + $0x1c8] sm:$0xff] %vm785_vm4, %v778_v18  ;;  %v1005_v15 = vadd.f32 %v973_v8, %v873_v31 }
 0x175   : > { %v935_v42 = vld [vmem:[#allocation2 + $0xe8] sm:$0xff]  ;;  %v871_v24 = vmul.f32 %v2610_v59, %v835_v46  ;;  %v1169_v27 = vmul.f32 %v2656_v54, %v835_v46  ;;  %v938_v62 = vld [vmem:[#allocation2 + $0x110] sm:$0xff]  ;;  %810 = vst.msk [vmem:[#allocation2 + $0x1a8] sm:$0xff] %vm785_vm4, %v776_v32  ;;  %813 = vst.msk [vmem:[#allocation2 + $0x1d0] sm:$0xff] %vm785_vm4, %v779_v53  ;;  %v1468_v28 = vmul.f32 %v2678_v16, %v835_v46 }
 0x176   : > { %v971_v29 = vmul.f32 %v2614_v61, %v935_v42  ;;  %v838_v26 = vld [vmem:[#allocation2 + $0x10f] sm:$0xff]  ;;  %v1269_v40 = vmul.f32 %v2667_v5, %v935_v42  ;;  %v974_v6 = vmul.f32 %v2614_v61, %v938_v62  ;;  %v1568_v8 = vmul.f32 %v2681_v17, %v935_v42 }
 0x177   : > { %v1037_v37 = vld [vmem:[#allocation2 + $0x109] sm:$0xff]  ;;  %v874_v39 = vmul.f32 %v2610_v59, %v838_v26  ;;  %v3214_v56 = vld [vmem:[#allocation2 + $0x111] sm:$0xff]  ;;  %v1201_v31 = vadd.f32 %v1169_v27, %v3015_v43  ;;  %v1500_v58 = vadd.f32 %v1468_v28, %v1399_v36  ;;  %v1172_v53 = vmul.f32 %v2656_v54, %v838_v26 }
 0x178   : > { %v1003_v1 = vadd.f32 %v971_v29, %v871_v24  ;;  %v1073_v50 = vmul.f32 %v2633_v23, %v1037_v37  ;;  %v1074_v32 = vmul.f32 %v2633_v23, %v3214_v56  ;;  %v836_v46 = vld [vmem:[#allocation2 + $0xef] sm:$0xff]  ;;  %v1272_v9 = vmul.f32 %v2667_v5, %v938_v62 }
 0x179   : > { %v1006_v18 = vadd.f32 %v974_v6, %v874_v39  ;;  %v1301_v48 = vadd.f32 %v1269_v40, %v1201_v31  ;;  %v1371_v24 = vmul.f32 %v2685_v19, %v1037_v37  ;;  %v936_v29 = vld [vmem:[#allocation2 + $0xf0] sm:$0xff]  ;;  %v1600_v42 = vadd.f32 %v1568_v8, %v1500_v58 }
 0x17a   : > { %v1105_v3 = vadd.f32 %v1073_v50, %v1005_v15  ;;  %v1035_v43 = vld [vmem:[#allocation2 + $0xe9] sm:$0xff]  ;;  %v1036_v27 = vld [vmem:[#allocation2 + $0xf1] sm:$0xff]  ;;  %v1372_v36 = vmul.f32 %v2685_v19, %v3214_v56  ;;  %v1471_v28 = vmul.f32 %v2678_v16, %v838_v26  ;;  %v1571_v6 = vmul.f32 %v2681_v17, %v938_v62 }
 0x17b   : > { %v1106_v60 = vadd.f32 %v1074_v32, %v1006_v18  ;;  %v1670_v15 = vmul.f32 %v2690_v21, %v1037_v37  ;;  %v872_v40 = vmul.f32 %v2610_v59, %v836_v46  ;;  %v972_v50 = vmul.f32 %v2614_v61, %v936_v29 }
 0x17c   : > { %v1205_v39 = vadd.f32 %v3047_v45, %v1105_v3  ;;  %v1071_v8 = vmul.f32 %v2633_v23, %v1035_v43  ;;  %v1072_v58 = vmul.f32 %v2633_v23, %v1036_v27  ;;  %v1170_v26 = vmul.f32 %v2656_v54, %v836_v46 }
 0x17d   : > { %v1206_v31 = vadd.f32 %v3112_v30, %v1106_v60  ;;  %v1270_v45 = vmul.f32 %v2667_v5, %v936_v29  ;;  %v1369_v3 = vmul.f32 %v2685_v19, %v1035_v43  ;;  %v1004_v37 = vadd.f32 %v972_v50, %v872_v40 }
 0x17e   : > { %v1305_v18 = vadd.f32 %v3058_v14, %v1205_v39  ;;  %v1103_v32 = vadd.f32 %v1071_v8, %v1003_v1  ;;  %v1370_v60 = vmul.f32 %v2685_v19, %v1036_v27  ;;  %v1202_v61 = vadd.f32 %v1170_v26, %v3032_v49 }
 0x17f   : > { %v1306_v62 = vadd.f32 %v3121_v20, %v1206_v31  ;;  %v1401_v59 = vadd.f32 %v1369_v3, %v1301_v48  ;;  %v1469_v23 = vmul.f32 %v2678_v16, %v836_v46  ;;  %v1104_v39 = vadd.f32 %v1072_v58, %v1004_v37  ;;  %v3735_v37 = vld [vmem:[#allocation28_spill] sm:$0xff] }
 0x180   : > { %v1405_v30 = vadd.f32 %v3127_v55, %v1305_v18  ;;  %v1203_v5 = vadd.f32 %v3192_v44, %v1103_v32  ;;  %v1569_v54 = vmul.f32 %v2681_v17, %v936_v29  ;;  %v1302_v40 = vadd.f32 %v1270_v45, %v1202_v61  ;;  %v3734_v45 = vld [vmem:[#allocation20_spill] sm:$0xff]  ;;  %v3736_v32 = vld [vmem:[#allocation9_spill] sm:$0xff] }
 0x181   : > { %v1406_v14 = vadd.f32 %v3136_v7, %v1306_v62  ;;  %v1501_v1 = vadd.f32 %v1469_v23, %v3189_v47  ;;  %v1502_v31 = vadd.f32 %v3198_v38, %v1401_v59  ;;  %v1204_v49 = vadd.f32 %v1172_v53, %v1104_v39 }
 0x182   : > { %v1506_v20 = vadd.f32 %v3732_v12, %v1405_v30  ;;  %v1303_v48 = vadd.f32 %v3195_v25, %v1203_v5  ;;  %v1668_v46 = vmul.f32 %v2690_v21, %v1035_v43  ;;  %v1402_v50 = vadd.f32 %v1370_v60, %v1302_v40  ;;  %v3737_v60 = vld [vmem:[#allocation26_spill] sm:$0xff] }
 0x183   : > { %v1507_v55 = vadd.f32 %v3092_v63, %v1406_v14  ;;  %v1601_v44 = vadd.f32 %v1569_v54, %v1501_v1  ;;  %v1602_v29 = vadd.f32 %v3201_v0, %v1502_v31  ;;  %v1304_v61 = vadd.f32 %v1272_v9, %v1204_v49  ;;  %v843_v49 = vld [vmem:[#allocation2 + $0x167] sm:$0xff] }
 0x184   : > { %v1606_v7 = vadd.f32 %v3040_v11, %v1506_v20  ;;  %v1403_v8 = vadd.f32 %v1371_v24, %v1303_v48  ;;  %v1669_v23 = vmul.f32 %v2690_v21, %v1036_v27  ;;  %v1503_v63 = vadd.f32 %v1471_v28, %v1402_v50  ;;  %v3738_v48 = vld [vmem:[#allocation18_spill] sm:$0xff] }
 0x185   : > { %v1607_v12 = vadd.f32 %v3095_v51, %v1507_v55  ;;  %v1700_v5 = vadd.f32 %v1668_v46, %v1600_v42  ;;  %v1702_v47 = vadd.f32 %v1670_v15, %v1602_v29  ;;  %v1404_v11 = vadd.f32 %v1372_v36, %v1304_v61  ;;  %v3739_v46 = vld [vmem:[#allocation24_spill] sm:$0xff]  ;;  %v3741_v29 = vld [vmem:[#allocation25_spill] sm:$0xff] }
 0x186   : > { %v3258_v59 = vadd.f32 %v3099_v57, %v1606_v7  ;;  %v1504_v54 = vadd.f32 %v3061_v52, %v1403_v8  ;;  %v1701_v38 = vadd.f32 %v1669_v23, %v1601_v44  ;;  %v1671_v51 = vmul.f32 %v2690_v21, %v3214_v56  ;;  %v3740_v44 = vld [vmem:[#allocation27_spill] sm:$0xff]  ;;  %v845_v8 = vld [vmem:[#allocation2 + $0x187] sm:$0xff] }
 0x187   : > { %v3261_v25 = vadd.f32 %v3103_v34, %v1607_v12  ;;  %v1603_v57 = vadd.f32 %v1571_v6, %v1503_v63  ;;  %v1742_v0 = vsel %vm785_vm4, %v1700_v5, 0.0  ;;  %v1505_v34 = vadd.f32 %v3165_v22, %v1404_v11  ;;  %v3317_v23 = vld [vmem:[#allocation2 + $0x188] sm:$0xff] }
 0x188   : > { %v2226_v9 = vpack.c.bf16 %v3258_v59, %v3258_v59  ;;  %v1604_v24 = vadd.f32 %v3066_v10, %v1504_v54  ;;  %v1743_v52 = vadd.f32 %v1742_v0, %v3132_v33  ;;  %v1744_v56 = vsel %vm785_vm4, %v1701_v38, 0.0  ;;  %v943_v63 = vld [vmem:[#allocation2 + $0x168] sm:$0xff] }
 0x189   : > { %v2227_v53 = vpack.c.bf16 %v3261_v25, %v3261_v25  ;;  %v1703_v43 = vadd.f32 %v1671_v51, %v1603_v57  ;;  %v1806_v27 = vmul.f32 %v1700_v5, %v1700_v5  ;;  %v1807_v42 = vmul.f32 %v1701_v38, %v1701_v38  ;;  %v3743_v51 = vld [vmem:[#allocation8_spill] sm:$0xff] }
 0x18a   : > { %2044 = vst.msk [vmem:[%s2385_s17 + $0x40] sm:$0xf] %vm2027_vm5, %v2226_v9  ;;  %v1673_v36 = vmul.f32 %v2690_v21, %v3087_v13  ;;  %v1605_v28 = vadd.f32 %v3175_v4, %v1505_v34  ;;  %v1745_v6 = vadd.f32 %v1744_v56, %v1743_v52  ;;  %v1808_v22 = vmul.f32 %v1702_v47, %v1702_v47  ;;  %v3733_v4 = vld [vmem:[#allocation12_spill] sm:$0xff]  ;;  %v3744_v52 = vld [vmem:[#allocation5_spill] sm:$0xff]  ;;  %v3745_v56 = vld [vmem:[#allocation6_spill] sm:$0xff] }
 0x18b   : > { %2045 = vst.msk [vmem:[%s2385_s17 + $0x44] sm:$0xf] %vm2027_vm5, %v2227_v53  ;;  %v1375_v10 = vmul.f32 %v2685_v19, %v3042_v35  ;;  %v1704_v33 = vadd.f32 %v3178_v2, %v1604_v24  ;;  %v1746_v15 = vsel %vm785_vm4, %v1702_v47, 0.0  ;;  %v1847_v58 = vsel %vm785_vm4, %v1806_v27, 0.0 }
 0x18c   : > { %v1376_v18 = vmul.f32 %v2685_v19, %v3044_v41  ;;  %v3289_v13 = vadd.f32 %v1673_v36, %v1605_v28  ;;  %v1849_v26 = vsel %vm785_vm4, %v1807_v42, 0.0  ;;  %v1307_v3 = vadd.f32 %v3734_v45, %v3733_v4  ;;  %v3746_v36 = vld [vmem:[#allocation10_spill] sm:$0xff]  ;;  %v3747_v45 = vld [vmem:[#allocation16_spill] sm:$0xff] }
 0x18d   : > { %v1809_v62 = vmul.f32 %v1703_v43, %v1703_v43  ;;  %v1848_v35 = vadd.f32 %v1847_v58, %v3735_v37  ;;  %v2220_v2 = vpack.c.bf16 %v1700_v5, %v1700_v5  ;;  %v1308_v30 = vadd.f32 %v3737_v60, %v3736_v32  ;;  %v3322_v5 = vld [vmem:[%s3682_s2] ss:$0 sm:$0xff]  ;;  %v3349_v4 = vld [vmem:[#allocation2 + $0x189] sm:$0xff] }
 0x18e   : > { %v1747_v14 = vadd.f32 %v1746_v15, %v1745_v6  ;;  %v1851_v41 = vsel %vm785_vm4, %v1808_v22, 0.0  ;;  %v2221_v39 = vpack.c.bf16 %v1701_v38, %v1701_v38  ;;  %v2222_v20 = vpack.c.bf16 %v1702_v47, %v1702_v47  ;;  %v3742_v47 = vld [vmem:[#allocation15_spill] sm:$0xff] }
 0x18f   : > { %v1850_v40 = vadd.f32 %v1849_v26, %v1848_v35  ;;  %v2223_v1 = vpack.c.bf16 %v1703_v43, %v1703_v43  ;;  %v2224_v31 = vpack.c.bf16 %v1704_v33, %v1704_v33  ;;  %v2225_v55 = vpack.c.bf16 %v3289_v13, %v3289_v13  ;;  %2038 = vst.msk [vmem:[%s2385_s17 + $0x28] sm:$0xf] %vm2027_vm5, %v2220_v2  ;;  %v3347_v26 = vld [vmem:[#allocation2 + $0x190] sm:$0xff] }
 0x190   : > { %v1109_v7 = vadd.f32 %v3739_v46, %v3738_v48  ;;  %v1748_v50 = vsel %vm785_vm4, %v1703_v43, 0.0  ;;  %2039 = vst.msk [vmem:[%s2385_s17 + $0x2c] sm:$0xf] %vm2027_vm5, %v2221_v39  ;;  %2040 = vst.msk [vmem:[%s2385_s17 + $0x30] sm:$0xf] %vm2027_vm5, %v2222_v20  ;;  %v1110_v12 = vadd.f32 %v3741_v29, %v3740_v44  ;;  %v706_v11 = vmul.f32 %v3322_v5, %v3742_v47  ;;  %v3749_v35 = vld [vmem:[#allocation22_spill] sm:$0xff] }
 0x191   : > { %v1852_v61 = vadd.f32 %v1851_v41, %v1850_v40  ;;  %2041 = vst.msk [vmem:[%s2385_s17 + $0x34] sm:$0xf] %vm2027_vm5, %v2223_v1  ;;  %2042 = vst.msk [vmem:[%s2385_s17 + $0x38] sm:$0xf] %vm2027_vm5, %v2224_v31  ;;  %v1810_v54 = vmul.f32 %v1704_v33, %v1704_v33  ;;  %v1853_v38 = vsel %vm785_vm4, %v1809_v62, 0.0  ;;  %v1177_v9 = vmul.f32 %v3743_v51, %v843_v49  ;;  %v3748_v62 = vld [vmem:[#allocation17_spill] sm:$0xff] }
 0x192   : > { %2043 = vst.msk [vmem:[%s2385_s17 + $0x3c] sm:$0xf] %vm2027_vm5, %v2225_v55  ;;  %v1407_v57 = vadd.f32 %v1375_v10, %v1307_v3  ;;  %v1749_v0 = vadd.f32 %v1748_v50, %v1747_v14  ;;  %v1750_v53 = vsel %vm785_vm4, %v1704_v33, 0.0  ;;  %v1476_v34 = vmul.f32 %v2678_v16, %v843_v49  ;;  %v3339_v10 = vld [vmem:[%s3683_s3] ss:$0 sm:$0xff]  ;;  %v844_v41 = vld [vmem:[#allocation2 + $0x16f] sm:$0xff] }
 0x193   : > { %v1408_v24 = vadd.f32 %v1376_v18, %v1308_v30  ;;  %v881_v43 = vmul.f32 %v3744_v52, %v845_v8  ;;  %v981_v27 = vmul.f32 %v3745_v56, %v3317_v23  ;;  %v1209_v42 = vadd.f32 %v1177_v9, %v1109_v7  ;;  %v3345_v18 = vld [vmem:[#allocation2 + $0x18f] sm:$0xff] }
 0x194   : > { %v1277_v28 = vmul.f32 %v3746_v36, %v943_v63  ;;  %v1854_v6 = vadd.f32 %v1853_v38, %v1852_v61  ;;  %v879_v22 = vmul.f32 %v3744_v52, %v843_v49  ;;  %v979_v15 = vmul.f32 %v3745_v56, %v943_v63  ;;  %v944_v39 = vld [vmem:[#allocation2 + $0x170] sm:$0xff] }
 0x195   : > { %v3342_v33 = vadd.f32 %v3339_v10, %v706_v11  ;;  %v1855_v58 = vsel %vm785_vm4, %v1810_v54, 0.0  ;;  %v3353_v3 = vmul.f32 %v3322_v5, %v3747_v45  ;;  %v3357_v37 = vmul.f32 %v3322_v5, %v3748_v62  ;;  %v1043_v20 = vld [vmem:[#allocation2 + $0x169] sm:$0xff]  ;;  %v3372_v49 = vld [vmem:[#allocation2 + $0x191] sm:$0xff] }
 0x196   : > { %v3361_v2 = vmul.f32 %v3322_v5, %v3749_v35  ;;  %v1751_v32 = vadd.f32 %v1750_v53, %v1749_v0  ;;  %v3364_v60 = vmul.f32 %v3743_v51, %v845_v8  ;;  %v1508_v30 = vadd.f32 %v1476_v34, %v1407_v57  ;;  %v1044_v44 = vld [vmem:[#allocation2 + $0x171] sm:$0xff] }
 0x197   : > { %v1576_v14 = vmul.f32 %v2681_v17, %v943_v63  ;;  %v3367_v40 = vadd.f32 %v981_v27, %v881_v43  ;;  %v1478_v1 = vmul.f32 %v2678_v16, %v845_v8  ;;  %v1578_v31 = vmul.f32 %v2681_v17, %v3317_v23  ;;  %v3750_v29 = vld [vmem:[#allocation7_spill] sm:$0xff] }
 0x198   : > { %v1309_v55 = vadd.f32 %v1277_v28, %v1209_v42  ;;  %v1856_v48 = vadd.f32 %v1855_v58, %v1854_v6  ;;  %v1011_v46 = vadd.f32 %v979_v15, %v879_v22  ;;  %v882_v7 = vmul.f32 %v3744_v52, %v3345_v18 }
 0x199   : > { %v982_v50 = vmul.f32 %v3745_v56, %v3347_v26  ;;  %v3380_v61 = vmul.f32 %v3750_v29, %v3349_v4  ;;  %v1178_v8 = vmul.f32 %v3743_v51, %v844_v41  ;;  %v1278_v63 = vmul.f32 %v3746_v36, %v944_v39 }
 0x19a   : > { %v1377_v47 = vmul.f32 %v2685_v19, %v1043_v20  ;;  %v1608_v11 = vadd.f32 %v1576_v14, %v1508_v30  ;;  %v3387_v54 = vmul.f32 %v3750_v29, %v3372_v49  ;;  %v1479_v38 = vmul.f32 %v2678_v16, %v3345_v18 }
 0x19b   : > { %v1477_v9 = vmul.f32 %v2678_v16, %v844_v41  ;;  %v1210_v57 = vadd.f32 %v1178_v8, %v1110_v12  ;;  %v1378_v0 = vmul.f32 %v2685_v19, %v1044_v44  ;;  %v1577_v34 = vmul.f32 %v2681_v17, %v944_v39 }
 0x19c   : > { %v1409_v53 = vadd.f32 %v1377_v47, %v1309_v55  ;;  %v1579_v43 = vmul.f32 %v2681_v17, %v3347_v26  ;;  %v1678_v27 = vmul.f32 %v2690_v21, %v3349_v4  ;;  %v1676_v28 = vmul.f32 %v2690_v21, %v1043_v20 }
 0x19d   : > { %v1509_v42 = vadd.f32 %v1477_v9, %v1408_v24  ;;  %v1310_v6 = vadd.f32 %v1278_v63, %v1210_v57  ;;  %v1677_v15 = vmul.f32 %v2690_v21, %v1044_v44  ;;  %v1752_v12 = vsel %vm785_vm4, %v3289_v13, 0.0 }
 0x19e   : > { %v1510_v22 = vadd.f32 %v1478_v1, %v1409_v53  ;;  %v880_v58 = vmul.f32 %v3744_v52, %v844_v41  ;;  %v980_v45 = vmul.f32 %v3745_v56, %v944_v39  ;;  %v1753_v35 = vadd.f32 %v1752_v12, %v1751_v32 }
 0x19f   : > { %v1609_v62 = vadd.f32 %v1577_v34, %v1509_v42  ;;  %v1079_v30 = vmul.f32 %v3750_v29, %v1043_v20  ;;  %v1410_v14 = vadd.f32 %v1378_v0, %v1310_v6  ;;  %v1754_v24 = vsel %vm785_vm4, %v3258_v59, 0.0 }
 0x1a0   : > { %v1610_v55 = vadd.f32 %v1578_v31, %v1510_v22  ;;  %v1708_v8 = vadd.f32 %v1676_v28, %v1608_v11  ;;  %v1755_v1 = vadd.f32 %v1754_v24, %v1753_v35  ;;  %v1811_v63 = vmul.f32 %v3289_v13, %v3289_v13  ;;  %v3751_v24 = vld [vmem:[#allocation23_spill] sm:$0xff] }
 0x1a1   : > { %v1812_v47 = vmul.f32 %v3258_v59, %v3258_v59  ;;  %v1679_v41 = vmul.f32 %v2690_v21, %v3372_v49  ;;  %v1511_v39 = vadd.f32 %v1479_v38, %v1410_v14  ;;  %v1709_v32 = vadd.f32 %v1677_v15, %v1609_v62 }
 0x1a2   : > { %v1756_v20 = vsel %vm785_vm4, %v3261_v25, 0.0  ;;  %v1710_v31 = vadd.f32 %v1678_v27, %v1610_v55  ;;  %v1813_v11 = vmul.f32 %v3261_v25, %v3261_v25  ;;  %v1857_v57 = vsel %vm785_vm4, %v1811_v63, 0.0  ;;  %v849_v55 = vld [vmem:[#allocation2 + $0x1c7] sm:$0xff] }
 0x1a3   : > { %v1757_v9 = vadd.f32 %v1756_v20, %v1755_v1  ;;  %v1012_v0 = vadd.f32 %v980_v45, %v880_v58  ;;  %v1080_v13 = vmul.f32 %v3750_v29, %v1044_v44  ;;  %v1611_v53 = vadd.f32 %v1579_v43, %v1511_v39  ;;  %v947_v20 = vld [vmem:[#allocation2 + $0x1a8] sm:$0xff] }
 0x1a4   : > { %v1858_v59 = vadd.f32 %v1857_v57, %v1856_v48  ;;  %v1014_v34 = vadd.f32 %v982_v50, %v882_v7  ;;  %v1111_v42 = vadd.f32 %v1079_v30, %v1011_v46  ;;  %v1758_v38 = vsel %vm785_vm4, %v1708_v8, 0.0 }
 0x1a5   : > { %v1859_v28 = vsel %vm785_vm4, %v1812_v47, 0.0  ;;  %v3421_v6 = vadd.f32 %v1679_v41, %v1611_v53  ;;  %v1759_v27 = vadd.f32 %v1758_v38, %v1757_v9  ;;  %v1814_v22 = vmul.f32 %v1708_v8, %v1708_v8  ;;  %v847_v47 = vld [vmem:[#allocation2 + $0x1a7] sm:$0xff] }
 0x1a6   : > { %v1860_v25 = vadd.f32 %v1859_v28, %v1858_v59  ;;  %v1861_v15 = vsel %vm785_vm4, %v1813_v11, 0.0  ;;  %v2228_v12 = vpack.c.bf16 %v1708_v8, %v1708_v8  ;;  %v2229_v44 = vpack.c.bf16 %v1709_v32, %v1709_v32  ;;  %v950_v11 = vld [vmem:[#allocation2 + $0x1d0] sm:$0xff] }
 0x1a7   : > { %v2230_v48 = vpack.c.bf16 %v1710_v31, %v1710_v31  ;;  %v1180_v46 = vmul.f32 %v3743_v51, %v3345_v18  ;;  %v1112_v7 = vadd.f32 %v1080_v13, %v1012_v0  ;;  %v2231_v43 = vpack.c.bf16 %v3421_v6, %v3421_v6 }
 0x1a8   : > { %v1862_v50 = vadd.f32 %v1861_v15, %v1860_v25  ;;  %v1279_v58 = vmul.f32 %v3746_v36, %v3317_v23  ;;  %v1211_v45 = vadd.f32 %v3364_v60, %v1111_v42  ;;  %v1760_v62 = vsel %vm785_vm4, %v1709_v32, 0.0  ;;  %2046 = vst.msk [vmem:[%s2385_s17 + $0x48] sm:$0xf] %vm2027_vm5, %v2228_v12  ;;  %2047 = vst.msk [vmem:[%s2385_s17 + $0x4c] sm:$0xf] %vm2027_vm5, %v2229_v44  ;;  %v949_v23 = vld [vmem:[#allocation2 + $0x1c8] sm:$0xff] }
 0x1a9   : > { %v1815_v35 = vmul.f32 %v1709_v32, %v1709_v32  ;;  %2048 = vst.msk [vmem:[%s2385_s17 + $0x50] sm:$0xf] %vm2027_vm5, %v2230_v48  ;;  %v1280_v18 = vmul.f32 %v3746_v36, %v3347_v26  ;;  %v1761_v30 = vadd.f32 %v1760_v62, %v1759_v27  ;;  %v1816_v14 = vmul.f32 %v1710_v31, %v1710_v31  ;;  %v1050_v48 = vld [vmem:[#allocation2 + $0x1d1] sm:$0xff] }
 0x1aa   : > { %2049 = vst.msk [vmem:[%s2385_s17 + $0x54] sm:$0xf] %vm2027_vm5, %v2231_v43  ;;  %v710_v60 = vmul.f32 %v3322_v5, %v3751_v24  ;;  %v1113_v8 = vadd.f32 %v3380_v61, %v3367_v40  ;;  %v1379_v1 = vmul.f32 %v2685_v19, %v3349_v4  ;;  %v3450_v63 = vmul.f32 %v2685_v19, %v3372_v49  ;;  %v850_v49 = vld [vmem:[#allocation2 + $0x1cf] sm:$0xff] }
 0x1ab   : > { %v1863_v26 = vsel %vm785_vm4, %v1814_v22, 0.0  ;;  %v3454_v41 = vadd.f32 %v3387_v54, %v1014_v34  ;;  %v1212_v39 = vadd.f32 %v1180_v46, %v1112_v7  ;;  %v1762_v32 = vsel %vm785_vm4, %v1710_v31, 0.0  ;;  %v1049_v22 = vld [vmem:[#allocation2 + $0x1c9] sm:$0xff] }
 0x1ac   : > { %v1864_v5 = vadd.f32 %v1863_v26, %v1862_v50  ;;  %v1865_v40 = vsel %vm785_vm4, %v1815_v35, 0.0  ;;  %v885_v61 = vmul.f32 %v3744_v52, %v849_v55  ;;  %v985_v4 = vmul.f32 %v3745_v56, %v949_v23 }
 0x1ad   : > { %v1311_v9 = vadd.f32 %v1279_v58, %v1211_v45  ;;  %v1763_v57 = vadd.f32 %v1762_v32, %v1761_v30  ;;  %v1817_v0 = vmul.f32 %v3421_v6, %v3421_v6  ;;  %v1867_v54 = vsel %vm785_vm4, %v1816_v14, 0.0 }
 0x1ae   : > { %v1181_v13 = vmul.f32 %v3743_v51, %v847_v47  ;;  %v3465_v31 = vmul.f32 %v3743_v51, %v849_v55  ;;  %v3468_v53 = vmul.f32 %v3746_v36, %v949_v23  ;;  %v883_v59 = vmul.f32 %v3744_v52, %v847_v47 }
 0x1af   : > { %v983_v34 = vmul.f32 %v3745_v56, %v947_v20  ;;  %v1866_v42 = vadd.f32 %v1865_v40, %v1864_v5  ;;  %v3473_v38 = vmul.f32 %v2678_v16, %v849_v55  ;;  %v886_v28 = vmul.f32 %v3744_v52, %v850_v49  ;;  %v1452_v40 = vld [vmem:[#allocation2 + $0x227] sm:$0xff] }
 0x1b0   : > { %v986_v27 = vmul.f32 %v3745_v56, %v950_v11  ;;  %v1017_v25 = vadd.f32 %v985_v4, %v885_v61  ;;  %v3478_v15 = vmul.f32 %v2681_v17, %v949_v23  ;;  %v1411_v12 = vadd.f32 %v1379_v1, %v1311_v9  ;;  %v1453_v61 = vld [vmem:[#allocation2 + $0x22f] sm:$0xff] }
 0x1b1   : > { %v1480_v44 = vmul.f32 %v2678_v16, %v847_v47  ;;  %v1213_v46 = vadd.f32 %v1181_v13, %v1113_v8  ;;  %v1281_v7 = vmul.f32 %v3746_v36, %v947_v20  ;;  %v1580_v50 = vmul.f32 %v2681_v17, %v947_v20  ;;  %v1552_v4 = vld [vmem:[#allocation2 + $0x228] sm:$0xff]  ;;  %v1553_v9 = vld [vmem:[#allocation2 + $0x230] sm:$0xff] }
 0x1b2   : > { %v777_v43 = vmax.f32 %v3342_v33, 0.0  ;;  %v1015_v58 = vadd.f32 %v983_v34, %v883_v59  ;;  %v1085_v45 = vmul.f32 %v3750_v29, %v1049_v22  ;;  %v750_v62 = vadd.f32 %v3339_v10, %v3353_v3 }
 0x1b3   : > { %v748_v35 = vadd.f32 %v3339_v10, %v3357_v37  ;;  %v1868_v30 = vadd.f32 %v1867_v54, %v1866_v42  ;;  %v1018_v14 = vadd.f32 %v986_v27, %v886_v28  ;;  %v1086_v55 = vmul.f32 %v3750_v29, %v1050_v48 }
 0x1b4   : > { %811 = vst.msk [vmem:[#allocation2 + $0x1b0] sm:$0xff] %vm785_vm4, %v777_v43  ;;  %v751_v23 = vadd.f32 %v3339_v10, %v3361_v2  ;;  %v1512_v24 = vadd.f32 %v1480_v44, %v1411_v12  ;;  %v782_v33 = vmax.f32 %v750_v62, 0.0  ;;  %v749_v1 = vadd.f32 %v3339_v10, %v710_v60 }
 0x1b5   : > { %v780_v8 = vmax.f32 %v748_v35, 0.0  ;;  %v1313_v26 = vadd.f32 %v1281_v7, %v1213_v46  ;;  %v1184_v3 = vmul.f32 %v3743_v51, %v850_v49  ;;  %v1312_v47 = vadd.f32 %v1280_v18, %v1212_v39 }
 0x1b6   : > { %v783_v32 = vmax.f32 %v751_v23, 0.0  ;;  %v3495_v37 = vadd.f32 %v1085_v45, %v1017_v25  ;;  %v3498_v5 = vmul.f32 %v3746_v36, %v950_v11  ;;  %v3501_v20 = vmul.f32 %v2685_v19, %v1049_v22  ;;  %816 = vst.msk [vmem:[#allocation2 + $0x208] sm:$0xff] %vm785_vm4, %v782_v33 }
 0x1b7   : > { %814 = vst.msk [vmem:[#allocation2 + $0x1e8] sm:$0xff] %vm785_vm4, %v780_v8  ;;  %v781_v2 = vmax.f32 %v749_v1, 0.0  ;;  %v3505_v10 = vadd.f32 %v1086_v55, %v1018_v14  ;;  %v3508_v60 = vmul.f32 %v2685_v19, %v1050_v48  ;;  %v1483_v18 = vmul.f32 %v2678_v16, %v850_v49 }
 0x1b8   : > { %v3512_v39 = vmul.f32 %v2681_v17, %v950_v11  ;;  %817 = vst.msk [vmem:[#allocation2 + $0x210] sm:$0xff] %vm785_vm4, %v783_v32  ;;  %v1612_v54 = vadd.f32 %v1580_v50, %v1512_v24  ;;  %v1682_v13 = vmul.f32 %v2690_v21, %v1049_v22  ;;  %v1764_v59 = vsel %vm785_vm4, %v3421_v6, 0.0  ;;  %v1652_v50 = vld [vmem:[#allocation2 + $0x229] sm:$0xff] }
 0x1b9   : > { %v1869_v34 = vsel %vm785_vm4, %v1817_v0, 0.0  ;;  %815 = vst.msk [vmem:[#allocation2 + $0x1f0] sm:$0xff] %vm785_vm4, %v781_v2  ;;  %v3521_v49 = vmul.f32 %v2690_v21, %v1050_v48  ;;  %v1412_v11 = vadd.f32 %v3450_v63, %v1312_v47  ;;  %v1765_v42 = vadd.f32 %v1764_v59, %v1763_v57 }
 0x1ba   : > { %v1870_v28 = vadd.f32 %v1869_v34, %v1868_v30  ;;  %v3525_v44 = vmul.f32 %v2678_v16, %v1452_v40  ;;  %v3528_v22 = vmul.f32 %v2678_v16, %v1453_v61  ;;  %v3531_v6 = vmul.f32 %v2681_v17, %v1552_v4 }
 0x1bb   : > { %v848_v27 = vld [vmem:[#allocation2 + $0x1af] sm:$0xff]  ;;  %v3534_v0 = vmul.f32 %v2681_v17, %v1553_v9  ;;  %v3549_v32 = vmul.f32 %v2690_v21, %v1652_v50 }
 0x1bc   : > { %v948_v25 = vld [vmem:[#allocation2 + $0x1b0] sm:$0xff]  ;;  %v884_v48 = vmul.f32 %v3744_v52, %v848_v27  ;;  %v1182_v7 = vmul.f32 %v3743_v51, %v848_v27  ;;  %v1481_v23 = vmul.f32 %v2678_v16, %v848_v27 }
 0x1bd   : > { %v1047_v12 = vld [vmem:[#allocation2 + $0x1a9] sm:$0xff]  ;;  %v984_v63 = vmul.f32 %v3745_v56, %v948_v25  ;;  %v1048_v57 = vld [vmem:[#allocation2 + $0x1b1] sm:$0xff]  ;;  %v1282_v45 = vmul.f32 %v3746_v36, %v948_v25  ;;  %v1581_v8 = vmul.f32 %v2681_v17, %v948_v25 }
 0x1be   : > { %v1083_v46 = vmul.f32 %v3750_v29, %v1047_v12  ;;  %v1084_v43 = vmul.f32 %v3750_v29, %v1048_v57  ;;  %v1381_v62 = vmul.f32 %v2685_v19, %v1047_v12  ;;  %v1382_v35 = vmul.f32 %v2685_v19, %v1048_v57  ;;  %v1151_v24 = vld [vmem:[#allocation2 + $0x207] sm:$0xff] }
 0x1bf   : > { %v1016_v30 = vadd.f32 %v984_v63, %v884_v48  ;;  %v1214_v55 = vadd.f32 %v1182_v7, %v3454_v41  ;;  %v1680_v1 = vmul.f32 %v2690_v21, %v1047_v12  ;;  %v1251_v47 = vld [vmem:[#allocation2 + $0x208] sm:$0xff]  ;;  %v1513_v61 = vadd.f32 %v1481_v23, %v1412_v11 }
 0x1c0   : > { %v1115_v14 = vadd.f32 %v1083_v46, %v1015_v58  ;;  %v1413_v33 = vadd.f32 %v1381_v62, %v1313_v26  ;;  %v1681_v4 = vmul.f32 %v2690_v21, %v1048_v57  ;;  %v3555_v26 = vmul.f32 %v3743_v51, %v1151_v24  ;;  %v951_v12 = vld [vmem:[#allocation2 + $0x1e8] sm:$0xff] }
 0x1c1   : > { %v1116_v2 = vadd.f32 %v1084_v43, %v1016_v30  ;;  %v1314_v40 = vadd.f32 %v1282_v45, %v1214_v55  ;;  %v1712_v9 = vadd.f32 %v1680_v1, %v1612_v54  ;;  %v1613_v27 = vadd.f32 %v1581_v8, %v1513_v61 }
 0x1c2   : > { %v1215_v58 = vadd.f32 %v3465_v31, %v1115_v14  ;;  %v1514_v41 = vadd.f32 %v3473_v38, %v1413_v33  ;;  %v3560_v25 = vmul.f32 %v3746_v36, %v1251_v47  ;;  %v3565_v46 = vmul.f32 %v2678_v16, %v1151_v24 }
 0x1c3   : > { %v3557_v59 = vadd.f32 %v1184_v3, %v1116_v2  ;;  %v1414_v34 = vadd.f32 %v1382_v35, %v1314_v40  ;;  %v1766_v48 = vsel %vm785_vm4, %v1712_v9, 0.0  ;;  %v1818_v31 = vmul.f32 %v1712_v9, %v1712_v9  ;;  %v851_v3 = vld [vmem:[#allocation2 + $0x1e7] sm:$0xff]  ;;  %v1152_v2 = vld [vmem:[#allocation2 + $0x20f] sm:$0xff] }
 0x1c4   : > { %v1614_v11 = vadd.f32 %v3478_v15, %v1514_v41  ;;  %v2232_v63 = vpack.c.bf16 %v1712_v9, %v1712_v9  ;;  %v1713_v54 = vadd.f32 %v1681_v4, %v1613_v27  ;;  %v1767_v57 = vadd.f32 %v1766_v48, %v1765_v42  ;;  %v1252_v40 = vld [vmem:[#allocation2 + $0x210] sm:$0xff] }
 0x1c5   : > { %v1515_v38 = vadd.f32 %v1483_v18, %v1414_v34  ;;  %v1871_v50 = vsel %vm785_vm4, %v1818_v31, 0.0  ;;  %v887_v43 = vmul.f32 %v3744_v52, %v851_v3  ;;  %v987_v15 = vmul.f32 %v3745_v56, %v951_v12  ;;  %v1351_v41 = vld [vmem:[#allocation2 + $0x209] sm:$0xff]  ;;  %v1352_v9 = vld [vmem:[#allocation2 + $0x211] sm:$0xff] }
 0x1c6   : > { %v1714_v7 = vadd.f32 %v1682_v13, %v1614_v11  ;;  %2050 = vst.msk [vmem:[%s2385_s17 + $0x58] sm:$0xf] %vm2027_vm5, %v2232_v63  ;;  %v1768_v18 = vsel %vm785_vm4, %v1713_v54, 0.0  ;;  %v1819_v62 = vmul.f32 %v1713_v54, %v1713_v54  ;;  %v1872_v42 = vadd.f32 %v1871_v50, %v1870_v28  ;;  %v852_v31 = vld [vmem:[#allocation2 + $0x1ef] sm:$0xff] }
 0x1c7   : > { %v1615_v45 = vadd.f32 %v3512_v39, %v1515_v38  ;;  %v1769_v35 = vadd.f32 %v1768_v18, %v1767_v57  ;;  %v2233_v14 = vpack.c.bf16 %v1713_v54, %v1713_v54  ;;  %v3575_v13 = vmul.f32 %v2681_v17, %v1251_v47  ;;  %v1051_v57 = vld [vmem:[#allocation2 + $0x1e9] sm:$0xff] }
 0x1c8   : > { %v1820_v30 = vmul.f32 %v1714_v7, %v1714_v7  ;;  %v1770_v23 = vsel %vm785_vm4, %v1714_v7, 0.0  ;;  %v1873_v24 = vsel %vm785_vm4, %v1819_v62, 0.0  ;;  %v2234_v33 = vpack.c.bf16 %v1714_v7, %v1714_v7  ;;  %v1052_v7 = vld [vmem:[#allocation2 + $0x1f1] sm:$0xff] }
 0x1c9   : > { %v1715_v55 = vadd.f32 %v3521_v49, %v1615_v45  ;;  %v3580_v8 = vadd.f32 %v1770_v23, %v1769_v35  ;;  %v1874_v39 = vadd.f32 %v1873_v24, %v1872_v42  ;;  %2051 = vst.msk [vmem:[%s2385_s17 + $0x5c] sm:$0xf] %vm2027_vm5, %v2233_v14  ;;  %v1019_v28 = vadd.f32 %v987_v15, %v887_v43 }
 0x1ca   : > { %v1185_v1 = vmul.f32 %v3743_v51, %v851_v3  ;;  %v1875_v47 = vsel %vm785_vm4, %v1820_v30, 0.0  ;;  %2052 = vst.msk [vmem:[%s2385_s17 + $0x60] sm:$0xf] %vm2027_vm5, %v2234_v33  ;;  %v1285_v49 = vmul.f32 %v3746_v36, %v951_v12  ;;  %v1315_v4 = vadd.f32 %v3468_v53, %v1215_v58  ;;  %v952_v58 = vld [vmem:[#allocation2 + $0x1f0] sm:$0xff] }
 0x1cb   : > { %v2235_v61 = vpack.c.bf16 %v1715_v55, %v1715_v55  ;;  %v1821_v34 = vmul.f32 %v1715_v55, %v1715_v55  ;;  %v3590_v27 = vadd.f32 %v1875_v47, %v1874_v39  ;;  %v1484_v48 = vmul.f32 %v2678_v16, %v851_v3 }
 0x1cc   : > { %v1217_v11 = vadd.f32 %v1185_v1, %v3495_v37  ;;  %v1415_v63 = vadd.f32 %v3501_v20, %v1315_v4  ;;  %v1584_v38 = vmul.f32 %v2681_v17, %v951_v12  ;;  %v1188_v54 = vmul.f32 %v3743_v51, %v1152_v2 }
 0x1cd   : > { %2053 = vst.msk [vmem:[%s2385_s17 + $0x64] sm:$0xf] %vm2027_vm5, %v2235_v61  ;;  %v1288_v53 = vmul.f32 %v3746_v36, %v1252_v40  ;;  %v1387_v43 = vmul.f32 %v2685_v19, %v1351_v41  ;;  %v1388_v37 = vmul.f32 %v2685_v19, %v1352_v9  ;;  %v1487_v3 = vmul.f32 %v2678_v16, %v1152_v2 }
 0x1ce   : > { %v1317_v50 = vadd.f32 %v1285_v49, %v1217_v11  ;;  %v1516_v15 = vadd.f32 %v1484_v48, %v1415_v63  ;;  %v1587_v45 = vmul.f32 %v2681_v17, %v1252_v40  ;;  %v1686_v20 = vmul.f32 %v2690_v21, %v1351_v41 }
 0x1cf   : > { %v888_v12 = vmul.f32 %v3744_v52, %v852_v31  ;;  %v988_v18 = vmul.f32 %v3745_v56, %v952_v58  ;;  %v1087_v62 = vmul.f32 %v3750_v29, %v1051_v57  ;;  %v1088_v42 = vmul.f32 %v3750_v29, %v1052_v7 }
 0x1d0   : > { %v1186_v35 = vmul.f32 %v3743_v51, %v852_v31  ;;  %v1616_v30 = vadd.f32 %v1584_v38, %v1516_v15  ;;  %v1286_v14 = vmul.f32 %v3746_v36, %v952_v58  ;;  %v1316_v23 = vadd.f32 %v3498_v5, %v3557_v59 }
 0x1d1   : > { %v1385_v24 = vmul.f32 %v2685_v19, %v1051_v57  ;;  %v1020_v33 = vadd.f32 %v988_v18, %v888_v12  ;;  %v1119_v39 = vadd.f32 %v1087_v62, %v1019_v28  ;;  %v1386_v56 = vmul.f32 %v2685_v19, %v1052_v7 }
 0x1d2   : > { %v1218_v52 = vadd.f32 %v1186_v35, %v3505_v10  ;;  %v1416_v1 = vadd.f32 %v3508_v60, %v1316_v23  ;;  %v1485_v29 = vmul.f32 %v2678_v16, %v852_v31  ;;  %v1585_v51 = vmul.f32 %v2681_v17, %v952_v58 }
 0x1d3   : > { %v1417_v2 = vadd.f32 %v1385_v24, %v1317_v50  ;;  %v1120_v40 = vadd.f32 %v1088_v42, %v1020_v33  ;;  %v1219_v36 = vadd.f32 %v3555_v26, %v1119_v39  ;;  %v1684_v5 = vmul.f32 %v2690_v21, %v1051_v57 }
 0x1d4   : > { %v1318_v47 = vadd.f32 %v1286_v14, %v1218_v52  ;;  %v1517_v59 = vadd.f32 %v1485_v29, %v1416_v1  ;;  %v1685_v10 = vmul.f32 %v2690_v21, %v1052_v7  ;;  %v1772_v19 = vsel %vm785_vm4, %v1715_v55, 0.0 }
 0x1d5   : > { %v1518_v28 = vadd.f32 %v3565_v46, %v1417_v2  ;;  %v1220_v61 = vadd.f32 %v1188_v54, %v1120_v40  ;;  %v1319_v60 = vadd.f32 %v3560_v25, %v1219_v36  ;;  %v1716_v16 = vadd.f32 %v1684_v5, %v1616_v30  ;;  %v1653_v46 = vld [vmem:[#allocation2 + $0x231] sm:$0xff] }
 0x1d6   : > { %v1418_v49 = vadd.f32 %v1386_v56, %v1318_v47  ;;  %v1687_v17 = vmul.f32 %v2690_v21, %v1352_v9  ;;  %v1617_v4 = vadd.f32 %v1585_v51, %v1517_v59  ;;  %v1773_v41 = vadd.f32 %v1772_v19, %v3580_v8 }
 0x1d7   : > { %v1618_v26 = vadd.f32 %v3575_v13, %v1518_v28  ;;  %v1320_v11 = vadd.f32 %v1288_v53, %v1220_v61  ;;  %v1419_v48 = vadd.f32 %v1387_v43, %v1319_v60  ;;  %v1774_v63 = vsel %vm785_vm4, %v1716_v16, 0.0 }
 0x1d8   : > { %v1519_v31 = vadd.f32 %v1487_v3, %v1418_v49  ;;  %v1717_v38 = vadd.f32 %v1685_v10, %v1617_v4  ;;  %v1775_v54 = vadd.f32 %v1774_v63, %v1773_v41  ;;  %v1877_v25 = vsel %vm785_vm4, %v1821_v34, 0.0  ;;  %v1722_v4 = vld [vmem:[#allocation3] sm:$0x1] }
 0x1d9   : > { %v1718_v55 = vadd.f32 %v1686_v20, %v1618_v26  ;;  %v1420_v58 = vadd.f32 %v1388_v37, %v1320_v11  ;;  %v1520_v57 = vadd.f32 %v3525_v44, %v1419_v48  ;;  %v1822_v7 = vmul.f32 %v1716_v16, %v1716_v16 }
 0x1da   : > { %v1619_v9 = vadd.f32 %v1587_v45, %v1519_v31  ;;  %v1689_v13 = vmul.f32 %v2690_v21, %v1653_v46  ;;  %v1776_v8 = vsel %vm785_vm4, %v1717_v38, 0.0  ;;  %v1823_v53 = vmul.f32 %v1717_v38, %v1717_v38  ;;  %v1795_v46 = vld [vmem:[#allocation4] sm:$0x1] }
 0x1db   : > { %v1878_v50 = vadd.f32 %v1877_v25, %v3590_v27  ;;  %v1521_v43 = vadd.f32 %v3528_v22, %v1420_v58  ;;  %v1620_v3 = vadd.f32 %v3531_v6, %v1520_v57  ;;  %v1777_v20 = vadd.f32 %v1776_v8, %v1775_v54 }
 0x1dc   : > { %v1719_v15 = vadd.f32 %v1687_v17, %v1619_v9  ;;  %v1778_v34 = vsel %vm785_vm4, %v1718_v55, 0.0  ;;  %v1824_v37 = vmul.f32 %v1718_v55, %v1718_v55  ;;  %v2236_v44 = vpack.c.bf16 %v1716_v16, %v1716_v16 }
 0x1dd   : > { %v1621_v45 = vadd.f32 %v3534_v0, %v1521_v43  ;;  %v1720_v21 = vadd.f32 %v3549_v32, %v1620_v3  ;;  %v1779_v12 = vadd.f32 %v1778_v34, %v1777_v20  ;;  %v1879_v27 = vsel %vm785_vm4, %v1822_v7, 0.0 }
 0x1de   : > { %v1780_v18 = vsel %vm785_vm4, %v1719_v15, 0.0  ;;  %v1880_v22 = vadd.f32 %v1879_v27, %v1878_v50  ;;  %v2237_v62 = vpack.c.bf16 %v1717_v38, %v1717_v38  ;;  %v2238_v6 = vpack.c.bf16 %v1718_v55, %v1718_v55  ;;  %2054 = vst.msk [vmem:[%s2385_s17 + $0x68] sm:$0xf] %vm2027_vm5, %v2236_v44  ;;  %v2075_v50 = vld [vmem:[%s3686_s6] sm:$0x1] (!%p2206_p6) }
 0x1df   : > { %v1721_v42 = vadd.f32 %v1689_v13, %v1621_v45  ;;  %v1781_v35 = vadd.f32 %v1780_v18, %v1779_v12  ;;  %v1825_v30 = vmul.f32 %v1719_v15, %v1719_v15  ;;  %v1881_v0 = vsel %vm785_vm4, %v1823_v53, 0.0  ;;  %v2070_v13 = vld [vmem:[%s3685_s5] sm:$0x1] (!%p2206_p6) }
 0x1e0   : > { %v1782_v32 = vsel %vm785_vm4, %v1720_v21, 0.0  ;;  %v1882_v14 = vadd.f32 %v1881_v0, %v1880_v22  ;;  %v2239_v23 = vpack.c.bf16 %v1719_v15, %v1719_v15  ;;  %v2240_v24 = vpack.c.bf16 %v1720_v21, %v1720_v21  ;;  %2055 = vst.msk [vmem:[%s2385_s17 + $0x6c] sm:$0xf] %vm2027_vm5, %v2237_v62  ;;  %2056 = vst.msk [vmem:[%s2385_s17 + $0x70] sm:$0xf] %vm2027_vm5, %v2238_v6 }
 0x1e1   : > { %v1783_v33 = vadd.f32 %v1782_v32, %v1781_v35  ;;  %v1826_v39 = vmul.f32 %v1720_v21, %v1720_v21  ;;  %v1883_v52 = vsel %vm785_vm4, %v1824_v37, 0.0  ;;  %v1784_v56 = vsel %vm785_vm4, %v1721_v42, 0.0 }
 0x1e2   : > { %v1884_v1 = vadd.f32 %v1883_v52, %v1882_v14  ;;  %v2241_v2 = vpack.c.bf16 %v1721_v42, %v1721_v42  ;;  %2057 = vst.msk [vmem:[%s2385_s17 + $0x74] sm:$0xf] %vm2027_vm5, %v2239_v23  ;;  %2058 = vst.msk [vmem:[%s2385_s17 + $0x78] sm:$0xf] %vm2027_vm5, %v2240_v24  ;;  %v1827_v51 = vmul.f32 %v1721_v42, %v1721_v42  ;;  %v1885_v40 = vsel %vm785_vm4, %v1825_v30, 0.0 }
 0x1e3   : > { %v1785_v29 = vadd.f32 %v1784_v56, %v1783_v33  ;;  %v1887_v5 = vsel %vm785_vm4, %v1826_v39, 0.0 }
 0x1e4   : > { %v1886_v36 = vadd.f32 %v1885_v40, %v1884_v1  ;;  %2059 = vst.msk [vmem:[%s2385_s17 + $0x7c] sm:$0xf] %vm2027_vm5, %v2241_v2  ;;  %v1889_v10 = vsel %vm785_vm4, %v1827_v51, 0.0 }
 0x1e5   : > { %v1786_v47 = vrot.slane %v1785_v29, 4 }
 0x1e6   : > { %v1888_v59 = vadd.f32 %v1887_v5, %v1886_v36 }
 0x1e7   : > { %v1787_v28 = vadd.f32 %v1786_v47, %v1785_v29 }
 0x1e8   : > { %v1890_v19 = vadd.f32 %v1889_v10, %v1888_v59 }
 0x1e9   : > { %v1788_v61 = vrot.slane %v1787_v28, 2 }
 0x1ea   : > { %v1891_v60 = vrot.slane %v1890_v19, 4 }
 0x1eb   : > { %v1789_v49 = vadd.f32 %v1788_v61, %v1787_v28 }
 0x1ec   : > { %v1892_v16 = vadd.f32 %v1891_v60, %v1890_v19 }
 0x1ed   : > { %v1790_v17 = vrot.slane %v1789_v49, 1 }
 0x1ee   : > { %v1893_v26 = vrot.slane %v1892_v16, 2 }
 0x1ef   : > { %v1791_v41 = vadd.f32 %v1790_v17, %v1789_v49 }
 0x1f0   : > { %v1894_v11 = vadd.f32 %v1893_v26, %v1892_v16 }
 0x1f1   : > { %v1792_v48 = vadd.f32 %v1791_v41, %v1722_v4 }
 0x1f2   : > { %v1895_v31 = vrot.slane %v1894_v11, 1  ;;  %2063 = sbr.rel (%p2206_p6) target bundleno = 536 (0x218), region = 56 }
 0x1f3   : > { %1794 = vst.msk [vmem:[#allocation3] sm:$0x1] %vm1793_vm6, %v1792_v48 }
 0x1f4   : > { %v1896_v63 = vadd.f32 %v1895_v31, %v1894_v11 }
 0x1f6   : > { %v1897_v38 = vadd.f32 %v1896_v63, %v1795_v46 }
 0x1f8   : > { %1898 = vst.msk [vmem:[#allocation4] sm:$0x1] %vm1793_vm6, %v1897_v38 }
 0x1fa   : > { %v2064_v55 = vld [vmem:[#allocation3] sm:$0x1] }
 0x1fb   : > { %v2065_v25 = vmul.f32 0.001953125, %v2064_v55 }
 0x1fd   : > { %v2068_v57 = vmul.f32 %v2065_v25, %v2065_v25 }
 0x1ff   : > { %v2066_v54 = vld [vmem:[#allocation4] sm:$0x1] }
 0x200   : > { %v2067_v58 = vmul.f32 0.001953125, %v2066_v54 }
 0x202   : > { %v2069_v9 = vsub.f32 %v2067_v58, %v2068_v57 }
 0x204   : > { %v2071_v7 = vadd.f32 1e-05, %v2069_v9 }
 0x206   : > { %2308 = vrsqrt.f32 %v2071_v7 }
 0x210   : > { %v2309_v8 = vpop.eup %2308 }
 0x211   : > { %v2073_v53 = vmul.f32 %v2309_v8, %v2070_v13 }
 0x213   : > { %2074 = vst.msk [vmem:[%s3688_s8] sm:$0x1] %vm1793_vm6, %v2073_v53  ;;  %v2076_v43 = vmul.f32 %v2073_v53, %v2065_v25 }
 0x215   : > { %v2077_v3 = vsub.f32 %v2075_v50, %v2076_v43 }
 0x217   : > { %2078 = vst.msk [vmem:[%s3689_s9] sm:$0x1] %vm1793_vm6, %v2077_v3 }
 0x218 PF: > { %s20_s30 = sadd.s32 1, %s2316_s30  }
 0x219   : > { %p17_p7 = scmp.ge.s32.totalorder %s20_s30, 4  }
 0x21b   :  { %19 = sbr.rel (!%p17_p7) target bundleno = 1 (0x1), region = 104 }

</bundles_post_ra>
